<compile_context>
chip_gen: v5e
topology: v5e:2x2
jax: 0.10.0
libtpu: 0.0.40
codegen_flags: <defaults>
</compile_context>

<pallas_src>
import functools

import jax
import jax.numpy as jnp
from jax import lax
from jax.experimental import pallas as pl
from jax.experimental.pallas import tpu as pltpu


def autopad(k, p=None, d=1):
    if d > 1:
        k = d * (k - 1) + 1 if isinstance(k, int) else [d * (x - 1) + 1 for x in k]
    if p is None:
        p = k // 2 if isinstance(k, int) else [x // 2 for x in k]
    return p


def _round_up(x, m):
    return ((x + m - 1) // m) * m


def _pick_th(oh, ow, n, max_rows=1024):
    """Largest divisor of OH s.t. th*OW <= max_rows; keep >=2 grid steps if N==1."""
    best = 1
    for t in range(1, oh + 1):
        if oh % t:
            continue
        if t * ow > max_rows:
            continue
        if n == 1 and t == oh and oh > 1:
            continue  # leave at least 2 row-tiles so both v7x TCs get work
        best = t
    return best


def _conv_bn_silu_kernel(x_ref, w_ref, scale_ref, bias_ref, o_ref,
                         *, k, s, d, th, ow, c2p):
    # x_ref:     (1, Hp, Wp, C1)  zero-padded NHWC image, bf16 (whole image block)
    # w_ref:     (k*k, C1, C2p)   conv weight, bf16, C2 padded to 128 lanes
    # scale_ref: (1, C2p)         folded BN scale = gamma / sqrt(var + eps), f32
    # bias_ref:  (1, C2p)         folded BN bias  = beta - mean * scale,    f32
    # o_ref:     (1, th, ow, C2p) output row-tile, f32
    i = pl.program_id(1)
    c1 = x_ref.shape[-1]
    row0 = i * th * s  # first padded-input row touched by this output row-tile

    acc = jnp.zeros((th * ow, c2p), jnp.float32)
    # In-kernel im2col: k*k shifted matmuls over the C1 contraction, f32 accumulate.
    for kh in range(k):
        for kw in range(k):
            if s == 1:
                patch = x_ref[0, pl.ds(row0 + kh * d, th), pl.ds(kw * d, ow), :]
            else:
                patch = x_ref[0, pl.ds(row0 + kh * d, th, stride=s),
                              pl.ds(kw * d, ow, stride=s), :]
            p2 = patch.reshape(th * ow, c1)                # (tm, C1) bf16
            acc = acc + jnp.dot(p2, w_ref[kh * k + kw],    # (C1, C2p) bf16
                                preferred_element_type=jnp.float32)

    y = acc * scale_ref[...] + bias_ref[...]               # folded BN (f32)
    y = y * jax.nn.sigmoid(y)                              # SiLU (f32)
    o_ref[...] = y.reshape(1, th, ow, c2p).astype(o_ref.dtype)


@functools.partial(jax.jit, static_argnames=("k", "s", "p", "d"))
def conv_bn_silu(x_nchw, weight, gamma, beta, running_mean, running_var,
                 *, k, s, p, d, eps=1e-5):
    """Equivalent of Conv.forward (eval-mode BN), groups=1."""
    N, C1, H, W = x_nchw.shape
    C2 = weight.shape[0]
    OH = (H + 2 * p - d * (k - 1) - 1) // s + 1
    OW = (W + 2 * p - d * (k - 1) - 1) // s + 1
    Hp, Wp = H + 2 * p, W + 2 * p
    C2p = _round_up(max(C2, 128), 128)

    # Glue (cheap, O(input) data movement only): NHWC + spatial zero-pad + bf16 cast.
    x_nhwc = jnp.transpose(x_nchw, (0, 2, 3, 1)).astype(jnp.bfloat16)
    xpad = jnp.pad(x_nhwc, ((0, 0), (p, p), (p, p), (0, 0)))

    # weight (c2, c1, kh, kw) -> (kh*kw, c1, c2p), bf16, zero-padded output channels.
    w_t = jnp.transpose(weight, (2, 3, 1, 0)).reshape(k * k, C1, C2)
    w_t = jnp.pad(w_t, ((0, 0), (0, 0), (0, C2p - C2))).astype(jnp.bfloat16)

    # Fold BatchNorm (inference stats) into per-channel scale/bias, kept in f32.
    scale = gamma / jnp.sqrt(running_var + eps)
    bias = beta - running_mean * scale
    scale = jnp.pad(scale, (0, C2p - C2)).reshape(1, C2p).astype(jnp.float32)
    bias = jnp.pad(bias, (0, C2p - C2)).reshape(1, C2p).astype(jnp.float32)

    th = _pick_th(OH, OW, N)
    grid = (N, OH // th)

    kern = functools.partial(_conv_bn_silu_kernel,
                             k=k, s=s, d=d, th=th, ow=OW, c2p=C2p)

    out = pl.pallas_call(
        kern,
        out_shape=jax.ShapeDtypeStruct((N, OH, OW, C2p), jnp.float32),
        grid_spec=pltpu.PrefetchScalarGridSpec(
            num_scalar_prefetch=0,
            grid=grid,
            in_specs=[
                pl.BlockSpec((1, Hp, Wp, C1), lambda n, i: (n, 0, 0, 0)),
                pl.BlockSpec((k * k, C1, C2p), lambda n, i: (0, 0, 0)),
                pl.BlockSpec((1, C2p), lambda n, i: (0, 0)),
                pl.BlockSpec((1, C2p), lambda n, i: (0, 0)),
            ],
            out_specs=pl.BlockSpec((1, th, OW, C2p), lambda n, i: (n, i, 0, 0)),
        ),
        compiler_params=pltpu.CompilerParams(
            dimension_semantics=("parallel", "parallel")),
    )(xpad, w_t, scale, bias)

    out = out[..., :C2]  # drop padded output channels
    # TODO(synk): when chaining Convs, keep NHWC (and bf16) between layers and only
    # convert to NCHW f32 at model boundaries; done here to match PyTorch exactly.
    return jnp.transpose(out, (0, 3, 1, 2))


def _reference(x, weight, gamma, beta, running_mean, running_var, *, k, s, p, d, eps=1e-5):
    y = lax.conv_general_dilated(
        x, weight, window_strides=(s, s), padding=((p, p), (p, p)),
        rhs_dilation=(d, d), dimension_numbers=("NCHW", "OIHW", "NCHW"))
    scale = gamma / jnp.sqrt(running_var + eps)
    bias = beta - running_mean * scale
    y = y * scale[None, :, None, None] + bias[None, :, None, None]
    return y * jax.nn.sigmoid(y)


if __name__ == "__main__":
    # Module config: Conv(c1=4, c2=8, k=3, s=1) -> pad = autopad(3) = 1, g=1, d=1.
    # TODO(synk): groups>1 path of nn.Conv2d is not implemented (g=1 only).
    c1, c2, k, s, d = 4, 8, 3, 1, 1
    p = autopad(k, None, d)
    N, H, W = 2, 16, 16

    key = jax.random.PRNGKey(0)
    kx, kw, kg, kb, km, kv = jax.random.split(key, 6)

    x = jax.random.normal(kx, (N, c1, H, W), dtype=jnp.float32)
    weight = jax.random.normal(kw, (c2, c1, k, k), dtype=jnp.float32) * 0.1  # bias=False
    gamma = 1.0 + 0.1 * jax.random.normal(kg, (c2,), dtype=jnp.float32)
    beta = 0.1 * jax.random.normal(kb, (c2,), dtype=jnp.float32)
    running_mean = 0.1 * jax.random.normal(km, (c2,), dtype=jnp.float32)
    running_var = jnp.abs(1.0 + 0.1 * jax.random.normal(kv, (c2,), dtype=jnp.float32))

    out = conv_bn_silu(x, weight, gamma, beta, running_mean, running_var,
                       k=k, s=s, p=p, d=d)
    jax.block_until_ready(out)
    assert out.shape == (N, c2, H, W), out.shape

    ref = _reference(x, weight, gamma, beta, running_mean, running_var,
                     k=k, s=s, p=p, d=d)
    jax.block_until_ready(ref)
    max_err = float(jnp.max(jnp.abs(out - ref)))
    assert max_err < 5e-2, f"max abs err {max_err}"  # bf16 operands, f32 accumulate

    print("KERNEL_OK")
</pallas_src>

<mosaic_0001>
module attributes {stable_mosaic.version = 11 : i64} {
  func.func @_conv_bn_silu_kernel(%arg0: i32, %arg1: i32, %arg2: memref<1x18x18x4xbf16, #tpu.memory_space<vmem>>, %arg3: memref<9x4x128xbf16, #tpu.memory_space<vmem>>, %arg4: memref<1x128xf32, #tpu.memory_space<vmem>>, %arg5: memref<1x128xf32, #tpu.memory_space<vmem>>, %arg6: memref<1x16x16x128xf32, #tpu.memory_space<vmem>>) attributes {dimension_semantics = [#tpu.dimension_semantics<parallel>, #tpu.dimension_semantics<parallel>], iteration_bounds = array<i64: 2, 1>, scalar_prefetch = 0 : i64, scratch_operands = 0 : i64, tpu.core_type = #tpu.core_type<tc>, window_params = [{transform_indices = @transform_0, window_bounds = array<i64: 1, 18, 18, 4>}, {pipeline_mode = #tpu.pipeline_mode<synchronous>, transform_indices = @transform_1, window_bounds = array<i64: 9, 4, 128>}, {pipeline_mode = #tpu.pipeline_mode<synchronous>, transform_indices = @transform_2, window_bounds = array<i64: 1, 128>}, {pipeline_mode = #tpu.pipeline_mode<synchronous>, transform_indices = @transform_3, window_bounds = array<i64: 1, 128>}, {transform_indices = @transform_4, window_bounds = array<i64: 1, 16, 16, 128>}]} {
    %c16_i32 = arith.constant 16 : i32
    %0 = arith.muli %arg1, %c16_i32 : i32
    %c1_i32 = arith.constant 1 : i32
    %1 = arith.muli %0, %c1_i32 : i32
    %cst = arith.constant 0.000000e+00 : f32
    %2 = vector.broadcast %cst : f32 to vector<256x128xf32>
    %c0_i32 = arith.constant 0 : i32
    %3 = arith.addi %1, %c0_i32 : i32
    %c0 = arith.constant 0 : index
    %4 = arith.index_cast %3 : i32 to index
    %c0_0 = arith.constant 0 : index
    %c0_1 = arith.constant 0 : index
    %5 = vector.load %arg2[%c0, %4, %c0_0, %c0_1] : memref<1x18x18x4xbf16, #tpu.memory_space<vmem>>, vector<1x16x16x4xbf16>
    %6 = vector.shape_cast %5 : vector<1x16x16x4xbf16> to vector<16x16x4xbf16>
    %7 = vector.shape_cast %6 : vector<16x16x4xbf16> to vector<256x4xbf16>
    %c0_2 = arith.constant 0 : index
    %c0_3 = arith.constant 0 : index
    %c0_4 = arith.constant 0 : index
    %8 = vector.load %arg3[%c0_2, %c0_3, %c0_4] : memref<9x4x128xbf16, #tpu.memory_space<vmem>>, vector<1x4x128xbf16>
    %9 = vector.shape_cast %8 : vector<1x4x128xbf16> to vector<4x128xbf16>
    %cst_5 = arith.constant dense<0.000000e+00> : vector<256x128xf32>
    %10 = tpu.matmul %7, %9, %cst_5 {dimension_numbers = #tpu.dot_dimension_numbers<[1], [0], [0], [1], [0, 0, 1, 1], [], []>} : vector<256x4xbf16>, vector<4x128xbf16>, vector<256x128xf32> -> vector<256x128xf32>
    %11 = arith.addf %2, %10 : vector<256x128xf32>
    %c0_i32_6 = arith.constant 0 : i32
    %12 = arith.addi %1, %c0_i32_6 : i32
    %c0_7 = arith.constant 0 : index
    %13 = arith.index_cast %12 : i32 to index
    %c1 = arith.constant 1 : index
    %c0_8 = arith.constant 0 : index
    %14 = vector.load %arg2[%c0_7, %13, %c1, %c0_8] : memref<1x18x18x4xbf16, #tpu.memory_space<vmem>>, vector<1x16x16x4xbf16>
    %15 = vector.shape_cast %14 : vector<1x16x16x4xbf16> to vector<16x16x4xbf16>
    %16 = vector.shape_cast %15 : vector<16x16x4xbf16> to vector<256x4xbf16>
    %c1_9 = arith.constant 1 : index
    %c0_10 = arith.constant 0 : index
    %c0_11 = arith.constant 0 : index
    %17 = vector.load %arg3[%c1_9, %c0_10, %c0_11] : memref<9x4x128xbf16, #tpu.memory_space<vmem>>, vector<1x4x128xbf16>
    %18 = vector.shape_cast %17 : vector<1x4x128xbf16> to vector<4x128xbf16>
    %cst_12 = arith.constant dense<0.000000e+00> : vector<256x128xf32>
    %19 = tpu.matmul %16, %18, %cst_12 {dimension_numbers = #tpu.dot_dimension_numbers<[1], [0], [0], [1], [0, 0, 1, 1], [], []>} : vector<256x4xbf16>, vector<4x128xbf16>, vector<256x128xf32> -> vector<256x128xf32>
    %20 = arith.addf %11, %19 : vector<256x128xf32>
    %c0_i32_13 = arith.constant 0 : i32
    %21 = arith.addi %1, %c0_i32_13 : i32
    %c0_14 = arith.constant 0 : index
    %22 = arith.index_cast %21 : i32 to index
    %c2 = arith.constant 2 : index
    %c0_15 = arith.constant 0 : index
    %23 = vector.load %arg2[%c0_14, %22, %c2, %c0_15] : memref<1x18x18x4xbf16, #tpu.memory_space<vmem>>, vector<1x16x16x4xbf16>
    %24 = vector.shape_cast %23 : vector<1x16x16x4xbf16> to vector<16x16x4xbf16>
    %25 = vector.shape_cast %24 : vector<16x16x4xbf16> to vector<256x4xbf16>
    %c2_16 = arith.constant 2 : index
    %c0_17 = arith.constant 0 : index
    %c0_18 = arith.constant 0 : index
    %26 = vector.load %arg3[%c2_16, %c0_17, %c0_18] : memref<9x4x128xbf16, #tpu.memory_space<vmem>>, vector<1x4x128xbf16>
    %27 = vector.shape_cast %26 : vector<1x4x128xbf16> to vector<4x128xbf16>
    %cst_19 = arith.constant dense<0.000000e+00> : vector<256x128xf32>
    %28 = tpu.matmul %25, %27, %cst_19 {dimension_numbers = #tpu.dot_dimension_numbers<[1], [0], [0], [1], [0, 0, 1, 1], [], []>} : vector<256x4xbf16>, vector<4x128xbf16>, vector<256x128xf32> -> vector<256x128xf32>
    %29 = arith.addf %20, %28 : vector<256x128xf32>
    %c1_i32_20 = arith.constant 1 : i32
    %30 = arith.addi %1, %c1_i32_20 : i32
    %c0_21 = arith.constant 0 : index
    %31 = arith.index_cast %30 : i32 to index
    %c0_22 = arith.constant 0 : index
    %c0_23 = arith.constant 0 : index
    %32 = vector.load %arg2[%c0_21, %31, %c0_22, %c0_23] : memref<1x18x18x4xbf16, #tpu.memory_space<vmem>>, vector<1x16x16x4xbf16>
    %33 = vector.shape_cast %32 : vector<1x16x16x4xbf16> to vector<16x16x4xbf16>
    %34 = vector.shape_cast %33 : vector<16x16x4xbf16> to vector<256x4xbf16>
    %c3 = arith.constant 3 : index
    %c0_24 = arith.constant 0 : index
    %c0_25 = arith.constant 0 : index
    %35 = vector.load %arg3[%c3, %c0_24, %c0_25] : memref<9x4x128xbf16, #tpu.memory_space<vmem>>, vector<1x4x128xbf16>
    %36 = vector.shape_cast %35 : vector<1x4x128xbf16> to vector<4x128xbf16>
    %cst_26 = arith.constant dense<0.000000e+00> : vector<256x128xf32>
    %37 = tpu.matmul %34, %36, %cst_26 {dimension_numbers = #tpu.dot_dimension_numbers<[1], [0], [0], [1], [0, 0, 1, 1], [], []>} : vector<256x4xbf16>, vector<4x128xbf16>, vector<256x128xf32> -> vector<256x128xf32>
    %38 = arith.addf %29, %37 : vector<256x128xf32>
    %c1_i32_27 = arith.constant 1 : i32
    %39 = arith.addi %1, %c1_i32_27 : i32
    %c0_28 = arith.constant 0 : index
    %40 = arith.index_cast %39 : i32 to index
    %c1_29 = arith.constant 1 : index
    %c0_30 = arith.constant 0 : index
    %41 = vector.load %arg2[%c0_28, %40, %c1_29, %c0_30] : memref<1x18x18x4xbf16, #tpu.memory_space<vmem>>, vector<1x16x16x4xbf16>
    %42 = vector.shape_cast %41 : vector<1x16x16x4xbf16> to vector<16x16x4xbf16>
    %43 = vector.shape_cast %42 : vector<16x16x4xbf16> to vector<256x4xbf16>
    %c4 = arith.constant 4 : index
    %c0_31 = arith.constant 0 : index
    %c0_32 = arith.constant 0 : index
    %44 = vector.load %arg3[%c4, %c0_31, %c0_32] : memref<9x4x128xbf16, #tpu.memory_space<vmem>>, vector<1x4x128xbf16>
    %45 = vector.shape_cast %44 : vector<1x4x128xbf16> to vector<4x128xbf16>
    %cst_33 = arith.constant dense<0.000000e+00> : vector<256x128xf32>
    %46 = tpu.matmul %43, %45, %cst_33 {dimension_numbers = #tpu.dot_dimension_numbers<[1], [0], [0], [1], [0, 0, 1, 1], [], []>} : vector<256x4xbf16>, vector<4x128xbf16>, vector<256x128xf32> -> vector<256x128xf32>
    %47 = arith.addf %38, %46 : vector<256x128xf32>
    %c1_i32_34 = arith.constant 1 : i32
    %48 = arith.addi %1, %c1_i32_34 : i32
    %c0_35 = arith.constant 0 : index
    %49 = arith.index_cast %48 : i32 to index
    %c2_36 = arith.constant 2 : index
    %c0_37 = arith.constant 0 : index
    %50 = vector.load %arg2[%c0_35, %49, %c2_36, %c0_37] : memref<1x18x18x4xbf16, #tpu.memory_space<vmem>>, vector<1x16x16x4xbf16>
    %51 = vector.shape_cast %50 : vector<1x16x16x4xbf16> to vector<16x16x4xbf16>
    %52 = vector.shape_cast %51 : vector<16x16x4xbf16> to vector<256x4xbf16>
    %c5 = arith.constant 5 : index
    %c0_38 = arith.constant 0 : index
    %c0_39 = arith.constant 0 : index
    %53 = vector.load %arg3[%c5, %c0_38, %c0_39] : memref<9x4x128xbf16, #tpu.memory_space<vmem>>, vector<1x4x128xbf16>
    %54 = vector.shape_cast %53 : vector<1x4x128xbf16> to vector<4x128xbf16>
    %cst_40 = arith.constant dense<0.000000e+00> : vector<256x128xf32>
    %55 = tpu.matmul %52, %54, %cst_40 {dimension_numbers = #tpu.dot_dimension_numbers<[1], [0], [0], [1], [0, 0, 1, 1], [], []>} : vector<256x4xbf16>, vector<4x128xbf16>, vector<256x128xf32> -> vector<256x128xf32>
    %56 = arith.addf %47, %55 : vector<256x128xf32>
    %c2_i32 = arith.constant 2 : i32
    %57 = arith.addi %1, %c2_i32 : i32
    %c0_41 = arith.constant 0 : index
    %58 = arith.index_cast %57 : i32 to index
    %c0_42 = arith.constant 0 : index
    %c0_43 = arith.constant 0 : index
    %59 = vector.load %arg2[%c0_41, %58, %c0_42, %c0_43] : memref<1x18x18x4xbf16, #tpu.memory_space<vmem>>, vector<1x16x16x4xbf16>
    %60 = vector.shape_cast %59 : vector<1x16x16x4xbf16> to vector<16x16x4xbf16>
    %61 = vector.shape_cast %60 : vector<16x16x4xbf16> to vector<256x4xbf16>
    %c6 = arith.constant 6 : index
    %c0_44 = arith.constant 0 : index
    %c0_45 = arith.constant 0 : index
    %62 = vector.load %arg3[%c6, %c0_44, %c0_45] : memref<9x4x128xbf16, #tpu.memory_space<vmem>>, vector<1x4x128xbf16>
    %63 = vector.shape_cast %62 : vector<1x4x128xbf16> to vector<4x128xbf16>
    %cst_46 = arith.constant dense<0.000000e+00> : vector<256x128xf32>
    %64 = tpu.matmul %61, %63, %cst_46 {dimension_numbers = #tpu.dot_dimension_numbers<[1], [0], [0], [1], [0, 0, 1, 1], [], []>} : vector<256x4xbf16>, vector<4x128xbf16>, vector<256x128xf32> -> vector<256x128xf32>
    %65 = arith.addf %56, %64 : vector<256x128xf32>
    %c2_i32_47 = arith.constant 2 : i32
    %66 = arith.addi %1, %c2_i32_47 : i32
    %c0_48 = arith.constant 0 : index
    %67 = arith.index_cast %66 : i32 to index
    %c1_49 = arith.constant 1 : index
    %c0_50 = arith.constant 0 : index
    %68 = vector.load %arg2[%c0_48, %67, %c1_49, %c0_50] : memref<1x18x18x4xbf16, #tpu.memory_space<vmem>>, vector<1x16x16x4xbf16>
    %69 = vector.shape_cast %68 : vector<1x16x16x4xbf16> to vector<16x16x4xbf16>
    %70 = vector.shape_cast %69 : vector<16x16x4xbf16> to vector<256x4xbf16>
    %c7 = arith.constant 7 : index
    %c0_51 = arith.constant 0 : index
    %c0_52 = arith.constant 0 : index
    %71 = vector.load %arg3[%c7, %c0_51, %c0_52] : memref<9x4x128xbf16, #tpu.memory_space<vmem>>, vector<1x4x128xbf16>
    %72 = vector.shape_cast %71 : vector<1x4x128xbf16> to vector<4x128xbf16>
    %cst_53 = arith.constant dense<0.000000e+00> : vector<256x128xf32>
    %73 = tpu.matmul %70, %72, %cst_53 {dimension_numbers = #tpu.dot_dimension_numbers<[1], [0], [0], [1], [0, 0, 1, 1], [], []>} : vector<256x4xbf16>, vector<4x128xbf16>, vector<256x128xf32> -> vector<256x128xf32>
    %74 = arith.addf %65, %73 : vector<256x128xf32>
    %c2_i32_54 = arith.constant 2 : i32
    %75 = arith.addi %1, %c2_i32_54 : i32
    %c0_55 = arith.constant 0 : index
    %76 = arith.index_cast %75 : i32 to index
    %c2_56 = arith.constant 2 : index
    %c0_57 = arith.constant 0 : index
    %77 = vector.load %arg2[%c0_55, %76, %c2_56, %c0_57] : memref<1x18x18x4xbf16, #tpu.memory_space<vmem>>, vector<1x16x16x4xbf16>
    %78 = vector.shape_cast %77 : vector<1x16x16x4xbf16> to vector<16x16x4xbf16>
    %79 = vector.shape_cast %78 : vector<16x16x4xbf16> to vector<256x4xbf16>
    %c8 = arith.constant 8 : index
    %c0_58 = arith.constant 0 : index
    %c0_59 = arith.constant 0 : index
    %80 = vector.load %arg3[%c8, %c0_58, %c0_59] : memref<9x4x128xbf16, #tpu.memory_space<vmem>>, vector<1x4x128xbf16>
    %81 = vector.shape_cast %80 : vector<1x4x128xbf16> to vector<4x128xbf16>
    %cst_60 = arith.constant dense<0.000000e+00> : vector<256x128xf32>
    %82 = tpu.matmul %79, %81, %cst_60 {dimension_numbers = #tpu.dot_dimension_numbers<[1], [0], [0], [1], [0, 0, 1, 1], [], []>} : vector<256x4xbf16>, vector<4x128xbf16>, vector<256x128xf32> -> vector<256x128xf32>
    %83 = arith.addf %74, %82 : vector<256x128xf32>
    %c0_61 = arith.constant 0 : index
    %c0_62 = arith.constant 0 : index
    %84 = vector.load %arg4[%c0_61, %c0_62] : memref<1x128xf32, #tpu.memory_space<vmem>>, vector<1x128xf32>
    %85 = vector.broadcast %84 : vector<1x128xf32> to vector<256x128xf32>
    %86 = arith.mulf %83, %85 : vector<256x128xf32>
    %c0_63 = arith.constant 0 : index
    %c0_64 = arith.constant 0 : index
    %87 = vector.load %arg5[%c0_63, %c0_64] : memref<1x128xf32, #tpu.memory_space<vmem>>, vector<1x128xf32>
    %88 = vector.broadcast %87 : vector<1x128xf32> to vector<256x128xf32>
    %89 = arith.addf %86, %88 : vector<256x128xf32>
    %90 = arith.negf %89 : vector<256x128xf32>
    %91 = math.exp %90 : vector<256x128xf32>
    %cst_65 = arith.constant 1.000000e+00 : f32
    %92 = vector.broadcast %cst_65 : f32 to vector<256x128xf32>
    %93 = arith.addf %92, %91 : vector<256x128xf32>
    %94 = arith.divf %92, %93 : vector<256x128xf32>
    %95 = arith.mulf %89, %94 : vector<256x128xf32>
    %96 = vector.shape_cast %95 : vector<256x128xf32> to vector<1x16x16x128xf32>
    %c0_66 = arith.constant 0 : index
    %c0_67 = arith.constant 0 : index
    %c0_68 = arith.constant 0 : index
    %c0_69 = arith.constant 0 : index
    %97 = vector.load %arg6[%c0_66, %c0_67, %c0_68, %c0_69] : memref<1x16x16x128xf32, #tpu.memory_space<vmem>>, vector<1x16x16x128xf32>
    tpu.vector_store %arg6[%c0_66, %c0_67, %c0_68, %c0_69], %96 {strides = array<i32>} : memref<1x16x16x128xf32, #tpu.memory_space<vmem>>, vector<1x16x16x128xf32>,
    return
  }
  func.func @transform_0(%arg0: i32, %arg1: i32) -> (i32, i32, i32, i32) {
    %c0_i32 = arith.constant 0 : i32
    %c0_i32_0 = arith.constant 0 : i32
    %c0_i32_1 = arith.constant 0 : i32
    %c0_i32_2 = arith.constant 0 : i32
    return %arg0, %c0_i32, %c0_i32_0, %c0_i32_1 : i32, i32, i32, i32
  }
  func.func @transform_1(%arg0: i32, %arg1: i32) -> (i32, i32, i32) {
    %c0_i32 = arith.constant 0 : i32
    %c0_i32_0 = arith.constant 0 : i32
    %c0_i32_1 = arith.constant 0 : i32
    %c0_i32_2 = arith.constant 0 : i32
    return %c0_i32, %c0_i32_0, %c0_i32_1 : i32, i32, i32
  }
  func.func @transform_2(%arg0: i32, %arg1: i32) -> (i32, i32) {
    %c0_i32 = arith.constant 0 : i32
    %c0_i32_0 = arith.constant 0 : i32
    %c0_i32_1 = arith.constant 0 : i32
    return %c0_i32, %c0_i32_0 : i32, i32
  }
  func.func @transform_3(%arg0: i32, %arg1: i32) -> (i32, i32) {
    %c0_i32 = arith.constant 0 : i32
    %c0_i32_0 = arith.constant 0 : i32
    %c0_i32_1 = arith.constant 0 : i32
    return %c0_i32, %c0_i32_0 : i32, i32
  }
  func.func @transform_4(%arg0: i32, %arg1: i32) -> (i32, i32, i32, i32) {
    %c0_i32 = arith.constant 0 : i32
    %c0_i32_0 = arith.constant 0 : i32
    %c0_i32_1 = arith.constant 0 : i32
    return %arg0, %arg1, %c0_i32, %c0_i32_0 : i32, i32, i32, i32
  }
}

</mosaic_0001>

<bundles_post_ra>
// kernel: conv_bn_silu.1
= control target key start
LH: loop header
LB: loop body
LE: loop exit
PB: predicated region body
PF: predicated region fallthrough
CT: control target
= control target key end

     0   :  { %s5922_s15 = smov 0   ;;  %s5924_s16 = smov 0   ;;  %s7871_s0 = inlined_call_operand.vmem [shape: bf16[2,18,18,4], index: 0, kind: input, shape index: {}]   ;;  %s7872_s1 = inlined_call_operand.vmem [shape: bf16[9,4,128], index: 1, kind: input, shape index: {}]   ;;  %s7873_s2 = inlined_call_operand.vmem [shape: f32[1,128], index: 2, kind: input, shape index: {}]   ;;  %s7874_s3 = inlined_call_operand.vmem [shape: f32[1,128], index: 3, kind: input, shape index: {}]   ;;  %s7875_s4 = inlined_call_operand.vmem [shape: f32[2,16,16,128], index: 4, kind: output, shape index: {}]  }
   0x1   :  { %s5926_s17 = smov 0  }
   0x2 LB: > { %s26_s18 = sadd.s32 1, %s5891_s16  ;;  %p4990_p0 = scmp.ge.s32.totalorder %s5895_s17, 1  ;;  %s5895_s17 = sphi %s5926_s17, %s14_s17   ;;  %s5891_s16 = sphi %s5924_s16, %s7937_s16   ;;  %s5887_s15 = sphi %s5922_s15, %s7936_s15  }
   0x3   : > { %p28_p1 = scmp.ge.s32.totalorder %s26_s18, 2  ;;  %p176_p2 = scmp.lt.s32.totalorder %s5895_s17, 3 }
   0x5   : > { %s7939_s18 = smov (%p28_p1, %s26_s18), 0  ;;  %p177_p3 = pnand %p4990_p0, %p176_p2 }
   0x7   : > { %180 = sbr.rel (%p177_p3) target bundleno = 811 (0x32b), region = 36 }
   0xc   : > { %v4994_v0 = vld [vmem:[%s7872_s1 + $0x2] sm:$0x3]  ;;  %vm763_vm0 = vcmask 1041408   ;;  %p207_p4 = scmp.lt.s32.totalorder %s5887_s15, 1  ;;  %v5107_v2 = vld [vmem:[%s7872_s1 + $0x4] sm:$0x3] }
   0xd   : > { %v765_v1 = vsel %vm763_vm0, %v4994_v0, 0  ;;  %v1338_v3 = vsel %vm763_vm0, %v5107_v2, 0  ;;  %v5156_v4 = vld [vmem:[%s7872_s1 + $0x6] sm:$0x3]  ;;  %v260_v5 = vld [vmem:[%s7872_s1] sm:$0x3] }
   0xe   : > { %5661 = vmatpush.bf16.msra.mxu1 %v765_v1  ;;  %5662 = vmatpush.bf16.msra.mxu2 %v765_v1  ;;  %s7941_s15 = smov (!%p207_p4, %s5887_s15), 1  ;;  %v5285_v6 = vld [vmem:[%s7872_s1 + $0x8] sm:$0x3]  ;;  %v1628_v7 = vsel %vm763_vm0, %v5156_v4, 0  ;;  %v985_v8 = vsel %vm763_vm0, %v260_v5, 0  ;;  %vm714_vm4 = vcmask 31744  }
   0xf   : > { %5663 = vmatpush.bf16.msra.mxu3 %v765_v1  ;;  %774 = vmatpush.bf16.msra.mxu0 %v765_v1  ;;  %s5664_s29 = smul.u32 216, %s7941_s15  ;;  %v2282_v9 = vsel %vm763_vm0, %v5285_v6, 0  ;;  %vm277_vm1 = vsmask.f32 3328  ;;  %vm278_vm2 = vsmask.f32 7440 }
  0x10   : > { %vm5978_vm3 = vmor %vm277_vm1, %vm278_vm2  ;;  %vm1124_vm5 = vcmask 1042432   ;;  %vm1125_vm6 = vcmask 1046532   ;;  %s5612_s23 = sshll.u32 %s7941_s15, 8 }
  0x11   : > { %s5966_s6 = scalar_lea.vmem %s7871_s0, %s5664_s29  ;;  %vm6152_vm7 = vmor %vm1124_vm5, %vm1125_vm6  ;;  %s7183_s25 = scalar_lea.vmem %s7875_s4, %s5612_s23 }
  0x12   : > { %1347 = vmatpush.bf16.msrb.mxu2 %v1338_v3  ;;  %994 = vmatpush.bf16.msrb.mxu1 %v985_v8  ;;  %v236_v10 = vld [vmem:[%s5966_s6 + $0x30] sm:$0xf]  ;;  %v237_v11 = vld [vmem:[%s5966_s6 + $0x34] sm:$0xf]  ;;  %v265_v12 = vld [vmem:[%s5966_s6 + $0x38] sm:$0x1] }
  0x13   : > { %1637 = vmatpush.bf16.msrb.mxu3 %v1628_v7  ;;  %2291 = vmatpush.bf16.msrb.mxu0 %v2282_v9  ;;  %v377_v13 = vshrl.u32 %v236_v10, 16  ;;  %v380_v14 = vshll.u32 %v236_v10, 16  ;;  %v386_v15 = vshll.u32 %v237_v11, 16  ;;  %v390_v16 = vshrl.u32 %v237_v11, 16  ;;  %v244_v17 = vld [vmem:[%s5966_s6 + $0x60] sm:$0xf] }
  0x14   : > { %v396_v18 = vshll.u32 %v265_v12, 16  ;;  %v245_v19 = vld [vmem:[%s5966_s6 + $0x64] sm:$0xf]  ;;  %v269_v20 = vld [vmem:[%s5966_s6 + $0x68] sm:$0x1]  ;;  %v473_v21 = vshrl.u32 %v244_v17, 16 }
  0x15   : > { %v379_v22 = vrot.slane %v377_v13, 4  ;;  %v382_v23 = vrot.slane %v380_v14, 5  ;;  %v388_v24 = vrot.slane %v386_v15, 5  ;;  %v392_v25 = vrot.slane %v390_v16, 4  ;;  %v252_v26 = vld [vmem:[%s5966_s6 + $0x90] sm:$0xf] }
  0x16   : > { %v398_v27 = vrot.slane %v396_v18, 5  ;;  %v475_v28 = vrot.slane %v473_v21, 4  ;;  %v476_v29 = vshll.u32 %v244_v17, 16  ;;  %v482_v30 = vshll.u32 %v245_v19, 16  ;;  %v253_v35 = vld [vmem:[%s5966_s6 + $0x94] sm:$0xf] }
  0x17   : > { %v383_v31 = vor.u32 %v382_v23, %v379_v22  ;;  %v393_v32 = vor.u32 %v392_v25, %v388_v24  ;;  %v486_v33 = vshrl.u32 %v245_v19, 16  ;;  %v492_v34 = vshll.u32 %v269_v20, 16  ;;  %v273_v45 = vld [vmem:[%s5966_s6 + $0x98] sm:$0x1]  ;;  %v228_v61 = vld [vmem:[%s5966_s6] sm:$0xf] }
  0x18   : > { %v478_v37 = vrot.slane %v476_v29, 5  ;;  %v484_v38 = vrot.slane %v482_v30, 5  ;;  %v569_v39 = vshrl.u32 %v252_v26, 16  ;;  %v572_v47 = vshll.u32 %v252_v26, 16  ;;  %v5991_v1 = vld [vmem:[%s5966_s6 + $0x4] sm:$0xf] }
  0x19   : > { %v384_v40 = vrot.slane %v383_v31, 4  ;;  %v394_v41 = vrot.slane %v393_v32, 4  ;;  %v488_v42 = vrot.slane %v486_v33, 4  ;;  %v494_v43 = vrot.slane %v492_v34, 5  ;;  %v5994_v2 = vld [vmem:[%s5966_s6 + $0x8] sm:$0x1] }
  0x1a   : > { %v479_v44 = vor.u32 %v478_v37, %v475_v28  ;;  %v571_v46 = vrot.slane %v569_v39, 4  ;;  %v578_v48 = vshll.u32 %v253_v35, 16  ;;  %v582_v52 = vshrl.u32 %v253_v35, 16  ;;  %v238_v19 = vld [vmem:[%s5966_s6 + $0x3c] sm:$0xf] }
  0x1b   : > { %v389_v49 = vsel %vm5978_vm3, %v384_v40, %v388_v24  ;;  %v399_v50 = vsel %vm5978_vm3, %v394_v41, %v398_v27  ;;  %v489_v51 = vor.u32 %v488_v42, %v484_v38  ;;  %v574_v56 = vrot.slane %v572_v47, 5  ;;  %v6006_v20 = vld [vmem:[%s5966_s6 + $0x40] sm:$0xf]  ;;  %v6011_v25 = vld [vmem:[%s5966_s6 + $0x44] sm:$0x1] }
  0x1c   : > { %v674_v53 = vunpack.c.l.b16 %v389_v49  ;;  %v675_v54 = vunpack.c.l.b16 %v399_v50  ;;  %v480_v55 = vrot.slane %v479_v44, 4  ;;  %v580_v58 = vrot.slane %v578_v48, 5  ;;  %v246_v33 = vld [vmem:[%s5966_s6 + $0x6c] sm:$0xf]  ;;  %v270_v47 = vld [vmem:[%s5966_s6 + $0x74] sm:$0x1] }
  0x1d   : > { %v490_v57 = vrot.slane %v489_v51, 4  ;;  %v584_v59 = vrot.slane %v582_v52, 4  ;;  %v588_v60 = vshll.u32 %v273_v45, 16  ;;  %v575_v0 = vor.u32 %v574_v56, %v571_v46 }
  0x1e   : > { %v702_v62 = vpack.c.b16 %v675_v54, %v674_v53  ;;  %v485_v63 = vsel %vm5978_vm3, %v480_v55, %v484_v38  ;;  %v281_v9 = vshrl.u32 %v228_v61, 16  ;;  %v284_v10 = vshll.u32 %v228_v61, 16  ;;  %v254_v61 = vld [vmem:[%s5966_s6 + $0x9c] sm:$0xf] }
  0x1f   : > { %v495_v3 = vsel %vm5978_vm3, %v490_v57, %v494_v43  ;;  %v682_v4 = vunpack.c.l.b16 %v485_v63  ;;  %v585_v5 = vor.u32 %v584_v59, %v580_v58  ;;  %v590_v6 = vrot.slane %v588_v60, 5  ;;  %v247_v43 = vld [vmem:[%s5966_s6 + $0x70] sm:$0xf] }
  0x20   : > { %4999 = vmatmul.msk.bf16.vlgmr.msra.gmra.mxu1 %vm714_vm4, %v702_v62  ;;  %v683_v7 = vunpack.c.l.b16 %v495_v3  ;;  %v576_v8 = vrot.slane %v575_v0, 4  ;;  %v290_v12 = vshll.u32 %v5991_v1, 16  ;;  %v294_v13 = vshrl.u32 %v5991_v1, 16  ;;  %v255_v3 = vld [vmem:[%s5966_s6 + $0xa0] sm:$0xf] }
  0x21   : > { %v586_v11 = vrot.slane %v585_v5, 4  ;;  %v300_v14 = vshll.u32 %v5994_v2, 16  ;;  %v283_v17 = vrot.slane %v281_v9, 4  ;;  %v286_v18 = vrot.slane %v284_v10, 5 }
  0x22   : > { %v706_v15 = vpack.c.b16 %v683_v7, %v682_v4  ;;  %v581_v16 = vsel %vm5978_vm3, %v576_v8, %v580_v58  ;;  %v292_v23 = vrot.slane %v290_v12, 5  ;;  %v296_v24 = vrot.slane %v294_v13, 4  ;;  %v274_v8 = vld [vmem:[%s5966_s6 + $0xa4] sm:$0x1] }
  0x23   : > { %v591_v21 = vsel %vm5978_vm3, %v586_v11, %v590_v6  ;;  %v690_v22 = vunpack.c.l.b16 %v581_v16  ;;  %v287_v27 = vor.u32 %v286_v18, %v283_v17  ;;  %v302_v28 = vrot.slane %v300_v14, 5 }
  0x24   : > { %5003 = vmatmul.msk.bf16.vlgmr.msra.gmra.mxu2 %vm714_vm4, %v706_v15  ;;  %v691_v26 = vunpack.c.l.b16 %v591_v21  ;;  %v297_v29 = vor.u32 %v296_v24, %v292_v23  ;;  %v401_v30 = vshrl.u32 %v238_v19, 16  ;;  %v404_v31 = vshll.u32 %v238_v19, 16 }
  0x25   : > { %v410_v32 = vshll.u32 %v6006_v20, 16  ;;  %v288_v35 = vrot.slane %v287_v27, 4  ;;  %v414_v37 = vshrl.u32 %v6006_v20, 16  ;;  %v420_v38 = vshll.u32 %v6011_v25, 16 }
  0x26   : > { %v710_v34 = vpack.c.b16 %v691_v26, %v690_v22  ;;  %v298_v39 = vrot.slane %v297_v29, 4  ;;  %v403_v40 = vrot.slane %v401_v30, 4  ;;  %v406_v41 = vrot.slane %v404_v31, 5  ;;  %v230_v22 = vld [vmem:[%s5966_s6 + $0xc] sm:$0xf] }
  0x27   : > { %v412_v42 = vrot.slane %v410_v32, 5  ;;  %v293_v44 = vsel %vm5978_vm3, %v288_v35, %v292_v23  ;;  %v416_v45 = vrot.slane %v414_v37, 4  ;;  %v422_v46 = vrot.slane %v420_v38, 5  ;;  %v6040_v32 = vld [vmem:[%s5966_s6 + $0x14] sm:$0x1] }
  0x28   : > { %5007 = vmatmul.msk.bf16.vlgmr.msra.gmra.mxu3 %vm714_vm4, %v710_v34  ;;  %v497_v48 = vshrl.u32 %v246_v33, 16  ;;  %v303_v49 = vsel %vm5978_vm3, %v298_v39, %v302_v28  ;;  %v666_v50 = vunpack.c.l.b16 %v293_v44  ;;  %v407_v51 = vor.u32 %v406_v41, %v403_v40  ;;  %v6037_v28 = vld [vmem:[%s5966_s6 + $0x10] sm:$0xf] }
  0x29   : > { %v500_v52 = vshll.u32 %v246_v33, 16  ;;  %v667_v53 = vunpack.c.l.b16 %v303_v49  ;;  %v417_v54 = vor.u32 %v416_v45, %v412_v42  ;;  %v506_v56 = vshll.u32 %v247_v43, 16 }
  0x2a   : > { %v499_v55 = vrot.slane %v497_v48, 4  ;;  %v408_v57 = vrot.slane %v407_v51, 4  ;;  %v510_v59 = vshrl.u32 %v247_v43, 16  ;;  %v516_v60 = vshll.u32 %v270_v47, 16  ;;  %v6050_v47 = vld [vmem:[%s5966_s6 + $0x4c] sm:$0xf] }
  0x2b   : > { %v502_v58 = vrot.slane %v500_v52, 5  ;;  %v698_v62 = vpack.c.b16 %v667_v53, %v666_v50  ;;  %v418_v63 = vrot.slane %v417_v54, 4  ;;  %v508_v0 = vrot.slane %v506_v56, 5  ;;  %v6055_v56 = vld [vmem:[%s5966_s6 + $0x50] sm:$0x1] }
  0x2c   : > { %v413_v4 = vsel %vm5978_vm3, %v408_v57, %v412_v42  ;;  %v512_v6 = vrot.slane %v510_v59, 4  ;;  %v518_v7 = vrot.slane %v516_v60, 5  ;;  %v593_v11 = vshrl.u32 %v254_v61, 16  ;;  %v240_v42 = vld [vmem:[%s5966_s6 + $0x48] sm:$0xf] }
  0x2d   : > { %v503_v5 = vor.u32 %v502_v58, %v499_v55  ;;  %4995 = vmatmul.msk.bf16.vlgmr.msra.gmra.mxu0 %vm714_vm4, %v698_v62  ;;  %v423_v9 = vsel %vm5978_vm3, %v418_v63, %v422_v46  ;;  %v676_v10 = vunpack.c.l.b16 %v413_v4  ;;  %v596_v12 = vshll.u32 %v254_v61, 16 }
  0x2e   : > { %v677_v13 = vunpack.c.l.b16 %v423_v9  ;;  %v513_v15 = vor.u32 %v512_v6, %v508_v0  ;;  %v602_v16 = vshll.u32 %v255_v3, 16  ;;  %v595_v17 = vrot.slane %v593_v11, 4 }
  0x2f   : > { %v504_v14 = vrot.slane %v503_v5, 4  ;;  %v598_v18 = vrot.slane %v596_v12, 5  ;;  %v606_v19 = vshrl.u32 %v255_v3, 16  ;;  %v612_v21 = vshll.u32 %v274_v8, 16  ;;  %v248_v3 = vld [vmem:[%s5966_s6 + $0x78] sm:$0xf] }
  0x30   : > { %v703_v23 = vpack.c.b16 %v677_v13, %v676_v10  ;;  %v514_v26 = vrot.slane %v513_v15, 4  ;;  %v604_v27 = vrot.slane %v602_v16, 5  ;;  %v305_v35 = vshrl.u32 %v230_v22, 16  ;;  %v249_v8 = vld [vmem:[%s5966_s6 + $0x7c] sm:$0xf] }
  0x31   : > { %v509_v24 = vsel %vm5978_vm3, %v504_v14, %v508_v0  ;;  %v599_v30 = vor.u32 %v598_v18, %v595_v17  ;;  %v608_v31 = vrot.slane %v606_v19, 4  ;;  %v614_v34 = vrot.slane %v612_v21, 5  ;;  %v271_v16 = vld [vmem:[%s5966_s6 + $0x80] sm:$0x1] }
  0x32   : > { %v684_v29 = vunpack.c.l.b16 %v509_v24  ;;  %5000 = vmatmul.msk.bf16.gmra.mxu1 %vm714_vm4, %v703_v23  ;;  %v519_v33 = vsel %vm5978_vm3, %v514_v26, %v518_v7  ;;  %v308_v37 = vshll.u32 %v230_v22, 16  ;;  %v314_v41 = vshll.u32 %v6037_v28, 16 }
  0x33   : > { %v685_v38 = vunpack.c.l.b16 %v519_v33  ;;  %v600_v39 = vrot.slane %v599_v30, 4  ;;  %v609_v40 = vor.u32 %v608_v31, %v604_v27  ;;  %v307_v43 = vrot.slane %v305_v35, 4 }
  0x34   : > { %v310_v44 = vrot.slane %v308_v37, 5  ;;  %v318_v45 = vshrl.u32 %v6037_v28, 16  ;;  %v324_v46 = vshll.u32 %v6040_v32, 16  ;;  %v316_v51 = vrot.slane %v314_v41, 5 }
  0x35   : > { %v707_v48 = vpack.c.b16 %v685_v38, %v684_v29  ;;  %v605_v49 = vsel %vm5978_vm3, %v600_v39, %v604_v27  ;;  %v610_v50 = vrot.slane %v609_v40, 4  ;;  %v425_v58 = vshrl.u32 %v240_v42, 16  ;;  %v257_v39 = vld [vmem:[%s5966_s6 + $0xac] sm:$0xf]  ;;  %v275_v40 = vld [vmem:[%s5966_s6 + $0xb0] sm:$0x1] }
  0x36   : > { %v692_v52 = vunpack.c.l.b16 %v605_v49  ;;  %v311_v53 = vor.u32 %v310_v44, %v307_v43  ;;  %v320_v54 = vrot.slane %v318_v45, 4  ;;  %v326_v55 = vrot.slane %v324_v46, 5 }
  0x37   : > { %5004 = vmatmul.msk.bf16.gmra.mxu2 %vm714_vm4, %v707_v48  ;;  %v615_v57 = vsel %vm5978_vm3, %v610_v50, %v614_v34  ;;  %v428_v59 = vshll.u32 %v240_v42, 16  ;;  %v434_v60 = vshll.u32 %v6050_v47, 16  ;;  %v438_v0 = vshrl.u32 %v6050_v47, 16  ;;  %v256_v34 = vld [vmem:[%s5966_s6 + $0xa8] sm:$0xf] }
  0x38   : > { %v693_v61 = vunpack.c.l.b16 %v615_v57  ;;  %v312_v62 = vrot.slane %v311_v53, 4  ;;  %v321_v63 = vor.u32 %v320_v54, %v316_v51  ;;  %v427_v4 = vrot.slane %v425_v58, 4 }
  0x39   : > { %v430_v5 = vrot.slane %v428_v59, 5  ;;  %v436_v6 = vrot.slane %v434_v60, 5  ;;  %v444_v7 = vshll.u32 %v6055_v56, 16  ;;  %v440_v12 = vrot.slane %v438_v0, 4  ;;  %v232_v59 = vld [vmem:[%s5966_s6 + $0x18] sm:$0xf] }
  0x3a   : > { %v711_v9 = vpack.c.b16 %v693_v61, %v692_v52  ;;  %v317_v10 = vsel %vm5978_vm3, %v312_v62, %v316_v51  ;;  %v322_v11 = vrot.slane %v321_v63, 4  ;;  %v521_v17 = vshrl.u32 %v248_v3, 16  ;;  %v6083_v63 = vld [vmem:[%s5966_s6 + $0x1c] sm:$0xf]  ;;  %v6086_v0 = vld [vmem:[%s5966_s6 + $0x20] sm:$0x1] }
  0x3b   : > { %v668_v13 = vunpack.c.l.b16 %v317_v10  ;;  %v431_v14 = vor.u32 %v430_v5, %v427_v4  ;;  %v446_v15 = vrot.slane %v444_v7, 5  ;;  %v441_v19 = vor.u32 %v440_v12, %v436_v6 }
  0x3c   : > { %5008 = vmatmul.msk.bf16.gmra.mxu3 %vm714_vm4, %v711_v9  ;;  %v327_v18 = vsel %vm5978_vm3, %v322_v11, %v326_v55  ;;  %v524_v21 = vshll.u32 %v248_v3, 16  ;;  %v530_v22 = vshll.u32 %v249_v8, 16  ;;  %v523_v26 = vrot.slane %v521_v17, 4 }
  0x3d   : > { %v669_v23 = vunpack.c.l.b16 %v327_v18  ;;  %v432_v24 = vrot.slane %v431_v14, 4  ;;  %v534_v27 = vshrl.u32 %v249_v8, 16  ;;  %v442_v29 = vrot.slane %v441_v19, 4 }
  0x3e   : > { %v526_v30 = vrot.slane %v524_v21, 5  ;;  %v532_v31 = vrot.slane %v530_v22, 5  ;;  %v540_v33 = vshll.u32 %v271_v16, 16  ;;  %v617_v48 = vshrl.u32 %v256_v34, 16  ;;  %v6096_v21 = vld [vmem:[%s5966_s6 + $0x58] sm:$0xf] }
  0x3f   : > { %v699_v35 = vpack.c.b16 %v669_v23, %v668_v13  ;;  %v437_v37 = vsel %vm5978_vm3, %v432_v24, %v436_v6  ;;  %v536_v38 = vrot.slane %v534_v27, 4  ;;  %v447_v41 = vsel %vm5978_vm3, %v442_v29, %v446_v15  ;;  %v242_v15 = vld [vmem:[%s5966_s6 + $0x54] sm:$0xf]  ;;  %v6101_v27 = vld [vmem:[%s5966_s6 + $0x5c] sm:$0x1] }
  0x40   : > { %v678_v42 = vunpack.c.l.b16 %v437_v37  ;;  %v527_v43 = vor.u32 %v526_v30, %v523_v26  ;;  %v542_v44 = vrot.slane %v540_v33, 5  ;;  %v679_v45 = vunpack.c.l.b16 %v447_v41 }
  0x41   : > { %4996 = vmatmul.msk.bf16.gmra.mxu0 %vm714_vm4, %v699_v35  ;;  %v537_v46 = vor.u32 %v536_v38, %v532_v31  ;;  %v620_v49 = vshll.u32 %v256_v34, 16  ;;  %v626_v51 = vshll.u32 %v257_v39, 16  ;;  %v630_v52 = vshrl.u32 %v257_v39, 16  ;;  %v250_v39 = vld [vmem:[%s5966_s6 + $0x84] sm:$0xf] }
  0x42   : > { %v528_v50 = vrot.slane %v527_v43, 4  ;;  %v636_v53 = vshll.u32 %v275_v40, 16  ;;  %v704_v54 = vpack.c.b16 %v679_v45, %v678_v42  ;;  %v619_v57 = vrot.slane %v617_v48, 4 }
  0x43   : > { %v538_v55 = vrot.slane %v537_v46, 4  ;;  %v622_v58 = vrot.slane %v620_v49, 5  ;;  %v628_v61 = vrot.slane %v626_v51, 5  ;;  %v632_v62 = vrot.slane %v630_v52, 4  ;;  %v251_v49 = vld [vmem:[%s5966_s6 + $0x88] sm:$0xf] }
  0x44   : > { %v533_v60 = vsel %vm5978_vm3, %v528_v50, %v532_v31  ;;  %5001 = vmatmul.msk.bf16.gmra.mxu1 %vm714_vm4, %v704_v54  ;;  %v638_v6 = vrot.slane %v636_v53, 5  ;;  %v329_v9 = vshrl.u32 %v232_v59, 16  ;;  %v332_v10 = vshll.u32 %v232_v59, 16  ;;  %v272_v53 = vld [vmem:[%s5966_s6 + $0x8c] sm:$0x1] }
  0x45   : > { %v543_v3 = vsel %vm5978_vm3, %v538_v55, %v542_v44  ;;  %v686_v4 = vunpack.c.l.b16 %v533_v60  ;;  %v623_v5 = vor.u32 %v622_v58, %v619_v57  ;;  %v633_v8 = vor.u32 %v632_v62, %v628_v61 }
  0x46   : > { %v687_v7 = vunpack.c.l.b16 %v543_v3  ;;  %v338_v12 = vshll.u32 %v6083_v63, 16  ;;  %v342_v13 = vshrl.u32 %v6083_v63, 16  ;;  %v348_v14 = vshll.u32 %v6086_v0, 16 }
  0x47   : > { %v624_v11 = vrot.slane %v623_v5, 4  ;;  %v634_v17 = vrot.slane %v633_v8, 4  ;;  %v331_v18 = vrot.slane %v329_v9, 4  ;;  %v334_v19 = vrot.slane %v332_v10, 5  ;;  %v258_v8 = vld [vmem:[%s5966_s6 + $0xb4] sm:$0xf] }
  0x48   : > { %v708_v16 = vpack.c.b16 %v687_v7, %v686_v4  ;;  %v340_v23 = vrot.slane %v338_v12, 5  ;;  %v344_v24 = vrot.slane %v342_v13, 4  ;;  %v350_v26 = vrot.slane %v348_v14, 5  ;;  %v259_v12 = vld [vmem:[%s5966_s6 + $0xb8] sm:$0xf] }
  0x49   : > { %v629_v22 = vsel %vm5978_vm3, %v624_v11, %v628_v61  ;;  %v639_v29 = vsel %vm5978_vm3, %v634_v17, %v638_v6  ;;  %v335_v31 = vor.u32 %v334_v19, %v331_v18  ;;  %v449_v33 = vshrl.u32 %v242_v15, 16  ;;  %v276_v17 = vld [vmem:[%s5966_s6 + $0xbc] sm:$0x1] }
  0x4a   : > { %5005 = vmatmul.msk.bf16.gmra.mxu2 %vm714_vm4, %v708_v16  ;;  %v694_v30 = vunpack.c.l.b16 %v629_v22  ;;  %v695_v34 = vunpack.c.l.b16 %v639_v29  ;;  %v345_v35 = vor.u32 %v344_v24, %v340_v23  ;;  %v452_v37 = vshll.u32 %v242_v15, 16 }
  0x4b   : > { %v458_v38 = vshll.u32 %v6096_v21, 16  ;;  %v336_v40 = vrot.slane %v335_v31, 4  ;;  %v451_v41 = vrot.slane %v449_v33, 4  ;;  %v462_v42 = vshrl.u32 %v6096_v21, 16 }
  0x4c   : > { %v468_v43 = vshll.u32 %v6101_v27, 16  ;;  %v712_v44 = vpack.c.b16 %v695_v34, %v694_v30  ;;  %v346_v45 = vrot.slane %v345_v35, 4  ;;  %v454_v46 = vrot.slane %v452_v37, 5  ;;  %v234_v37 = vld [vmem:[%s5966_s6 + $0x24] sm:$0xf] }
  0x4d   : > { %v460_v48 = vrot.slane %v458_v38, 5  ;;  %v341_v50 = vsel %vm5978_vm3, %v336_v40, %v340_v23  ;;  %v464_v51 = vrot.slane %v462_v42, 4  ;;  %v545_v54 = vshrl.u32 %v250_v39, 16  ;;  %v6129_v42 = vld [vmem:[%s5966_s6 + $0x28] sm:$0xf] }
  0x4e   : > { %v470_v52 = vrot.slane %v468_v43, 5  ;;  %5009 = vmatmul.msk.bf16.gmra.mxu3 %vm714_vm4, %v712_v44  ;;  %v351_v55 = vsel %vm5978_vm3, %v346_v45, %v350_v26  ;;  %v670_v57 = vunpack.c.l.b16 %v341_v50  ;;  %v455_v58 = vor.u32 %v454_v46, %v451_v41 }
  0x4f   : > { %v548_v59 = vshll.u32 %v250_v39, 16  ;;  %v671_v60 = vunpack.c.l.b16 %v351_v55  ;;  %v465_v61 = vor.u32 %v464_v51, %v460_v48  ;;  %v547_v62 = vrot.slane %v545_v54, 4 }
  0x50   : > { %v554_v3 = vshll.u32 %v251_v49, 16  ;;  %v456_v4 = vrot.slane %v455_v58, 4  ;;  %v558_v6 = vshrl.u32 %v251_v49, 16  ;;  %v564_v7 = vshll.u32 %v272_v53, 16 }
  0x51   : > { %v550_v5 = vrot.slane %v548_v59, 5  ;;  %v700_v9 = vpack.c.b16 %v671_v60, %v670_v57  ;;  %v466_v10 = vrot.slane %v465_v61, 4  ;;  %v641_v22 = vshrl.u32 %v258_v8, 16  ;;  %v1076_v61 = vld [vmem:[%s5966_s6] sm:$0xe] }
  0x52   : > { %v556_v11 = vrot.slane %v554_v3, 5  ;;  %v461_v13 = vsel %vm5978_vm3, %v456_v4, %v460_v48  ;;  %v560_v15 = vrot.slane %v558_v6, 4  ;;  %v566_v16 = vrot.slane %v564_v7, 5  ;;  %v6133_v48 = vld [vmem:[%s5966_s6 + $0x2c] sm:$0x1] }
  0x53   : > { %v551_v14 = vor.u32 %v550_v5, %v547_v62  ;;  %4997 = vmatmul.msk.bf16.gmra.mxu0 %vm714_vm4, %v700_v9  ;;  %v471_v18 = vsel %vm5978_vm3, %v466_v10, %v470_v52  ;;  %v680_v19 = vunpack.c.l.b16 %v461_v13  ;;  %v644_v23 = vshll.u32 %v258_v8, 16  ;;  %v5237_v6 = vld [vmem:[%s5966_s6 + $0xc] sm:$0xf] }
  0x54   : > { %v681_v24 = vunpack.c.l.b16 %v471_v18  ;;  %v561_v29 = vor.u32 %v560_v15, %v556_v11  ;;  %v650_v30 = vshll.u32 %v259_v12, 16  ;;  %v643_v31 = vrot.slane %v641_v22, 4 }
  0x55   : > { %v552_v26 = vrot.slane %v551_v14, 4  ;;  %v646_v33 = vrot.slane %v644_v23, 5  ;;  %v654_v34 = vshrl.u32 %v259_v12, 16  ;;  %v660_v35 = vshll.u32 %v276_v17, 16  ;;  %v5238_v12 = vld [vmem:[%s5966_s6 + $0x10] sm:$0xf] }
  0x56   : > { %v705_v38 = vpack.c.b16 %v681_v24, %v680_v19  ;;  %v562_v40 = vrot.slane %v561_v29, 4  ;;  %v652_v41 = vrot.slane %v650_v30, 5  ;;  %v1132_v43 = vrot.slane %v5994_v2, 5 }
  0x57   : > { %v557_v39 = vsel %vm5978_vm3, %v552_v26, %v556_v11  ;;  %v647_v45 = vor.u32 %v646_v33, %v643_v31  ;;  %v656_v46 = vrot.slane %v654_v34, 4  ;;  %v662_v50 = vrot.slane %v660_v35, 5  ;;  %v5383_v11 = vld [vmem:[%s7872_s1 + $0xc] sm:$0x3] }
  0x58   : > { %v688_v44 = vunpack.c.l.b16 %v557_v39  ;;  %5002 = vmatmul.msk.bf16.gmra.mxu1 %vm714_vm4, %v705_v38  ;;  %v567_v49 = vsel %vm5978_vm3, %v562_v40, %v566_v16  ;;  %v353_v51 = vshrl.u32 %v234_v37, 16  ;;  %v356_v52 = vshll.u32 %v234_v37, 16  ;;  %v5239_v38 = vld [vmem:[%s5966_s6 + $0x14] sm:$0x1] }
  0x59   : > { %v689_v53 = vunpack.c.l.b16 %v567_v49  ;;  %v648_v54 = vrot.slane %v647_v45, 4  ;;  %v657_v55 = vor.u32 %v656_v46, %v652_v41  ;;  %v362_v2 = vshll.u32 %v6129_v42, 16  ;;  %v5512_v45 = vld [vmem:[%s7872_s1 + $0xe] sm:$0x3] }
  0x5a   : > { %v355_v57 = vrot.slane %v353_v51, 4  ;;  %v358_v58 = vrot.slane %v356_v52, 5  ;;  %v366_v59 = vshrl.u32 %v6129_v42, 16  ;;  %v372_v60 = vshll.u32 %v6133_v48, 16  ;;  %v5613_v51 = vld [vmem:[%s5966_s6] sm:$0xff] }
  0x5b   : > { %v709_v62 = vpack.c.b16 %v689_v53, %v688_v44  ;;  %v653_v3 = vsel %vm5978_vm3, %v648_v54, %v652_v41  ;;  %v658_v4 = vrot.slane %v657_v55, 4  ;;  %v364_v5 = vrot.slane %v362_v2, 5  ;;  %v5561_v2 = vld [vmem:[%s7872_s1 + $0x10] sm:$0x3] }
  0x5c   : > { %v696_v7 = vunpack.c.l.b16 %v653_v3  ;;  %v359_v8 = vor.u32 %v358_v58, %v355_v57  ;;  %v368_v9 = vrot.slane %v366_v59, 4  ;;  %v374_v10 = vrot.slane %v372_v60, 5 }
  0x5d   : > { %5006 = vmatmul.msk.bf16.gmra.mxu2 %vm714_vm4, %v709_v62  ;;  %v663_v13 = vsel %vm5978_vm3, %v658_v4, %v662_v50  ;;  %v5091_v14 = vrot.slane %v1076_v61, 9  ;;  %v1129_v19 = vrot.slane %v5991_v1, 5  ;;  %v2970_v22 = vsel %vm763_vm0, %v5383_v11, 0  ;;  %v5334_v50 = vld [vmem:[%s7872_s1 + $0xa] sm:$0x3] }
  0x5e   : > { %v697_v15 = vunpack.c.l.b16 %v663_v13  ;;  %v360_v16 = vrot.slane %v359_v8, 4  ;;  %v369_v17 = vor.u32 %v368_v9, %v364_v5  ;;  %v1800_v23 = vshrl.u32 %v5237_v6, 16  ;;  %2979 = vmatpush.bf16.msra.mxu2 %v2970_v22  ;;  %v1077_v8 = vld [vmem:[%s5966_s6 + $0xc] sm:$0xe] }
  0x5f   : > { %v1803_v24 = vshll.u32 %v5237_v6, 16  ;;  %v1809_v26 = vshll.u32 %v5238_v12, 16  ;;  %v1130_v33 = vsel %vm6152_vm7, %v5091_v14, %v1129_v19  ;;  %v1131_v35 = vrot.slane %v1129_v19, 4  ;;  %v5241_v6 = vld [vmem:[%s5966_s6 + $0x1c] sm:$0xf] }
  0x60   : > { %v713_v29 = vpack.c.b16 %v697_v15, %v696_v7  ;;  %v365_v30 = vsel %vm5978_vm3, %v360_v16, %v364_v5  ;;  %v370_v31 = vrot.slane %v369_v17, 4  ;;  %v1241_v37 = vunpack.c.l.b16 %v1130_v33  ;;  %v5240_v5 = vld [vmem:[%s5966_s6 + $0x18] sm:$0xf]  ;;  %v5629_v15 = vld [vmem:[%s5966_s6 + $0xc] sm:$0xff] }
  0x61   : > { %v672_v34 = vunpack.c.l.b16 %v365_v30  ;;  %v1802_v1 = vrot.slane %v1800_v23, 4  ;;  %v1805_v40 = vrot.slane %v1803_v24, 5  ;;  %v1811_v41 = vrot.slane %v1809_v26, 5  ;;  %v5242_v30 = vld [vmem:[%s5966_s6 + $0x20] sm:$0x1] }
  0x62   : > { %5010 = vmatmul.msk.bf16.gmra.mxu3 %vm714_vm4, %v713_v29  ;;  %v375_v39 = vsel %vm5978_vm3, %v370_v31, %v374_v10  ;;  %v1813_v44 = vshrl.u32 %v5238_v12, 16  ;;  %v1133_v49 = vsel %vm6152_vm7, %v1131_v35, %v1132_v43  ;;  %v1819_v55 = vshll.u32 %v5239_v38, 16 }
  0x63   : > { %v673_v46 = vunpack.c.l.b16 %v375_v39  ;;  %v1242_v52 = vunpack.c.l.b16 %v1133_v49  ;;  %v1806_v53 = vor.u32 %v1805_v40, %v1802_v1  ;;  %v3624_v58 = vsel %vm763_vm0, %v5512_v45, 0  ;;  %v5243_v45 = vld [vmem:[%s5966_s6 + $0x24] sm:$0xf]  ;;  %v5244_v49 = vld [vmem:[%s5966_s6 + $0x28] sm:$0xf] }
  0x64   : > { %v1815_v54 = vrot.slane %v1813_v44, 4  ;;  %3633 = vmatpush.bf16.msra.mxu3 %v3624_v58  ;;  %v2680_v60 = vsel %vm763_vm0, %v5334_v50, 0  ;;  %v4022_v61 = vsel %vm763_vm0, %v5561_v2, 0  ;;  %v1821_v4 = vrot.slane %v1819_v55, 5  ;;  %v5630_v58 = vld [vmem:[%s5966_s6 + $0x18] sm:$0xff] }
  0x65   : > { %v701_v57 = vpack.c.b16 %v673_v46, %v672_v34  ;;  %v1273_v43 = vpack.c.b16 %v1242_v52, %v1241_v37  ;;  %2689 = vmatpush.bf16.msra.mxu1 %v2680_v60  ;;  %v1807_v62 = vrot.slane %v1806_v53, 4  ;;  %4031 = vmatpush.bf16.msra.mxu0 %v4022_v61  ;;  %v1136_v7 = vrot.slane %v6037_v28, 5  ;;  %v1078_v52 = vld [vmem:[%s5966_s6 + $0x18] sm:$0xe] }
  0x66   : > { %v1816_v59 = vor.u32 %v1815_v54, %v1811_v41  ;;  %v1824_v9 = vshrl.u32 %v5240_v5, 16  ;;  %v1827_v10 = vshll.u32 %v5240_v5, 16  ;;  %v1833_v13 = vshll.u32 %v5241_v6, 16 }
  0x67   : > { %4998 = vmatmul.msk.bf16.gmra.mxu0 %vm714_vm4, %v701_v57  ;;  %v1812_v11 = vsel %vm5978_vm3, %v1807_v62, %v1811_v41  ;;  %v1837_v14 = vshrl.u32 %v5241_v6, 16  ;;  %v5092_v16 = vrot.slane %v1077_v8, 9  ;;  %v1138_v17 = vrot.slane %v1136_v7, 4  ;;  %v5245_v6 = vld [vmem:[%s5966_s6 + $0x2c] sm:$0x1] }
  0x68   : > { %5075 = vmatmul.msk.bf16.vlgmr.msrb.gmra.mxu1 %vm714_vm4, %v5613_v51  ;;  %v1817_v3 = vrot.slane %v1816_v59, 4  ;;  %v1139_v28 = vrot.slane %v6040_v32, 5  ;;  %v2185_v19 = vunpack.c.l.b16 %v1812_v11  ;;  %v1826_v23 = vrot.slane %v1824_v9, 4  ;;  %v5614_v32 = vld [vmem:[%s5966_s6 + $0xc] sm:$0xff] }
  0x69   : > { %v1829_v24 = vrot.slane %v1827_v10, 5  ;;  %v1835_v26 = vrot.slane %v1833_v13, 5  ;;  %v1839_v29 = vrot.slane %v1837_v14, 4  ;;  %v1137_v31 = vsel %vm6152_vm7, %v5092_v16, %v1136_v7  ;;  %v5247_v16 = vld [vmem:[%s5966_s6 + $0x34] sm:$0xf] }
  0x6a   : > { %v1822_v12 = vsel %vm5978_vm3, %v1817_v3, %v1821_v4  ;;  %v1140_v33 = vsel %vm6152_vm7, %v1138_v17, %v1139_v28  ;;  %v1843_v38 = vshll.u32 %v5242_v30, 16  ;;  %v1243_v1 = vunpack.c.l.b16 %v1137_v31 }
  0x6b   : > { %v2186_v22 = vunpack.c.l.b16 %v1822_v12  ;;  %v1830_v35 = vor.u32 %v1829_v24, %v1826_v23  ;;  %v1840_v37 = vor.u32 %v1839_v29, %v1835_v26  ;;  %v1244_v39 = vunpack.c.l.b16 %v1140_v33  ;;  %v1079_v24 = vld [vmem:[%s5966_s6 + $0x24] sm:$0xe] }
  0x6c   : > { %v1845_v44 = vrot.slane %v1843_v38, 5  ;;  %v1143_v50 = vrot.slane %v6083_v63, 5  ;;  %v1848_v53 = vshrl.u32 %v5243_v45, 16  ;;  %v1851_v55 = vshll.u32 %v5243_v45, 16  ;;  %v5248_v45 = vld [vmem:[%s5966_s6 + $0x38] sm:$0x1] }
  0x6d   : > { %5108 = vmatmul.msk.bf16.vlgmr.msrb.gmra.mxu2 %vm714_vm4, %v1273_v43  ;;  %v2217_v34 = vpack.c.b16 %v2186_v22, %v2185_v19  ;;  %v1831_v40 = vrot.slane %v1830_v35, 4  ;;  %v1841_v41 = vrot.slane %v1840_v37, 4  ;;  %v1274_v46 = vpack.c.b16 %v1244_v39, %v1243_v1 }
  0x6e   : > { %v1857_v2 = vshll.u32 %v5244_v49, 16  ;;  %v1861_v57 = vshrl.u32 %v5244_v49, 16  ;;  %v5093_v43 = vrot.slane %v1078_v52, 9  ;;  %v1145_v59 = vrot.slane %v1143_v50, 4 }
  0x6f   : > { %v1836_v51 = vsel %vm5978_vm3, %v1831_v40, %v1835_v26  ;;  %v1846_v54 = vsel %vm5978_vm3, %v1841_v41, %v1845_v44  ;;  %v1146_v63 = vrot.slane %v6086_v0, 5  ;;  %v1850_v62 = vrot.slane %v1848_v53, 4  ;;  %v5615_v0 = vld [vmem:[%s5966_s6 + $0x18] sm:$0xff]  ;;  %v5616_v53 = vld [vmem:[%s5966_s6 + $0x24] sm:$0xff] }
  0x70   : > { %v2187_v60 = vunpack.c.l.b16 %v1836_v51  ;;  %v2188_v61 = vunpack.c.l.b16 %v1846_v54  ;;  %v1853_v3 = vrot.slane %v1851_v55, 5  ;;  %v1859_v4 = vrot.slane %v1857_v2, 5 }
  0x71   : > { %v1863_v5 = vrot.slane %v1861_v57, 4  ;;  %v1144_v7 = vsel %vm6152_vm7, %v5093_v43, %v1143_v50  ;;  %v1147_v8 = vsel %vm6152_vm7, %v1145_v59, %v1146_v63  ;;  %v1867_v12 = vshll.u32 %v5245_v6, 16  ;;  %v5249_v43 = vld [vmem:[%s5966_s6 + $0x3c] sm:$0xf]  ;;  %v5250_v59 = vld [vmem:[%s5966_s6 + $0x40] sm:$0xf] }
  0x72   : > { %5221 = vmatmul.msk.bf16.vlgmr.msrb.gmra.mxu3 %vm714_vm4, %v5629_v15  ;;  %v2218_v9 = vpack.c.b16 %v2188_v61, %v2187_v60  ;;  %v1854_v10 = vor.u32 %v1853_v3, %v1850_v62  ;;  %v1245_v13 = vunpack.c.l.b16 %v1144_v7  ;;  %v1246_v14 = vunpack.c.l.b16 %v1147_v8  ;;  %v5246_v15 = vld [vmem:[%s5966_s6 + $0x30] sm:$0xf]  ;;  %v5819_v62 = vld [vmem:[%s5966_s6 + $0x34] sm:$0xf] }
  0x73   : > { %v1864_v11 = vor.u32 %v1863_v5, %v1859_v4  ;;  %v1869_v19 = vrot.slane %v1867_v12, 5  ;;  %v1150_v23 = vrot.slane %v6129_v42, 5  ;;  %v1872_v26 = vshrl.u32 %v5246_v15, 16  ;;  %v5631_v42 = vld [vmem:[%s5966_s6 + $0x24] sm:$0xff]  ;;  %v1080_v5 = vld [vmem:[%s5966_s6 + $0x30] sm:$0xe] }
  0x74   : > { %v1855_v17 = vrot.slane %v1854_v10, 4  ;;  %v1275_v22 = vpack.c.b16 %v1246_v14, %v1245_v13  ;;  %v1875_v29 = vshll.u32 %v5246_v15, 16  ;;  %v1881_v30 = vshll.u32 %v5247_v16, 16  ;;  %v5632_v10 = vld [vmem:[%s5966_s6 + $0x30] sm:$0xff]  ;;  %v5820_v14 = vld [vmem:[%s5966_s6 + $0x38] sm:$0x1] }
  0x75   : > { %v1865_v28 = vrot.slane %v1864_v11, 4  ;;  %v1885_v31 = vshrl.u32 %v5247_v16, 16  ;;  %v5094_v35 = vrot.slane %v1079_v24, 9  ;;  %v1153_v37 = vrot.slane %v6133_v48, 5 }
  0x76   : > { %v1860_v33 = vsel %vm5978_vm3, %v1855_v17, %v1859_v4  ;;  %v1874_v38 = vrot.slane %v1872_v26, 4  ;;  %v1877_v1 = vrot.slane %v1875_v29, 5  ;;  %v1883_v39 = vrot.slane %v1881_v30, 5 }
  0x77   : > { %5286 = vmatmul.msk.bf16.vlgmr.msrb.gmra.mxu0 %vm714_vm4, %v2217_v34  ;;  %v1870_v34 = vsel %vm5978_vm3, %v1865_v28, %v1869_v19  ;;  %v1887_v40 = vrot.slane %v1885_v31, 4  ;;  %v2189_v41 = vunpack.c.l.b16 %v1860_v33  ;;  %v1891_v51 = vshll.u32 %v5248_v45, 16  ;;  %v5617_v33 = vld [vmem:[%s5966_s6 + $0x30] sm:$0xff] }
  0x78   : > { %5076 = vmatmul.msk.bf16.gmra.mxu1 %vm714_vm4, %v5614_v32  ;;  %v1152_v32 = vrot.slane %v1150_v23, 4  ;;  %v2190_v44 = vunpack.c.l.b16 %v1870_v34  ;;  %v1878_v48 = vor.u32 %v1877_v1, %v1874_v38  ;;  %v1157_v3 = vrot.slane %v5819_v62, 5 }
  0x79   : > { %v1888_v50 = vor.u32 %v1887_v40, %v1883_v39  ;;  %v1896_v6 = vshrl.u32 %v5249_v43, 16  ;;  %v1899_v7 = vshll.u32 %v5249_v43, 16  ;;  %v1905_v8 = vshll.u32 %v5250_v59, 16 }
  0x7a   : > { %v1154_v49 = vsel %vm6152_vm7, %v1152_v32, %v1153_v37  ;;  %v2219_v52 = vpack.c.b16 %v2190_v44, %v2189_v41  ;;  %v1879_v2 = vrot.slane %v1878_v48, 4  ;;  %v5095_v12 = vrot.slane %v1080_v5, 9  ;;  %v5252_v41 = vld [vmem:[%s5966_s6 + $0x48] sm:$0xf]  ;;  %v5253_v44 = vld [vmem:[%s5966_s6 + $0x4c] sm:$0xf] }
  0x7b   : > { %v1248_v55 = vunpack.c.l.b16 %v1154_v49  ;;  %v1889_v57 = vrot.slane %v1888_v50, 4  ;;  %v1159_v13 = vrot.slane %v1157_v3, 4  ;;  %v1160_v15 = vrot.slane %v5820_v14, 5  ;;  %v1081_v50 = vld [vmem:[%s5966_s6 + $0x3c] sm:$0xe] }
  0x7c   : > { %v1884_v60 = vsel %vm5978_vm3, %v1879_v2, %v1883_v39  ;;  %v1898_v16 = vrot.slane %v1896_v6, 4  ;;  %v1901_v17 = vrot.slane %v1899_v7, 5  ;;  %v1907_v28 = vrot.slane %v1905_v8, 5  ;;  %v5254_v5 = vld [vmem:[%s5966_s6 + $0x50] sm:$0x1] }
  0x7d   : > { %5109 = vmatmul.msk.bf16.gmra.mxu2 %vm714_vm4, %v1274_v46  ;;  %v1151_v46 = vsel %vm6152_vm7, %v5094_v35, %v1150_v23  ;;  %v1158_v23 = vsel %vm6152_vm7, %v5095_v12, %v1157_v3  ;;  %v1161_v24 = vsel %vm6152_vm7, %v1159_v13, %v1160_v15  ;;  %v1939_v12 = vshll.u32 %v5254_v5, 16  ;;  %v5255_v15 = vld [vmem:[%s5966_s6 + $0x54] sm:$0xf] }
  0x7e   : > { %v1247_v54 = vunpack.c.l.b16 %v1151_v46  ;;  %v1902_v29 = vor.u32 %v1901_v17, %v1898_v16  ;;  %v1249_v35 = vunpack.c.l.b16 %v1158_v23  ;;  %v1250_v32 = vunpack.c.l.b16 %v1161_v24  ;;  %v5256_v16 = vld [vmem:[%s5966_s6 + $0x58] sm:$0xf] }
  0x7f   : > { %v1164_v46 = vrot.slane %v6006_v20, 5  ;;  %v1167_v20 = vrot.slane %v6011_v25, 5 }
  0x80   : > { %v1276_v63 = vpack.c.b16 %v1248_v55, %v1247_v54  ;;  %v1277_v40 = vpack.c.b16 %v1250_v32, %v1249_v35  ;;  %v1933_v54 = vshrl.u32 %v5253_v44, 16  ;;  %v5633_v55 = vld [vmem:[%s5966_s6 + $0x3c] sm:$0xff]  ;;  %v1082_v35 = vld [vmem:[%s5966_s6 + $0x48] sm:$0xe] }
  0x82   : > { %5222 = vmatmul.msk.bf16.gmra.mxu3 %vm714_vm4, %v5630_v58  ;;  %v1893_v58 = vrot.slane %v1891_v51, 5  ;;  %v1920_v51 = vshrl.u32 %v5252_v41, 16  ;;  %v1935_v3 = vrot.slane %v1933_v54, 4 }
  0x84   : > { %v1894_v61 = vsel %vm5978_vm3, %v1889_v57, %v1893_v58  ;;  %v5096_v57 = vrot.slane %v1081_v50, 9  ;;  %v1166_v58 = vrot.slane %v1164_v46, 4 }
  0x85   : > { %v2192_v11 = vunpack.c.l.b16 %v1894_v61 }
  0x86   : > { %v1165_v6 = vsel %vm6152_vm7, %v5096_v57, %v1164_v46  ;;  %v1168_v7 = vsel %vm6152_vm7, %v1166_v58, %v1167_v20 }
  0x87   : > { %5287 = vmatmul.msk.bf16.gmra.mxu0 %vm714_vm4, %v2218_v9  ;;  %v1909_v9 = vshrl.u32 %v5250_v59, 16  ;;  %v1251_v13 = vunpack.c.l.b16 %v1165_v6  ;;  %v1252_v14 = vunpack.c.l.b16 %v1168_v7 }
  0x88   : > { %5077 = vmatmul.msk.bf16.gmra.mxu1 %vm714_vm4, %v5615_v0  ;;  %v2191_v0 = vunpack.c.l.b16 %v1884_v60  ;;  %v1922_v60 = vrot.slane %v1920_v51, 4 }
  0x89   : > { %v1911_v19 = vrot.slane %v1909_v9, 4  ;;  %v1278_v23 = vpack.c.b16 %v1252_v14, %v1251_v13  ;;  %v1178_v14 = vrot.slane %v6096_v21, 5  ;;  %v1181_v21 = vrot.slane %v6101_v27, 5 }
  0x8a   : > { %v2220_v26 = vpack.c.b16 %v2192_v11, %v2191_v0  ;;  %v5618_v0 = vld [vmem:[%s5966_s6 + $0x3c] sm:$0xff] }
  0x8b   : > { %v1912_v30 = vor.u32 %v1911_v19, %v1907_v28 }
  0x8d   : > { %5110 = vmatmul.msk.bf16.gmra.mxu2 %vm714_vm4, %v1275_v22  ;;  %v5251_v22 = vld [vmem:[%s5966_s6 + $0x44] sm:$0x1]  ;;  %v1913_v38 = vrot.slane %v1912_v30, 4  ;;  %v1953_v30 = vshll.u32 %v5256_v16, 16 }
  0x8e   : > { %v1915_v31 = vshll.u32 %v5251_v22, 16  ;;  %v1941_v22 = vrot.slane %v1939_v12, 5 }
  0x90   : > { %v1917_v1 = vrot.slane %v1915_v31, 5  ;;  %v1171_v31 = vrot.slane %v6050_v47, 5  ;;  %v5097_v47 = vrot.slane %v1082_v35, 9  ;;  %v1180_v35 = vrot.slane %v1178_v14, 4 }
  0x92   : > { %5223 = vmatmul.msk.bf16.gmra.mxu3 %vm714_vm4, %v5631_v42  ;;  %v1903_v42 = vrot.slane %v1902_v29, 4  ;;  %v1918_v48 = vsel %vm5978_vm3, %v1913_v38, %v1917_v1  ;;  %v1947_v29 = vshll.u32 %v5255_v15, 16  ;;  %v1172_v58 = vsel %vm6152_vm7, %v5097_v47, %v1171_v31 }
  0x93   : > { %v2194_v59 = vunpack.c.l.b16 %v1918_v48  ;;  %v1174_v48 = vrot.slane %v6055_v56, 5 }
  0x94   : > { %v1908_v49 = vsel %vm5978_vm3, %v1903_v42, %v1907_v28 }
  0x95   : > { %v2193_v43 = vunpack.c.l.b16 %v1908_v49  ;;  %v1173_v49 = vrot.slane %v1171_v31, 4 }
  0x97   : > { %5288 = vmatmul.msk.bf16.gmra.mxu0 %vm714_vm4, %v2219_v52  ;;  %v1923_v52 = vshll.u32 %v5252_v41, 16  ;;  %v2221_v25 = vpack.c.b16 %v2194_v59, %v2193_v43  ;;  %v1955_v41 = vrot.slane %v1953_v30, 5  ;;  %v1175_v20 = vsel %vm6152_vm7, %v1173_v49, %v1174_v48  ;;  %v5635_v30 = vld [vmem:[%s5966_s6 + $0x54] sm:$0xff] }
  0x98   : > { %5078 = vmatmul.msk.bf16.gmra.mxu1 %vm714_vm4, %v5616_v53  ;;  %v1929_v53 = vshll.u32 %v5253_v44, 16  ;;  %v5634_v44 = vld [vmem:[%s5966_s6 + $0x48] sm:$0xff]  ;;  %v1182_v48 = vsel %vm6152_vm7, %v1180_v35, %v1181_v21 }
  0x99   : > { %v1925_v61 = vrot.slane %v1923_v52, 5 }
  0x9a   : > { %v1931_v62 = vrot.slane %v1929_v53, 5  ;;  %v5257_v53 = vld [vmem:[%s5966_s6 + $0x5c] sm:$0x1] }
  0x9b   : > { %v1963_v43 = vshll.u32 %v5257_v53, 16  ;;  %v5620_v53 = vld [vmem:[%s5966_s6 + $0x54] sm:$0xff] }
  0x9c   : > { %v1936_v11 = vor.u32 %v1935_v3, %v1931_v62 }
  0x9d   : > { %v6250_v4 = vpop.f32.mrf.mxu1  ;;  %5111 = vmatmul.msk.bf16.gmra.mxu2 %vm714_vm4, %v1276_v63  ;;  %v1965_v7 = vrot.slane %v1963_v43, 5 }
  0x9e   : > { %v1937_v19 = vrot.slane %v1936_v11, 4 }
  0xa0   : > { %v1942_v42 = vsel %vm5978_vm3, %v1937_v19, %v1941_v22 }
  0xa1   : > { %v2196_v52 = vunpack.c.l.b16 %v1942_v42 }
  0xa2   : > { %5224 = vmatmul.msk.bf16.gmra.mxu3 %vm714_vm4, %v5632_v10  ;;  %v1926_v10 = vor.u32 %v1925_v61, %v1922_v60  ;;  %v5619_v60 = vld [vmem:[%s5966_s6 + $0x48] sm:$0xff]  ;;  %v1253_v61 = vunpack.c.l.b16 %v1172_v58 }
  0xa4   : > { %v1927_v28 = vrot.slane %v1926_v10, 4  ;;  %v5259_v10 = vld [vmem:[%s5966_s6 + $0x64] sm:$0xf] }
  0xa5   : > { %v6263_v34 = vpop.f32.mrf.mxu1  ;;  %v1977_v22 = vshll.u32 %v5259_v10, 16 }
  0xa6   : > { %v1932_v32 = vsel %vm5978_vm3, %v1927_v28, %v1931_v62  ;;  %v1254_v62 = vunpack.c.l.b16 %v1175_v20  ;;  %v1256_v20 = vunpack.c.l.b16 %v1182_v48 }
  0xa7   : > { %v6265_v37 = vpop.f32.mrf.mxu2  ;;  %5289 = vmatmul.msk.bf16.gmra.mxu0 %vm714_vm4, %v2220_v26  ;;  %v1944_v26 = vshrl.u32 %v5255_v15, 16  ;;  %v2195_v51 = vunpack.c.l.b16 %v1932_v32 }
  0xa8   : > { %5079 = vmatmul.msk.bf16.gmra.mxu1 %vm714_vm4, %v5617_v33  ;;  %v1957_v33 = vshrl.u32 %v5256_v16, 16  ;;  %v1279_v11 = vpack.c.b16 %v1254_v62, %v1253_v61  ;;  %v1083_v16 = vld [vmem:[%s5966_s6 + $0x54] sm:$0xe]  ;;  %v5261_v62 = vld [vmem:[%s5966_s6 + $0x6c] sm:$0xf] }
  0xa9   : > { %v1946_v1 = vrot.slane %v1944_v26, 4  ;;  %v2222_v59 = vpack.c.b16 %v2196_v52, %v2195_v51 }
  0xaa   : > { %v6269_v39 = vpop.f32.mrf.mxu0  ;;  %v1959_v50 = vrot.slane %v1957_v33, 4  ;;  %v5098_v33 = vrot.slane %v1083_v16, 9  ;;  %v1995_v16 = vshll.u32 %v5261_v62, 16 }
  0xab   : > { %v6273_v45 = vpop.f32.mrf.mxu3 }
  0xac   : > { %v1960_v56 = vor.u32 %v1959_v50, %v1955_v41  ;;  %v1179_v49 = vsel %vm6152_vm7, %v5098_v33, %v1178_v14  ;;  %v1992_v14 = vshrl.u32 %v5261_v62, 16 }
  0xad   : > { %5112 = vmatmul.msk.bf16.gmra.mxu2 %vm714_vm4, %v1277_v40  ;;  %v1949_v40 = vrot.slane %v1947_v29, 5  ;;  %v1255_v58 = vunpack.c.l.b16 %v1179_v49  ;;  %v5263_v49 = vld [vmem:[%s5966_s6 + $0x74] sm:$0x1] }
  0xae   : > { %v1961_v6 = vrot.slane %v1960_v56, 4 }
  0xaf   : > { %v6283_v2 = vpop.f32.mrf.mxu1  ;;  %v6286_v63 = vpop.f32.mrf.mxu2  ;;  %v1280_v61 = vpack.c.b16 %v1256_v20, %v1255_v58  ;;  %v2011_v20 = vshll.u32 %v5263_v49, 16  ;;  %v5637_v49 = vld [vmem:[%s5966_s6 + $0x6c] sm:$0xff] }
  0xb0   : > { %v1966_v13 = vsel %vm5978_vm3, %v1961_v6, %v1965_v7  ;;  %v5821_v7 = vld [vmem:[%s5966_s6 + $0x64] sm:$0xf] }
  0xb1   : > { %v2198_v31 = vunpack.c.l.b16 %v1966_v13  ;;  %v1084_v13 = vld [vmem:[%s5966_s6 + $0x60] sm:$0xe] }
  0xb2   : > { %5225 = vmatmul.msk.bf16.gmra.mxu3 %vm714_vm4, %v5633_v55  ;;  %v6294_v8 = vpop.f32.mrf.mxu0  ;;  %v1950_v55 = vor.u32 %v1949_v40, %v1946_v1  ;;  %v1979_v1 = vrot.slane %v1977_v22, 5 }
  0xb3   : > { %v6296_v9 = vpop.f32.mrf.mxu3 }
  0xb4   : > { %v1951_v5 = vrot.slane %v1950_v55, 4 }
  0xb6   : > { %v1956_v12 = vsel %vm5978_vm3, %v1951_v5, %v1955_v41  ;;  %v5262_v5 = vld [vmem:[%s5966_s6 + $0x70] sm:$0xf] }
  0xb7   : > { %5290 = vmatmul.msk.bf16.gmra.mxu0 %vm714_vm4, %v2221_v25  ;;  %v6302_v17 = vpop.f32.mrf.mxu1  ;;  %v2197_v29 = vunpack.c.l.b16 %v1956_v12 }
  0xb8   : > { %5080 = vmatmul.msk.bf16.gmra.mxu1 %vm714_vm4, %v5618_v0  ;;  %v5258_v0 = vld [vmem:[%s5966_s6 + $0x60] sm:$0xf] }
  0xb9   : > { %v1968_v28 = vshrl.u32 %v5258_v0, 16  ;;  %v1971_v19 = vshll.u32 %v5258_v0, 16  ;;  %v2223_v50 = vpack.c.b16 %v2198_v31, %v2197_v29  ;;  %v1185_v0 = vrot.slane %v5821_v7, 5 }
  0xba   : > { %v6305_v24 = vpop.f32.mrf.mxu2  ;;  %v5099_v31 = vrot.slane %v1084_v13, 9 }
  0xbb   : > { %v1970_v32 = vrot.slane %v1968_v28, 4  ;;  %v1973_v42 = vrot.slane %v1971_v19, 5  ;;  %v2001_v28 = vshll.u32 %v5262_v5, 16  ;;  %v2005_v19 = vshrl.u32 %v5262_v5, 16 }
  0xbc   : > { %v1187_v33 = vrot.slane %v1185_v0, 4  ;;  %v1186_v48 = vsel %vm6152_vm7, %v5099_v31, %v1185_v0 }
  0xbd   : > { %5113 = vmatmul.msk.bf16.gmra.mxu2 %vm714_vm4, %v1278_v23  ;;  %v1981_v23 = vshrl.u32 %v5259_v10, 16  ;;  %v1974_v27 = vor.u32 %v1973_v42, %v1970_v32  ;;  %v1994_v42 = vrot.slane %v1992_v14, 4  ;;  %v5265_v14 = vld [vmem:[%s5966_s6 + $0x7c] sm:$0xf] }
  0xbe   : > { %v6313_v38 = vpop.f32.mrf.mxu0 }
  0xbf   : > { %v6317_v46 = vpop.f32.mrf.mxu3  ;;  %v1983_v40 = vrot.slane %v1981_v23, 4  ;;  %v1975_v43 = vrot.slane %v1974_v27, 4  ;;  %v5822_v23 = vld [vmem:[%s5966_s6 + $0x68] sm:$0x1] }
  0xc0   : > { %v1188_v29 = vrot.slane %v5822_v23, 5 }
  0xc1   : > { %v6321_v54 = vpop.f32.mrf.mxu1  ;;  %v1984_v51 = vor.u32 %v1983_v40, %v1979_v1  ;;  %v2003_v40 = vrot.slane %v2001_v28, 5 }
  0xc2   : > { %5226 = vmatmul.msk.bf16.gmra.mxu3 %vm714_vm4, %v5634_v44  ;;  %v6324_v57 = vpop.f32.mrf.mxu2  ;;  %v5260_v44 = vld [vmem:[%s5966_s6 + $0x68] sm:$0x1] }
  0xc3   : > { %v1987_v52 = vshll.u32 %v5260_v44, 16  ;;  %v2007_v44 = vrot.slane %v2005_v19, 4  ;;  %v1085_v19 = vld [vmem:[%s5966_s6 + $0x6c] sm:$0xe] }
  0xc5   : > { %v2008_v58 = vor.u32 %v2007_v44, %v2003_v40 }
  0xc6   : > { %v6331_v3 = vpop.f32.mrf.mxu0 }
  0xc7   : > { %5291 = vmatmul.msk.bf16.gmra.mxu0 %vm714_vm4, %v2222_v59  ;;  %v6334_v25 = vpop.f32.mrf.mxu3  ;;  %v1985_v59 = vrot.slane %v1984_v51, 4  ;;  %v2009_v0 = vrot.slane %v2008_v58, 4 }
  0xc8   : > { %5081 = vmatmul.msk.bf16.gmra.mxu1 %vm714_vm4, %v5619_v60  ;;  %v1989_v60 = vrot.slane %v1987_v52, 5  ;;  %v5621_v52 = vld [vmem:[%s5966_s6 + $0x60] sm:$0xff] }
  0xc9   : > { %v6344_v15 = vpop.f32.mrf.mxu1 }
  0xca   : > { %v1990_v12 = vsel %vm5978_vm3, %v1985_v59, %v1989_v60  ;;  %v1257_v60 = vunpack.c.l.b16 %v1186_v48 }
  0xcb   : > { %v2200_v21 = vunpack.c.l.b16 %v1990_v12  ;;  %v5264_v12 = vld [vmem:[%s5966_s6 + $0x78] sm:$0xf] }
  0xcc   : > { %v2016_v23 = vshrl.u32 %v5264_v12, 16 }
  0xcd   : > { %v6347_v26 = vpop.f32.mrf.mxu2  ;;  %5114 = vmatmul.msk.bf16.gmra.mxu2 %vm714_vm4, %v1279_v11  ;;  %v1980_v11 = vsel %vm5978_vm3, %v1975_v43, %v1979_v1  ;;  %v1997_v1 = vrot.slane %v1995_v16, 5  ;;  %v5823_v16 = vld [vmem:[%s5966_s6 + $0x70] sm:$0xf] }
  0xce   : > { %v2199_v35 = vunpack.c.l.b16 %v1980_v11  ;;  %v2013_v11 = vrot.slane %v2011_v20, 5  ;;  %v1192_v28 = vrot.slane %v5823_v16, 5 }
  0xd0   : > { %v6352_v41 = vpop.f32.mrf.mxu0  ;;  %v2224_v27 = vpack.c.b16 %v2200_v21, %v2199_v35  ;;  %v2014_v31 = vsel %vm5978_vm3, %v2009_v0, %v2013_v11  ;;  %v2029_v35 = vshrl.u32 %v5265_v14, 16 }
  0xd1   : > { %v6355_v47 = vpop.f32.mrf.mxu3 }
  0xd2   : > { %5227 = vmatmul.msk.bf16.gmra.mxu3 %vm714_vm4, %v5635_v30  ;;  %v5636_v30 = vld [vmem:[%s5966_s6 + $0x60] sm:$0xff] }
  0xd5   : > { %v6363_v55 = vpop.f32.mrf.mxu1  ;;  %v6365_v56 = vpop.f32.mrf.mxu2 }
  0xd7   : > { %5292 = vmatmul.msk.bf16.gmra.mxu0 %vm714_vm4, %v2223_v50  ;;  %v1189_v50 = vsel %vm6152_vm7, %v1187_v33, %v1188_v29  ;;  %v2019_v29 = vshll.u32 %v5264_v12, 16  ;;  %v2025_v33 = vshll.u32 %v5265_v14, 16  ;;  %v5622_v14 = vld [vmem:[%s5966_s6 + $0x6c] sm:$0xff] }
  0xd8   : > { %5082 = vmatmul.msk.bf16.gmra.mxu1 %vm714_vm4, %v5620_v53  ;;  %v6371_v6 = vpop.f32.mrf.mxu0  ;;  %v1998_v53 = vor.u32 %v1997_v1, %v1994_v42  ;;  %v5824_v1 = vld [vmem:[%s5966_s6 + $0x74] sm:$0x1] }
  0xd9   : > { %v6374_v10 = vpop.f32.mrf.mxu3  ;;  %v1195_v44 = vrot.slane %v5824_v1, 5  ;;  %v2021_v58 = vrot.slane %v2019_v29, 5 }
  0xda   : > { %v1999_v7 = vrot.slane %v1998_v53, 4  ;;  %v2018_v53 = vrot.slane %v2016_v23, 4 }
  0xdc   : > { %v2022_v12 = vor.u32 %v2021_v58, %v2018_v53  ;;  %v1086_v58 = vld [vmem:[%s5966_s6 + $0x78] sm:$0xe] }
  0xdd   : > { %5115 = vmatmul.msk.bf16.gmra.mxu2 %vm714_vm4, %v1280_v61  ;;  %v6382_v22 = vpop.f32.mrf.mxu1  ;;  %v1258_v61 = vunpack.c.l.b16 %v1189_v50  ;;  %v5100_v50 = vrot.slane %v1085_v19, 9 }
  0xdf   : > { %v1281_v13 = vpack.c.b16 %v1258_v61, %v1257_v60  ;;  %v2031_v60 = vrot.slane %v2029_v35, 4  ;;  %v1193_v0 = vsel %vm6152_vm7, %v5100_v50, %v1192_v28 }
  0xe0   : > { %v6386_v32 = vpop.f32.mrf.mxu2 }
  0xe2   : > { %5228 = vmatmul.msk.bf16.gmra.mxu3 %vm714_vm4, %v5636_v30  ;;  %v2004_v30 = vsel %vm5978_vm3, %v1999_v7, %v2003_v40  ;;  %v5266_v7 = vld [vmem:[%s5966_s6 + $0x80] sm:$0x1] }
  0xe3   : > { %v2201_v40 = vunpack.c.l.b16 %v2004_v30  ;;  %v2035_v19 = vshll.u32 %v5266_v7, 16 }
  0xe4   : > { %v6394_v51 = vpop.f32.mrf.mxu0 }
  0xe5   : > { %v6397_v43 = vpop.f32.mrf.mxu3  ;;  %v996_v59 = vpop.f32.mrf.mxu1  ;;  %v2037_v1 = vrot.slane %v2035_v19, 5  ;;  %v5101_v19 = vrot.slane %v1086_v58, 9 }
  0xe6   : > { %v997_v62 = vadd.f32 %v996_v59, %v6269_v39  ;;  %v2027_v59 = vrot.slane %v2025_v33, 5  ;;  %v2023_v33 = vrot.slane %v2022_v12, 4 }
  0xe7   : > { %5293 = vmatmul.msk.bf16.gmra.mxu0 %vm714_vm4, %v2224_v27  ;;  %v1194_v27 = vrot.slane %v1192_v28, 4 }
  0xe8   : > { %v6401_v5 = vpop.f32.mrf.mxu2  ;;  %5083 = vmatmul.msk.bf16.gmra.mxu1 %vm714_vm4, %v5621_v52  ;;  %v2202_v52 = vunpack.c.l.b16 %v2014_v31  ;;  %v2032_v16 = vor.u32 %v2031_v60, %v2027_v59 }
  0xea   : > { %v2225_v11 = vpack.c.b16 %v2202_v52, %v2201_v40  ;;  %v5268_v40 = vld [vmem:[%s5966_s6 + $0x88] sm:$0xf]  ;;  %v5825_v52 = vld [vmem:[%s5966_s6 + $0x7c] sm:$0xf] }
  0xeb   : > { %v1199_v53 = vrot.slane %v5825_v52, 5 }
  0xec   : > { %v6408_v39 = vpop.f32.mrf.mxu0 }
  0xed   : > { %v6414_v21 = vpop.f32.mrf.mxu3  ;;  %5116 = vmatmul.msk.bf16.gmra.mxu2 %vm714_vm4, %v1281_v13  ;;  %v998_v42 = vpop.f32.mrf.mxu1 }
  0xee   : > { %v999_v48 = vadd.f32 %v998_v42, %v6294_v8  ;;  %v1196_v8 = vsel %vm6152_vm7, %v1194_v27, %v1195_v44  ;;  %v2033_v42 = vrot.slane %v2032_v16, 4  ;;  %v5267_v44 = vld [vmem:[%s5966_s6 + $0x84] sm:$0xf]  ;;  %v5638_v16 = vld [vmem:[%s5966_s6 + $0x78] sm:$0xff] }
  0xef   : > { %v1260_v30 = vunpack.c.l.b16 %v1196_v8  ;;  %v2043_v7 = vshll.u32 %v5267_v44, 16  ;;  %v2053_v8 = vshrl.u32 %v5268_v40, 16 }
  0xf0   : > { %v1349_v20 = vpop.f32.mrf.mxu2 }
  0xf1   : > { %v1429_v61 = vadd.f32 %v1349_v20, %v997_v62  ;;  %v1259_v62 = vunpack.c.l.b16 %v1193_v0  ;;  %v2040_v20 = vshrl.u32 %v5267_v44, 16  ;;  %v2049_v0 = vshll.u32 %v5268_v40, 16 }
  0xf2   : > { %5229 = vmatmul.msk.bf16.gmra.mxu3 %vm714_vm4, %v5637_v49 }
  0xf3   : > { %v1282_v27 = vpack.c.b16 %v1260_v30, %v1259_v62  ;;  %v2042_v30 = vrot.slane %v2040_v20, 4 }
  0xf4   : > { %v2293_v13 = vpop.f32.mrf.mxu0 }
  0xf5   : > { %v1639_v23 = vpop.f32.mrf.mxu3  ;;  %v1001_v29 = vpop.f32.mrf.mxu1 }
  0xf6   : > { %v1719_v31 = vadd.f32 %v1639_v23, %v1429_v61  ;;  %v1002_v28 = vadd.f32 %v1001_v29, %v6313_v38  ;;  %v2028_v38 = vsel %vm5978_vm3, %v2023_v33, %v2027_v59  ;;  %v2038_v61 = vsel %vm5978_vm3, %v2033_v42, %v2037_v1 }
  0xf7   : > { %5294 = vmatmul.msk.bf16.gmra.mxu0 %vm714_vm4, %v2225_v11  ;;  %v5826_v11 = vld [vmem:[%s5966_s6 + $0x80] sm:$0x1]  ;;  %v1201_v23 = vrot.slane %v1199_v53, 4  ;;  %v2203_v29 = vunpack.c.l.b16 %v2028_v38  ;;  %v2204_v62 = vunpack.c.l.b16 %v2038_v61  ;;  %v2045_v33 = vrot.slane %v2043_v7, 5  ;;  %v5623_v38 = vld [vmem:[%s5966_s6 + $0x78] sm:$0xff] }
  0xf8   : > { %v1351_v35 = vpop.f32.mrf.mxu2  ;;  %5084 = vmatmul.msk.bf16.gmra.mxu1 %vm714_vm4, %v5622_v14  ;;  %v6431_v49 = vadd.f32 %v2293_v13, %v1719_v31  ;;  %v1202_v12 = vrot.slane %v5826_v11, 5  ;;  %v2055_v42 = vrot.slane %v2053_v8, 4 }
  0xf9   : > { %v1430_v50 = vadd.f32 %v1351_v35, %v999_v48  ;;  %v2051_v35 = vrot.slane %v2049_v0, 5  ;;  %v2226_v40 = vpack.c.b16 %v2204_v62, %v2203_v29  ;;  %v2046_v58 = vor.u32 %v2045_v33, %v2042_v30  ;;  %v5271_v29 = vld [vmem:[%s5966_s6 + $0x94] sm:$0xf]  ;;  %v5827_v62 = vld [vmem:[%s5966_s6 + $0x88] sm:$0xf] }
  0xfa   : > { %v1206_v30 = vrot.slane %v5827_v62, 5 }
  0xfb   : > { %v2056_v20 = vor.u32 %v2055_v42, %v2051_v35 }
  0xfc   : > { %v2295_v60 = vpop.f32.mrf.mxu0 }
  0xfd   : > { %v1641_v48 = vpop.f32.mrf.mxu3  ;;  %5117 = vmatmul.msk.bf16.gmra.mxu2 %vm714_vm4, %v1282_v27  ;;  %v1003_v13 = vpop.f32.mrf.mxu1  ;;  %v5269_v27 = vld [vmem:[%s5966_s6 + $0x8c] sm:$0x1] }
  0xfe   : > { %v1720_v14 = vadd.f32 %v1641_v48, %v1430_v50  ;;  %v1004_v59 = vadd.f32 %v1003_v13, %v6331_v3  ;;  %v1200_v50 = vsel %vm6152_vm7, %v5101_v19, %v1199_v53  ;;  %v1203_v3 = vsel %vm6152_vm7, %v1201_v23, %v1202_v12 }
  0xff   : > { %v2059_v61 = vshll.u32 %v5269_v27, 16  ;;  %v1262_v0 = vunpack.c.l.b16 %v1203_v3  ;;  %v2047_v12 = vrot.slane %v2046_v58, 4  ;;  %v2057_v48 = vrot.slane %v2056_v20, 4  ;;  %v5639_v20 = vld [vmem:[%s5966_s6 + $0x84] sm:$0xff] }
 0x100   : > { %v1354_v31 = vpop.f32.mrf.mxu2  ;;  %v6444_v1 = vadd.f32 %v2295_v60, %v1720_v14  ;;  %v5270_v14 = vld [vmem:[%s5966_s6 + $0x90] sm:$0xf]  ;;  %v2077_v3 = vshrl.u32 %v5271_v29, 16 }
 0x101   : > { %v1431_v44 = vadd.f32 %v1354_v31, %v1002_v28  ;;  %v1261_v28 = vunpack.c.l.b16 %v1200_v50  ;;  %v2061_v13 = vrot.slane %v2059_v61, 5  ;;  %v1087_v31 = vld [vmem:[%s5966_s6 + $0x84] sm:$0xe]  ;;  %v2067_v33 = vshll.u32 %v5270_v14, 16 }
 0x102   : > { %5230 = vmatmul.msk.bf16.gmra.mxu3 %vm714_vm4, %v5638_v16  ;;  %v2073_v50 = vshll.u32 %v5271_v29, 16 }
 0x103   : > { %v1283_v23 = vpack.c.b16 %v1262_v0, %v1261_v28  ;;  %v2062_v27 = vsel %vm5978_vm3, %v2057_v48, %v2061_v13  ;;  %v2079_v48 = vrot.slane %v2077_v3, 4 }
 0x104   : > { %v2298_v52 = vpop.f32.mrf.mxu0 }
 0x105   : > { %v1644_v7 = vpop.f32.mrf.mxu3  ;;  %v1006_v60 = vpop.f32.mrf.mxu1 }
 0x106   : > { %v1721_v8 = vadd.f32 %v1644_v7, %v1431_v44  ;;  %v1007_v53 = vadd.f32 %v1006_v60, %v6352_v41  ;;  %v2064_v41 = vshrl.u32 %v5270_v14, 16  ;;  %v2052_v44 = vsel %vm5978_vm3, %v2047_v12, %v2051_v35 }
 0x107   : > { %5295 = vmatmul.msk.bf16.gmra.mxu0 %vm714_vm4, %v2226_v40  ;;  %v5828_v40 = vld [vmem:[%s5966_s6 + $0x8c] sm:$0x1]  ;;  %v5102_v7 = vrot.slane %v1087_v31, 9  ;;  %v1208_v60 = vrot.slane %v1206_v30, 4  ;;  %v2205_v28 = vunpack.c.l.b16 %v2052_v44  ;;  %v2206_v35 = vunpack.c.l.b16 %v2062_v27 }
 0x108   : > { %v1356_v11 = vpop.f32.mrf.mxu2  ;;  %5085 = vmatmul.msk.bf16.gmra.mxu1 %vm714_vm4, %v5623_v38  ;;  %v6457_v16 = vadd.f32 %v2298_v52, %v1721_v8  ;;  %v1209_v52 = vrot.slane %v5828_v40, 5  ;;  %v2066_v0 = vrot.slane %v2064_v41, 4  ;;  %v2069_v8 = vrot.slane %v2067_v33, 5  ;;  %v5624_v41 = vld [vmem:[%s5966_s6 + $0x84] sm:$0xff] }
 0x109   : > { %v1432_v19 = vadd.f32 %v1356_v11, %v1004_v59  ;;  %v2075_v12 = vrot.slane %v2073_v50, 5  ;;  %v2227_v29 = vpack.c.b16 %v2206_v35, %v2205_v28  ;;  %v5274_v28 = vld [vmem:[%s5966_s6 + $0xa0] sm:$0xf]  ;;  %v5829_v35 = vld [vmem:[%s5966_s6 + $0x94] sm:$0xf] }
 0x10a   : > { %v2070_v62 = vor.u32 %v2069_v8, %v2066_v0  ;;  %v1213_v0 = vrot.slane %v5829_v35, 5  ;;  %v1088_v8 = vld [vmem:[%s5966_s6 + $0x90] sm:$0xe] }
 0x10b   : > { %v2080_v33 = vor.u32 %v2079_v48, %v2075_v12 }
 0x10c   : > { %v2300_v42 = vpop.f32.mrf.mxu0  ;;  %v2071_v40 = vrot.slane %v2070_v62, 4 }
 0x10d   : > { %v1646_v59 = vpop.f32.mrf.mxu3  ;;  %5118 = vmatmul.msk.bf16.gmra.mxu2 %vm714_vm4, %v1283_v23  ;;  %v1008_v38 = vpop.f32.mrf.mxu1  ;;  %v5272_v23 = vld [vmem:[%s5966_s6 + $0x98] sm:$0x1] }
 0x10e   : > { %v1722_v58 = vadd.f32 %v1646_v59, %v1432_v19  ;;  %v1009_v61 = vadd.f32 %v1008_v38, %v6371_v6  ;;  %v1207_v19 = vsel %vm6152_vm7, %v5102_v7, %v1206_v30  ;;  %v1210_v6 = vsel %vm6152_vm7, %v1208_v60, %v1209_v52 }
 0x10f   : > { %v2083_v44 = vshll.u32 %v5272_v23, 16  ;;  %v1264_v50 = vunpack.c.l.b16 %v1210_v6  ;;  %v2081_v59 = vrot.slane %v2080_v33, 4  ;;  %v2101_v6 = vshrl.u32 %v5274_v28, 16  ;;  %v5640_v33 = vld [vmem:[%s5966_s6 + $0x90] sm:$0xff] }
 0x110   : > { %v1359_v11 = vpop.f32.mrf.mxu2  ;;  %v6470_v13 = vadd.f32 %v2300_v42, %v1722_v58  ;;  %v5273_v58 = vld [vmem:[%s5966_s6 + $0x9c] sm:$0xf] }
 0x111   : > { %v1433_v14 = vadd.f32 %v1359_v11, %v1007_v53  ;;  %v1263_v53 = vunpack.c.l.b16 %v1207_v19  ;;  %v2085_v38 = vrot.slane %v2083_v44, 5  ;;  %v2088_v11 = vshrl.u32 %v5273_v58, 16 }
 0x112   : > { %5231 = vmatmul.msk.bf16.gmra.mxu3 %vm714_vm4, %v5639_v20  ;;  %v2091_v23 = vshll.u32 %v5273_v58, 16  ;;  %v2097_v19 = vshll.u32 %v5274_v28, 16  ;;  %v5103_v44 = vrot.slane %v1088_v8, 9 }
 0x113   : > { %v1284_v60 = vpack.c.b16 %v1264_v50, %v1263_v53  ;;  %v2090_v50 = vrot.slane %v2088_v11, 4 }
 0x114   : > { %v2303_v31 = vpop.f32.mrf.mxu0 }
 0x115   : > { %v1649_v27 = vpop.f32.mrf.mxu3  ;;  %v1011_v42 = vpop.f32.mrf.mxu1 }
 0x116   : > { %v1723_v3 = vadd.f32 %v1649_v27, %v1433_v14  ;;  %v1012_v30 = vadd.f32 %v1011_v42, %v6394_v51  ;;  %v2076_v51 = vsel %vm5978_vm3, %v2071_v40, %v2075_v12  ;;  %v2086_v14 = vsel %vm5978_vm3, %v2081_v59, %v2085_v38 }
 0x117   : > { %5296 = vmatmul.msk.bf16.gmra.mxu0 %vm714_vm4, %v2227_v29  ;;  %v5830_v29 = vld [vmem:[%s5966_s6 + $0x98] sm:$0x1]  ;;  %v1215_v27 = vrot.slane %v1213_v0, 4  ;;  %v2207_v42 = vunpack.c.l.b16 %v2076_v51  ;;  %v2208_v53 = vunpack.c.l.b16 %v2086_v14  ;;  %v2093_v40 = vrot.slane %v2091_v23, 5  ;;  %v5625_v51 = vld [vmem:[%s5966_s6 + $0x90] sm:$0xff] }
 0x118   : > { %v1361_v52 = vpop.f32.mrf.mxu2  ;;  %5086 = vmatmul.msk.bf16.gmra.mxu1 %vm714_vm4, %v5624_v41  ;;  %v6483_v20 = vadd.f32 %v2303_v31, %v1723_v3  ;;  %v1216_v62 = vrot.slane %v5830_v29, 5  ;;  %v2103_v59 = vrot.slane %v2101_v6, 4  ;;  %v5276_v29 = vld [vmem:[%s5966_s6 + $0xa8] sm:$0xf] }
 0x119   : > { %v1434_v7 = vadd.f32 %v1361_v52, %v1009_v61  ;;  %v2099_v52 = vrot.slane %v2097_v19, 5  ;;  %v2228_v28 = vpack.c.b16 %v2208_v53, %v2207_v42  ;;  %v2094_v8 = vor.u32 %v2093_v40, %v2090_v50  ;;  %v5831_v53 = vld [vmem:[%s5966_s6 + $0xa0] sm:$0xf]  ;;  %v1089_v40 = vld [vmem:[%s5966_s6 + $0x9c] sm:$0xe] }
 0x11a   : > { %v2112_v42 = vshrl.u32 %v5276_v29, 16  ;;  %v1220_v50 = vrot.slane %v5831_v53, 5 }
 0x11b   : > { %v2104_v11 = vor.u32 %v2103_v59, %v2099_v52 }
 0x11c   : > { %v2305_v48 = vpop.f32.mrf.mxu0 }
 0x11d   : > { %v1651_v61 = vpop.f32.mrf.mxu3  ;;  %5119 = vmatmul.msk.bf16.gmra.mxu2 %vm714_vm4, %v1284_v60  ;;  %v1013_v31 = vpop.f32.mrf.mxu1  ;;  %v5275_v60 = vld [vmem:[%s5966_s6 + $0xa4] sm:$0x1] }
 0x11e   : > { %v1724_v41 = vadd.f32 %v1651_v61, %v1434_v7  ;;  %v1014_v12 = vadd.f32 %v1013_v31, %v6408_v39  ;;  %v1214_v39 = vsel %vm6152_vm7, %v5103_v44, %v1213_v0  ;;  %v1217_v7 = vsel %vm6152_vm7, %v1215_v27, %v1216_v62  ;;  %v5277_v27 = vld [vmem:[%s5966_s6 + $0xac] sm:$0xf] }
 0x11f   : > { %v2107_v14 = vshll.u32 %v5275_v60, 16  ;;  %v1266_v19 = vunpack.c.l.b16 %v1217_v7  ;;  %v2095_v62 = vrot.slane %v2094_v8, 4  ;;  %v2105_v61 = vrot.slane %v2104_v11, 4 }
 0x120   : > { %v1364_v3 = vpop.f32.mrf.mxu2  ;;  %v6496_v38 = vadd.f32 %v2305_v48, %v1724_v41  ;;  %v2125_v7 = vshrl.u32 %v5277_v27, 16  ;;  %v2114_v8 = vrot.slane %v2112_v42, 4 }
 0x121   : > { %v1435_v58 = vadd.f32 %v1364_v3, %v1012_v30  ;;  %v1265_v30 = vunpack.c.l.b16 %v1214_v39  ;;  %v2109_v31 = vrot.slane %v2107_v14, 5  ;;  %v2115_v3 = vshll.u32 %v5276_v29, 16  ;;  %v5641_v14 = vld [vmem:[%s5966_s6 + $0x9c] sm:$0xff] }
 0x122   : > { %5232 = vmatmul.msk.bf16.gmra.mxu3 %vm714_vm4, %v5640_v33  ;;  %v2121_v39 = vshll.u32 %v5277_v27, 16 }
 0x123   : > { %v1285_v44 = vpack.c.b16 %v1266_v19, %v1265_v30  ;;  %v2110_v60 = vsel %vm5978_vm3, %v2105_v61, %v2109_v31  ;;  %v1222_v30 = vrot.slane %v1220_v50, 4  ;;  %v2117_v19 = vrot.slane %v2115_v3, 5  ;;  %v5626_v3 = vld [vmem:[%s5966_s6 + $0x9c] sm:$0xff] }
 0x124   : > { %v2308_v35 = vpop.f32.mrf.mxu0  ;;  %v2210_v29 = vunpack.c.l.b16 %v2110_v60  ;;  %v2127_v61 = vrot.slane %v2125_v7, 4 }
 0x125   : > { %v1654_v48 = vpop.f32.mrf.mxu3  ;;  %v1016_v23 = vpop.f32.mrf.mxu1  ;;  %v2118_v53 = vor.u32 %v2117_v19, %v2114_v8 }
 0x126   : > { %v1725_v6 = vadd.f32 %v1654_v48, %v1435_v58  ;;  %v2100_v58 = vsel %vm5978_vm3, %v2095_v62, %v2099_v52  ;;  %v5104_v48 = vrot.slane %v1089_v40, 9  ;;  %v1017_v52 = vadd.f32 %v1016_v23, %v6250_v4 }
 0x127   : > { %5297 = vmatmul.msk.bf16.gmra.mxu0 %vm714_vm4, %v2228_v28  ;;  %v5832_v28 = vld [vmem:[%s5966_s6 + $0xa4] sm:$0x1]  ;;  %v2123_v62 = vrot.slane %v2121_v39, 5 }
 0x128   : > { %v1366_v0 = vpop.f32.mrf.mxu2  ;;  %5087 = vmatmul.msk.bf16.gmra.mxu1 %vm714_vm4, %v5625_v51  ;;  %v6508_v41 = vadd.f32 %v2308_v35, %v1725_v6  ;;  %v1223_v35 = vrot.slane %v5832_v28, 5  ;;  %v2209_v6 = vunpack.c.l.b16 %v2100_v58 }
 0x129   : > { %v1436_v33 = vadd.f32 %v1366_v0, %v1014_v12  ;;  %v2128_v40 = vor.u32 %v2127_v61, %v2123_v62 }
 0x12a   : > { %v1224_v42 = vsel %vm6152_vm7, %v1222_v30, %v1223_v35  ;;  %v2229_v4 = vpack.c.b16 %v2210_v29, %v2209_v6 }
 0x12b   : > { %v1268_v7 = vunpack.c.l.b16 %v1224_v42  ;;  %v2129_v8 = vrot.slane %v2128_v40, 4 }
 0x12c   : > { %v2310_v59 = vpop.f32.mrf.mxu0 }
 0x12d   : > { %v1656_v12 = vpop.f32.mrf.mxu3  ;;  %5120 = vmatmul.msk.bf16.gmra.mxu2 %vm714_vm4, %v1285_v44  ;;  %v1018_v51 = vpop.f32.mrf.mxu1  ;;  %v5278_v44 = vld [vmem:[%s5966_s6 + $0xb0] sm:$0x1] }
 0x12e   : > { %v1726_v11 = vadd.f32 %v1656_v12, %v1436_v33  ;;  %v1221_v33 = vsel %vm6152_vm7, %v5104_v48, %v1220_v50  ;;  %v2131_v58 = vshll.u32 %v5278_v44, 16  ;;  %v2119_v12 = vrot.slane %v2118_v53, 4  ;;  %v5280_v48 = vld [vmem:[%s5966_s6 + $0xb8] sm:$0xf]  ;;  %v5834_v53 = vld [vmem:[%s5966_s6 + $0xb0] sm:$0x1] }
 0x12f   : > { %v1267_v39 = vunpack.c.l.b16 %v1221_v33  ;;  %v1019_v50 = vadd.f32 %v1018_v51, %v6263_v34  ;;  %v1090_v34 = vld [vmem:[%s5966_s6 + $0xa8] sm:$0xe]  ;;  %v2145_v51 = vshll.u32 %v5280_v48, 16  ;;  %v2149_v44 = vshrl.u32 %v5280_v48, 16 }
 0x130   : > { %v1369_v0 = vpop.f32.mrf.mxu2  ;;  %v6521_v31 = vadd.f32 %v2310_v59, %v1726_v11  ;;  %v5279_v11 = vld [vmem:[%s5966_s6 + $0xb4] sm:$0xf]  ;;  %v2124_v29 = vsel %vm5978_vm3, %v2119_v12, %v2123_v62 }
 0x131   : > { %v1437_v27 = vadd.f32 %v1369_v0, %v1017_v52  ;;  %v1286_v52 = vpack.c.b16 %v1268_v7, %v1267_v39  ;;  %v2136_v6 = vshrl.u32 %v5279_v11, 16  ;;  %v5833_v0 = vld [vmem:[%s5966_s6 + $0xac] sm:$0xf]  ;;  %v5105_v39 = vrot.slane %v1090_v34, 9 }
 0x132   : > { %5233 = vmatmul.msk.bf16.gmra.mxu3 %vm714_vm4, %v5641_v14  ;;  %v2133_v14 = vrot.slane %v2131_v58, 5  ;;  %v1227_v61 = vrot.slane %v5833_v0, 5  ;;  %v5627_v34 = vld [vmem:[%s5966_s6 + $0xa8] sm:$0xff] }
 0x133   : > { %v2138_v62 = vrot.slane %v2136_v6, 4 }
 0x134   : > { %v2313_v23 = vpop.f32.mrf.mxu0  ;;  %v2134_v42 = vsel %vm5978_vm3, %v2129_v8, %v2133_v14  ;;  %v1229_v7 = vrot.slane %v1227_v61, 4  ;;  %v5281_v14 = vld [vmem:[%s5966_s6 + $0xbc] sm:$0x1] }
 0x135   : > { %v1659_v59 = vpop.f32.mrf.mxu3  ;;  %v1021_v60 = vpop.f32.mrf.mxu1 }
 0x136   : > { %v1727_v28 = vadd.f32 %v1659_v59, %v1437_v27  ;;  %v2139_v27 = vshll.u32 %v5279_v11, 16  ;;  %v5642_v59 = vld [vmem:[%s5966_s6 + $0xa8] sm:$0xff]  ;;  %v1022_v12 = vadd.f32 %v1021_v60, %v6283_v2  ;;  %v2212_v11 = vunpack.c.l.b16 %v2134_v42 }
 0x137   : > { %5298 = vmatmul.msk.bf16.gmra.mxu0 %vm714_vm4, %v2229_v4  ;;  %v1230_v4 = vrot.slane %v5834_v53, 5 }
 0x138   : > { %v1371_v35 = vpop.f32.mrf.mxu2  ;;  %5088 = vmatmul.msk.bf16.gmra.mxu1 %vm714_vm4, %v5626_v3  ;;  %v6535_v30 = vadd.f32 %v2313_v23, %v1727_v28  ;;  %v2211_v3 = vunpack.c.l.b16 %v2124_v29  ;;  %v2141_v28 = vrot.slane %v2139_v27, 5  ;;  %v2155_v29 = vshll.u32 %v5281_v14, 16 }
 0x139   : > { %v1438_v19 = vadd.f32 %v1371_v35, %v1019_v50  ;;  %v2147_v50 = vrot.slane %v2145_v51, 5  ;;  %v2151_v35 = vrot.slane %v2149_v44, 4 }
 0x13a   : > { %v2142_v6 = vor.u32 %v2141_v28, %v2138_v62  ;;  %v2230_v2 = vpack.c.b16 %v2212_v11, %v2211_v3  ;;  %v2157_v3 = vrot.slane %v2155_v29, 5  ;;  %v5835_v62 = vld [vmem:[%s5966_s6 + $0x10] sm:$0xf]  ;;  %v1091_v11 = vld [vmem:[%s5966_s6 + $0xb4] sm:$0xe] }
 0x13b   : > { %v2152_v60 = vor.u32 %v2151_v35, %v2147_v50  ;;  %v5836_v35 = vld [vmem:[%s5966_s6 + $0xb8] sm:$0xf] }
 0x13c   : > { %v2315_v33 = vpop.f32.mrf.mxu0 }
 0x13d   : > { %v1661_v23 = vpop.f32.mrf.mxu3  ;;  %5121 = vmatmul.msk.bf16.gmra.mxu2 %vm714_vm4, %v1286_v52  ;;  %v1023_v40 = vpop.f32.mrf.mxu1  ;;  %v1231_v52 = vsel %vm6152_vm7, %v1229_v7, %v1230_v4  ;;  %v5283_v7 = vld [vmem:[%s5966_s6 + $0xc4] sm:$0xf] }
 0x13e   : > { %v1728_v58 = vadd.f32 %v1661_v23, %v1438_v19  ;;  %v1228_v19 = vsel %vm6152_vm7, %v5105_v39, %v1227_v61  ;;  %v1270_v42 = vunpack.c.l.b16 %v1231_v52  ;;  %v2143_v61 = vrot.slane %v2142_v6, 4  ;;  %v5282_v39 = vld [vmem:[%s5966_s6 + $0xc0] sm:$0xf] }
 0x13f   : > { %v1024_v4 = vadd.f32 %v1023_v40, %v6302_v17  ;;  %v2153_v23 = vrot.slane %v2152_v60, 4  ;;  %v2169_v52 = vshll.u32 %v5283_v7, 16 }
 0x140   : > { %v1374_v8 = vpop.f32.mrf.mxu2  ;;  %v6548_v48 = vadd.f32 %v2315_v33, %v1728_v58  ;;  %v1269_v33 = vunpack.c.l.b16 %v1228_v19  ;;  %v2471_v58 = vrot.slane %v5835_v62, 5  ;;  %v2148_v17 = vsel %vm5978_vm3, %v2143_v61, %v2147_v50  ;;  %v5302_v61 = vld [vmem:[%s5966_s6 + $0xc] sm:$0xe] }
 0x141   : > { %v1439_v0 = vadd.f32 %v1374_v8, %v1022_v12  ;;  %v1234_v8 = vrot.slane %v5836_v35, 5  ;;  %v2158_v40 = vsel %vm5978_vm3, %v2153_v23, %v2157_v3  ;;  %v2163_v19 = vshll.u32 %v5282_v39, 16  ;;  %v5643_v23 = vld [vmem:[%s5966_s6 + $0xb4] sm:$0xff] }
 0x142   : > { %5234 = vmatmul.msk.bf16.gmra.mxu3 %vm714_vm4, %v5642_v59  ;;  %v1287_v12 = vpack.c.b16 %v1270_v42, %v1269_v33  ;;  %v2473_v6 = vrot.slane %v2471_v58, 4  ;;  %v5838_v33 = vld [vmem:[%s5966_s6 + $0xbc] sm:$0x1]  ;;  %v2213_v3 = vunpack.c.l.b16 %v2148_v17  ;;  %v2214_v62 = vunpack.c.l.b16 %v2158_v40 }
 0x144   : > { %v2318_v27 = vpop.f32.mrf.mxu0 }
 0x145   : > { %v1664_v51 = vpop.f32.mrf.mxu3  ;;  %v1026_v44 = vpop.f32.mrf.mxu1 }
 0x146   : > { %v1729_v53 = vadd.f32 %v1664_v51, %v1439_v0  ;;  %v2160_v0 = vshrl.u32 %v5282_v39, 16  ;;  %v2173_v51 = vshrl.u32 %v5283_v7, 16  ;;  %v1027_v39 = vadd.f32 %v1026_v44, %v6321_v54  ;;  %v5284_v54 = vld [vmem:[%s5966_s6 + $0xc8] sm:$0x1] }
 0x147   : > { %5299 = vmatmul.msk.bf16.gmra.mxu0 %vm714_vm4, %v2230_v2  ;;  %v5837_v2 = vld [vmem:[%s5966_s6 + $0x14] sm:$0x1]  ;;  %v2171_v7 = vrot.slane %v2169_v52, 5 }
 0x148   : > { %v1376_v59 = vpop.f32.mrf.mxu2  ;;  %5089 = vmatmul.msk.bf16.gmra.mxu1 %vm714_vm4, %v5627_v34  ;;  %v6564_v14 = vadd.f32 %v2318_v27, %v1729_v53  ;;  %v2474_v60 = vrot.slane %v5837_v2, 5  ;;  %v5106_v34 = vrot.slane %v1091_v11, 9  ;;  %v1237_v27 = vrot.slane %v5838_v33, 5 }
 0x149   : > { %v1440_v28 = vadd.f32 %v1376_v59, %v1024_v4  ;;  %v1236_v53 = vrot.slane %v1234_v8, 4  ;;  %v5318_v59 = vrot.slane %v5302_v61, 9  ;;  %v2162_v35 = vrot.slane %v2160_v0, 4  ;;  %v5628_v61 = vld [vmem:[%s5966_s6 + $0xb4] sm:$0xff] }
 0x14a   : > { %v2165_v11 = vrot.slane %v2163_v19, 5  ;;  %v1235_v33 = vsel %vm6152_vm7, %v5106_v34, %v1234_v8  ;;  %v2475_v17 = vsel %vm6152_vm7, %v2473_v6, %v2474_v60  ;;  %v5464_v19 = vld [vmem:[%s5966_s6 + $0x18] sm:$0xf]  ;;  %v2231_v8 = vpack.c.b16 %v2214_v62, %v2213_v3 }
 0x14b   : > { %v2584_v0 = vunpack.c.l.b16 %v2475_v17  ;;  %v1271_v6 = vunpack.c.l.b16 %v1235_v33  ;;  %v3145_v17 = vshll.u32 %v5464_v19, 16 }
 0x14c   : > { %v2320_v29 = vpop.f32.mrf.mxu0  ;;  %v2166_v52 = vor.u32 %v2165_v11, %v2162_v35 }
 0x14d   : > { %v1666_v42 = vpop.f32.mrf.mxu3  ;;  %5122 = vmatmul.msk.bf16.gmra.mxu2 %vm714_vm4, %v1287_v12  ;;  %v1028_v50 = vpop.f32.mrf.mxu1  ;;  %v2175_v12 = vrot.slane %v2173_v51, 4 }
 0x14e   : > { %v1730_v4 = vadd.f32 %v1666_v42, %v1440_v28  ;;  %v2472_v28 = vsel %vm6152_vm7, %v5318_v59, %v2471_v58  ;;  %v1238_v42 = vsel %vm6152_vm7, %v1236_v53, %v1237_v27  ;;  %v6593_v27 = vld [vmem:[%s5966_s6 + $0x1c] sm:$0xf]  ;;  %v1029_v3 = vadd.f32 %v1028_v50, %v6344_v15 }
 0x14f   : > { %v2583_v44 = vunpack.c.l.b16 %v2472_v28  ;;  %v1272_v60 = vunpack.c.l.b16 %v1238_v42  ;;  %v2176_v59 = vor.u32 %v2175_v12, %v2171_v7  ;;  %v3142_v28 = vshrl.u32 %v5464_v19, 16 }
 0x150   : > { %v1379_v2 = vpop.f32.mrf.mxu2  ;;  %v6589_v51 = vadd.f32 %v2320_v29, %v1730_v4  ;;  %v2167_v62 = vrot.slane %v2166_v52, 4  ;;  %v3151_v29 = vshll.u32 %v6593_v27, 16  ;;  %v3155_v4 = vshrl.u32 %v6593_v27, 16  ;;  %v5466_v52 = vld [vmem:[%s5966_s6 + $0x20] sm:$0x1] }
 0x151   : > { %v1441_v40 = vadd.f32 %v1379_v2, %v1027_v39  ;;  %v6587_v34 = vpack.c.b16 %v2584_v0, %v2583_v44  ;;  %v2179_v39 = vshll.u32 %v5284_v54, 16  ;;  %v1288_v11 = vpack.c.b16 %v1272_v60, %v1271_v6 }
 0x152   : > { %5235 = vmatmul.msk.bf16.gmra.mxu3 %vm714_vm4, %v5643_v23  ;;  %v2177_v33 = vrot.slane %v2176_v59, 4  ;;  %v3144_v54 = vrot.slane %v3142_v28, 4  ;;  %v2172_v15 = vsel %vm5978_vm3, %v2167_v62, %v2171_v7  ;;  %v3153_v50 = vrot.slane %v3151_v29, 5 }
 0x153   : > { %v2181_v12 = vrot.slane %v2179_v39, 5  ;;  %v3157_v0 = vrot.slane %v3155_v4, 4  ;;  %v2215_v39 = vunpack.c.l.b16 %v2172_v15 }
 0x154   : > { %v2323_v58 = vpop.f32.mrf.mxu0 }
 0x155   : > { %v1669_v53 = vpop.f32.mrf.mxu3  ;;  %v1031_v2 = vpop.f32.mrf.mxu1  ;;  %v3158_v28 = vor.u32 %v3157_v0, %v3153_v50  ;;  %v5839_v0 = vld [vmem:[%s5966_s6 + $0x1c] sm:$0xf] }
 0x156   : > { %v1731_v23 = vadd.f32 %v1669_v53, %v1441_v40  ;;  %v3147_v40 = vrot.slane %v3145_v17, 5  ;;  %v1032_v53 = vadd.f32 %v1031_v2, %v6363_v55  ;;  %v3161_v17 = vshll.u32 %v5466_v52, 16  ;;  %v6617_v2 = vld [vmem:[%s5966_s6 + $0x28] sm:$0xf] }
 0x157   : > { %5300 = vmatmul.msk.bf16.gmra.mxu0 %vm714_vm4, %v2231_v8  ;;  %v2182_v8 = vsel %vm5978_vm3, %v2177_v33, %v2181_v12  ;;  %v3159_v4 = vrot.slane %v3158_v28, 4  ;;  %v5467_v33 = vld [vmem:[%s5966_s6 + $0x24] sm:$0xf]  ;;  %v3813_v55 = vrot.slane %v6593_v27, 5 }
 0x158   : > { %v1381_v35 = vpop.f32.mrf.mxu2  ;;  %5090 = vmatmul.msk.bf16.gmra.mxu1 %vm714_vm4, %v5628_v61  ;;  %v6600_v44 = vadd.f32 %v2323_v58, %v1731_v23  ;;  %v3148_v60 = vor.u32 %v3147_v40, %v3144_v54  ;;  %v5644_v58 = vld [vmem:[%s5966_s6 + $0xc0] sm:$0xff]  ;;  %v2216_v7 = vunpack.c.l.b16 %v2182_v8  ;;  %v2478_v8 = vrot.slane %v5839_v0, 5 }
 0x159   : > { %v1442_v42 = vadd.f32 %v1381_v35, %v1029_v3  ;;  %v3163_v35 = vrot.slane %v3161_v17, 5 }
 0x15a   : > { %7880 = vst [vmem:[#allocation2_spill] sm:$0xff] %v6600_v44  ;;  %v3149_v62 = vrot.slane %v3148_v60, 4  ;;  %v2232_v29 = vpack.c.b16 %v2216_v7, %v2215_v39  ;;  %v3166_v39 = vshrl.u32 %v5467_v33, 16  ;;  %v3179_v7 = vshrl.u32 %v6617_v2, 16 }
 0x15c   : > { %v2325_v19 = vpop.f32.mrf.mxu0  ;;  %v3154_v15 = vsel %vm5978_vm3, %v3149_v62, %v3153_v50  ;;  %v5840_v50 = vld [vmem:[%s5966_s6 + $0x20] sm:$0x1] }
 0x15d   : > { %v1671_v61 = vpop.f32.mrf.mxu3  ;;  %5123 = vmatmul.msk.bf16.gmra.mxu2 %vm714_vm4, %v1288_v11  ;;  %v1033_v6 = vpop.f32.mrf.mxu1  ;;  %v5529_v11 = vld [vmem:[%s5966_s6 + $0x18] sm:$0xe]  ;;  %v2481_v28 = vrot.slane %v5840_v50, 5 }
 0x15e   : > { %v1732_v59 = vadd.f32 %v1671_v61, %v1442_v42  ;;  %v5545_v60 = vrot.slane %v5529_v11, 9  ;;  %v1034_v27 = vadd.f32 %v1033_v6, %v6382_v22  ;;  %v2480_v22 = vrot.slane %v2478_v8, 4 }
 0x160   : > { %v1384_v23 = vpop.f32.mrf.mxu2  ;;  %v6613_v12 = vadd.f32 %v2325_v19, %v1732_v59  ;;  %v3169_v19 = vshll.u32 %v5467_v33, 16  ;;  %v3164_v59 = vsel %vm5978_vm3, %v3159_v4, %v3163_v35  ;;  %v3527_v4 = vunpack.c.l.b16 %v3154_v15 }
 0x161   : > { %v1443_v3 = vadd.f32 %v1384_v23, %v1032_v53  ;;  %v3175_v53 = vshll.u32 %v6617_v2, 16  ;;  %v3815_v23 = vrot.slane %v3813_v55, 4  ;;  %v3528_v35 = vunpack.c.l.b16 %v3164_v59 }
 0x162   : > { %5236 = vmatmul.msk.bf16.gmra.mxu3 %vm714_vm4, %v5644_v58  ;;  %7881 = vst [vmem:[#allocation3_spill] sm:$0xff] %v6613_v12  ;;  %v5303_v58 = vld [vmem:[%s5966_s6 + $0x18] sm:$0xe]  ;;  %v3168_v33 = vrot.slane %v3166_v39, 4  ;;  %v3814_v0 = vsel %vm6152_vm7, %v5545_v60, %v3813_v55  ;;  %v3181_v12 = vrot.slane %v3179_v7, 4 }
 0x163   : > { %v5319_v11 = vrot.slane %v5303_v58, 9  ;;  %v3177_v50 = vrot.slane %v3175_v53, 5  ;;  %v3559_v60 = vpack.c.b16 %v3528_v35, %v3527_v4  ;;  %v3925_v58 = vunpack.c.l.b16 %v3814_v0  ;;  %v5470_v4 = vld [vmem:[%s5966_s6 + $0x30] sm:$0xf] }
 0x164   : > { %v2328_v42 = vpop.f32.mrf.mxu0  ;;  %v3820_v35 = vrot.slane %v6617_v2, 5 }
 0x165   : > { %v1674_v54 = vpop.f32.mrf.mxu3  ;;  %v1036_v40 = vpop.f32.mrf.mxu1  ;;  %v2479_v15 = vsel %vm6152_vm7, %v5319_v11, %v2478_v8  ;;  %v3182_v53 = vor.u32 %v3181_v12, %v3177_v50 }
 0x166   : > { %v1733_v61 = vadd.f32 %v1674_v54, %v1443_v3  ;;  %v3816_v3 = vrot.slane %v5466_v52, 5  ;;  %v3171_v54 = vrot.slane %v3169_v19, 5  ;;  %v6640_v52 = vld [vmem:[%s5966_s6 + $0x2c] sm:$0x1]  ;;  %v1037_v19 = vadd.f32 %v1036_v40, %v6265_v37 }
 0x167   : > { %5301 = vmatmul.msk.bf16.gmra.mxu0 %vm714_vm4, %v2232_v29  ;;  %v5645_v29 = vld [vmem:[%s5966_s6 + $0x18] sm:$0xff]  ;;  %v3185_v7 = vshll.u32 %v6640_v52, 16  ;;  %v3183_v11 = vrot.slane %v3182_v53, 4  ;;  %v5842_v53 = vld [vmem:[%s5966_s6 + $0x2c] sm:$0x1] }
 0x168   : > { %v1386_v17 = vpop.f32.mrf.mxu2  ;;  %5335 = vmatmul.msk.bf16.vlgmr.msra.gmra.mxu1 %vm714_vm4, %v6587_v34  ;;  %v6633_v6 = vadd.f32 %v2328_v42, %v1733_v61  ;;  %v3817_v34 = vsel %vm6152_vm7, %v3815_v23, %v3816_v3  ;;  %v2482_v61 = vsel %vm6152_vm7, %v2480_v22, %v2481_v28  ;;  %v3172_v39 = vor.u32 %v3171_v54, %v3168_v33  ;;  %v6656_v33 = vld [vmem:[%s5966_s6 + $0x34] sm:$0xf] }
 0x169   : > { %v1444_v62 = vadd.f32 %v1386_v17, %v1034_v27  ;;  %v3926_v59 = vunpack.c.l.b16 %v3817_v34  ;;  %v2585_v23 = vunpack.c.l.b16 %v2479_v15  ;;  %v2586_v3 = vunpack.c.l.b16 %v2482_v61 }
 0x16a   : > { %v3173_v28 = vrot.slane %v3172_v39, 4  ;;  %v3187_v22 = vrot.slane %v3185_v7, 5  ;;  %v2488_v7 = vrot.slane %v5842_v53, 5 }
 0x16b   : > { %v2616_v40 = vpack.c.b16 %v2586_v3, %v2585_v23  ;;  %v3823_v23 = vrot.slane %v6640_v52, 5  ;;  %v6679_v52 = vld [vmem:[%s5966_s6 + $0x38] sm:$0x1] }
 0x16c   : > { %v2330_v44 = vpop.f32.mrf.mxu0  ;;  %v3188_v39 = vsel %vm5978_vm3, %v3183_v11, %v3187_v22 }
 0x16d   : > { %v1676_v27 = vpop.f32.mrf.mxu3  ;;  %5448 = vmatmul.msk.bf16.vlgmr.msra.gmra.mxu2 %vm714_vm4, %v5645_v29  ;;  %v1038_v42 = vpop.f32.mrf.mxu1  ;;  %v3957_v29 = vpack.c.b16 %v3926_v59, %v3925_v58  ;;  %v5304_v58 = vld [vmem:[%s5966_s6 + $0x24] sm:$0xe]  ;;  %v3203_v59 = vshrl.u32 %v6656_v33, 16 }
 0x16e   : > { %v1734_v55 = vadd.f32 %v1676_v27, %v1444_v62  ;;  %v5530_v62 = vld [vmem:[%s5966_s6 + $0x24] sm:$0xe]  ;;  %v5841_v27 = vld [vmem:[%s5966_s6 + $0x28] sm:$0xf]  ;;  %v1039_v2 = vadd.f32 %v1038_v42, %v6286_v63 }
 0x16f   : > { %v5546_v34 = vrot.slane %v5530_v62, 9  ;;  %v2485_v15 = vrot.slane %v5841_v27, 5  ;;  %v3205_v27 = vrot.slane %v3203_v59, 4  ;;  %v3209_v59 = vshll.u32 %v6679_v52, 16 }
 0x170   : > { %v1389_v17 = vpop.f32.mrf.mxu2  ;;  %v6652_v37 = vadd.f32 %v2330_v44, %v1734_v55  ;;  %v3190_v44 = vshrl.u32 %v5470_v4, 16  ;;  %v3193_v55 = vshll.u32 %v5470_v4, 16 }
 0x171   : > { %v1445_v8 = vadd.f32 %v1389_v17, %v1037_v19  ;;  %v3199_v19 = vshll.u32 %v6656_v33, 16  ;;  %v2487_v63 = vrot.slane %v2485_v15, 4  ;;  %v3821_v4 = vsel %vm6152_vm7, %v5546_v34, %v3820_v35 }
 0x172   : > { %5513 = vmatmul.msk.bf16.vlgmr.msra.gmra.mxu3 %vm714_vm4, %v3559_v60  ;;  %v3178_v60 = vsel %vm5978_vm3, %v3173_v28, %v3177_v50  ;;  %v3822_v50 = vrot.slane %v3820_v35, 4  ;;  %v5320_v28 = vrot.slane %v5304_v58, 9  ;;  %v3192_v11 = vrot.slane %v3190_v44, 4 }
 0x173   : > { %v3529_v62 = vunpack.c.l.b16 %v3178_v60  ;;  %v3195_v22 = vrot.slane %v3193_v55, 5  ;;  %v2489_v60 = vsel %vm6152_vm7, %v2487_v63, %v2488_v7  ;;  %v3927_v58 = vunpack.c.l.b16 %v3821_v4 }
 0x174   : > { %v2333_v12 = vpop.f32.mrf.mxu0  ;;  %v3824_v53 = vsel %vm6152_vm7, %v3822_v50, %v3823_v23  ;;  %v2588_v23 = vunpack.c.l.b16 %v2489_v60  ;;  %v3211_v63 = vrot.slane %v3209_v59, 5 }
 0x175   : > { %v1679_v54 = vpop.f32.mrf.mxu3  ;;  %v1041_v0 = vpop.f32.mrf.mxu1  ;;  %v3196_v44 = vor.u32 %v3195_v22, %v3192_v11  ;;  %v3827_v11 = vrot.slane %v6656_v33, 5  ;;  %v6695_v22 = vld [vmem:[%s5966_s6 + $0x40] sm:$0xf] }
 0x176   : > { %v1735_v61 = vadd.f32 %v1679_v54, %v1445_v8  ;;  %v5646_v8 = vld [vmem:[%s5966_s6 + $0x24] sm:$0xff]  ;;  %v3201_v54 = vrot.slane %v3199_v19, 5  ;;  %v1042_v55 = vadd.f32 %v1041_v0, %v6305_v24 }
 0x177   : > { %5562 = vmatmul.msk.bf16.vlgmr.msra.gmra.mxu0 %vm714_vm4, %v3957_v29  ;;  %v3530_v29 = vunpack.c.l.b16 %v3188_v39  ;;  %v3928_v39 = vunpack.c.l.b16 %v3824_v53  ;;  %v3197_v7 = vrot.slane %v3196_v44, 4 }
 0x178   : > { %v1391_v17 = vpop.f32.mrf.mxu2  ;;  %5336 = vmatmul.msk.bf16.gmra.mxu1 %vm714_vm4, %v2616_v40  ;;  %v6672_v42 = vadd.f32 %v2333_v12, %v1735_v61  ;;  %v2486_v61 = vsel %vm6152_vm7, %v5320_v28, %v2485_v15  ;;  %v3206_v19 = vor.u32 %v3205_v27, %v3201_v54 }
 0x179   : > { %v1446_v3 = vadd.f32 %v1391_v17, %v1039_v2  ;;  %v3560_v34 = vpack.c.b16 %v3530_v29, %v3529_v62  ;;  %v2587_v50 = vunpack.c.l.b16 %v2486_v61  ;;  %v5473_v62 = vld [vmem:[%s5966_s6 + $0x3c] sm:$0xf] }
 0x17a   : > { %v3207_v28 = vrot.slane %v3206_v19, 4  ;;  %v5844_v19 = vld [vmem:[%s5966_s6 + $0x38] sm:$0x1] }
 0x17b   : > { %v2617_v29 = vpack.c.b16 %v2588_v23, %v2587_v50  ;;  %v2495_v59 = vrot.slane %v5844_v19, 5  ;;  %v3830_v50 = vrot.slane %v6679_v52, 5  ;;  %v6718_v52 = vld [vmem:[%s5966_s6 + $0x44] sm:$0x1] }
 0x17c   : > { %v2335_v40 = vpop.f32.mrf.mxu0  ;;  %v3212_v44 = vsel %vm5978_vm3, %v3207_v28, %v3211_v63 }
 0x17d   : > { %v1681_v2 = vpop.f32.mrf.mxu3  ;;  %5449 = vmatmul.msk.bf16.gmra.mxu2 %vm714_vm4, %v5646_v8  ;;  %v1043_v12 = vpop.f32.mrf.mxu1  ;;  %v3958_v8 = vpack.c.b16 %v3928_v39, %v3927_v58  ;;  %v5305_v58 = vld [vmem:[%s5966_s6 + $0x30] sm:$0xe]  ;;  %v3227_v39 = vshrl.u32 %v6695_v22, 16 }
 0x17e   : > { %v1736_v35 = vadd.f32 %v1681_v2, %v1446_v3  ;;  %v5531_v3 = vld [vmem:[%s5966_s6 + $0x30] sm:$0xe]  ;;  %v5843_v2 = vld [vmem:[%s5966_s6 + $0x34] sm:$0xf]  ;;  %v1044_v33 = vadd.f32 %v1043_v12, %v6324_v57 }
 0x17f   : > { %v5547_v53 = vrot.slane %v5531_v3, 9  ;;  %v2492_v61 = vrot.slane %v5843_v2, 5  ;;  %v3229_v2 = vrot.slane %v3227_v39, 4  ;;  %v3233_v39 = vshll.u32 %v6718_v52, 16 }
 0x180   : > { %v1394_v17 = vpop.f32.mrf.mxu2  ;;  %v6691_v24 = vadd.f32 %v2335_v40, %v1736_v35  ;;  %v3214_v40 = vshrl.u32 %v5473_v62, 16  ;;  %v3217_v35 = vshll.u32 %v5473_v62, 16 }
 0x181   : > { %v1447_v15 = vadd.f32 %v1394_v17, %v1042_v55  ;;  %v3223_v55 = vshll.u32 %v6695_v22, 16  ;;  %v2494_v57 = vrot.slane %v2492_v61, 4  ;;  %v3828_v62 = vsel %vm6152_vm7, %v5547_v53, %v3827_v11 }
 0x182   : > { %5514 = vmatmul.msk.bf16.gmra.mxu3 %vm714_vm4, %v3560_v34  ;;  %v3202_v34 = vsel %vm5978_vm3, %v3197_v7, %v3201_v54  ;;  %v3829_v54 = vrot.slane %v3827_v11, 4  ;;  %v5321_v7 = vrot.slane %v5305_v58, 9  ;;  %v3216_v28 = vrot.slane %v3214_v40, 4 }
 0x183   : > { %v3531_v3 = vunpack.c.l.b16 %v3202_v34  ;;  %v3219_v63 = vrot.slane %v3217_v35, 5  ;;  %v2496_v34 = vsel %vm6152_vm7, %v2494_v57, %v2495_v59  ;;  %v3929_v58 = vunpack.c.l.b16 %v3828_v62 }
 0x184   : > { %v2338_v0 = vpop.f32.mrf.mxu0  ;;  %v3831_v19 = vsel %vm6152_vm7, %v3829_v54, %v3830_v50  ;;  %v2590_v50 = vunpack.c.l.b16 %v2496_v34  ;;  %v3235_v57 = vrot.slane %v3233_v39, 5 }
 0x185   : > { %v1684_v4 = vpop.f32.mrf.mxu3  ;;  %v1046_v27 = vpop.f32.mrf.mxu1  ;;  %v3220_v40 = vor.u32 %v3219_v63, %v3216_v28  ;;  %v3834_v28 = vrot.slane %v6695_v22, 5  ;;  %v6734_v63 = vld [vmem:[%s5966_s6 + $0x4c] sm:$0xf] }
 0x186   : > { %v1737_v60 = vadd.f32 %v1684_v4, %v1447_v15  ;;  %v5647_v15 = vld [vmem:[%s5966_s6 + $0x30] sm:$0xff]  ;;  %v3225_v4 = vrot.slane %v3223_v55, 5  ;;  %v1047_v35 = vadd.f32 %v1046_v27, %v6347_v26 }
 0x187   : > { %5563 = vmatmul.msk.bf16.gmra.mxu0 %vm714_vm4, %v3958_v8  ;;  %v3532_v8 = vunpack.c.l.b16 %v3212_v44  ;;  %v3930_v44 = vunpack.c.l.b16 %v3831_v19  ;;  %v3221_v59 = vrot.slane %v3220_v40, 4 }
 0x188   : > { %v1396_v17 = vpop.f32.mrf.mxu2  ;;  %5337 = vmatmul.msk.bf16.gmra.mxu1 %vm714_vm4, %v2617_v29  ;;  %v6711_v12 = vadd.f32 %v2338_v0, %v1737_v60  ;;  %v2493_v60 = vsel %vm6152_vm7, %v5321_v7, %v2492_v61  ;;  %v3230_v55 = vor.u32 %v3229_v2, %v3225_v4 }
 0x189   : > { %v1448_v23 = vadd.f32 %v1396_v17, %v1044_v33  ;;  %v3561_v53 = vpack.c.b16 %v3532_v8, %v3531_v3  ;;  %v2589_v54 = vunpack.c.l.b16 %v2493_v60  ;;  %v5476_v3 = vld [vmem:[%s5966_s6 + $0x48] sm:$0xf] }
 0x18a   : > { %v3231_v7 = vrot.slane %v3230_v55, 4  ;;  %v5846_v55 = vld [vmem:[%s5966_s6 + $0x44] sm:$0x1] }
 0x18b   : > { %v2618_v8 = vpack.c.b16 %v2590_v50, %v2589_v54  ;;  %v2502_v39 = vrot.slane %v5846_v55, 5  ;;  %v3837_v54 = vrot.slane %v6718_v52, 5  ;;  %v6757_v52 = vld [vmem:[%s5966_s6 + $0x50] sm:$0x1] }
 0x18c   : > { %v2340_v29 = vpop.f32.mrf.mxu0  ;;  %v3236_v40 = vsel %vm5978_vm3, %v3231_v7, %v3235_v57 }
 0x18d   : > { %v1686_v33 = vpop.f32.mrf.mxu3  ;;  %5450 = vmatmul.msk.bf16.gmra.mxu2 %vm714_vm4, %v5647_v15  ;;  %v1048_v0 = vpop.f32.mrf.mxu1  ;;  %v3959_v15 = vpack.c.b16 %v3930_v44, %v3929_v58  ;;  %v5306_v58 = vld [vmem:[%s5966_s6 + $0x3c] sm:$0xe]  ;;  %v3251_v44 = vshrl.u32 %v6734_v63, 16 }
 0x18e   : > { %v1738_v11 = vadd.f32 %v1686_v33, %v1448_v23  ;;  %v5532_v23 = vld [vmem:[%s5966_s6 + $0x3c] sm:$0xe]  ;;  %v5845_v33 = vld [vmem:[%s5966_s6 + $0x40] sm:$0xf]  ;;  %v1049_v22 = vadd.f32 %v1048_v0, %v6365_v56 }
 0x18f   : > { %v5548_v19 = vrot.slane %v5532_v23, 9  ;;  %v2499_v60 = vrot.slane %v5845_v33, 5  ;;  %v3253_v33 = vrot.slane %v3251_v44, 4  ;;  %v3257_v44 = vshll.u32 %v6757_v52, 16 }
 0x190   : > { %v1399_v17 = vpop.f32.mrf.mxu2  ;;  %v6730_v26 = vadd.f32 %v2340_v29, %v1738_v11  ;;  %v3238_v29 = vshrl.u32 %v5476_v3, 16  ;;  %v3241_v11 = vshll.u32 %v5476_v3, 16 }
 0x191   : > { %v1449_v61 = vadd.f32 %v1399_v17, %v1047_v35  ;;  %v3247_v35 = vshll.u32 %v6734_v63, 16  ;;  %v2501_v56 = vrot.slane %v2499_v60, 4  ;;  %v3835_v3 = vsel %vm6152_vm7, %v5548_v19, %v3834_v28 }
 0x192   : > { %5515 = vmatmul.msk.bf16.gmra.mxu3 %vm714_vm4, %v3561_v53  ;;  %v3226_v53 = vsel %vm5978_vm3, %v3221_v59, %v3225_v4  ;;  %v3836_v4 = vrot.slane %v3834_v28, 4  ;;  %v5322_v59 = vrot.slane %v5306_v58, 9  ;;  %v3240_v7 = vrot.slane %v3238_v29, 4 }
 0x193   : > { %v3533_v23 = vunpack.c.l.b16 %v3226_v53  ;;  %v3243_v57 = vrot.slane %v3241_v11, 5  ;;  %v2503_v53 = vsel %vm6152_vm7, %v2501_v56, %v2502_v39  ;;  %v3931_v58 = vunpack.c.l.b16 %v3835_v3 }
 0x194   : > { %v2343_v27 = vpop.f32.mrf.mxu0  ;;  %v3838_v55 = vsel %vm6152_vm7, %v3836_v4, %v3837_v54  ;;  %v2592_v54 = vunpack.c.l.b16 %v2503_v53  ;;  %v3259_v56 = vrot.slane %v3257_v44, 5 }
 0x195   : > { %v1689_v62 = vpop.f32.mrf.mxu3  ;;  %v1051_v2 = vpop.f32.mrf.mxu1  ;;  %v3244_v29 = vor.u32 %v3243_v57, %v3240_v7  ;;  %v3841_v7 = vrot.slane %v6734_v63, 5  ;;  %v6773_v57 = vld [vmem:[%s5966_s6 + $0x58] sm:$0xf] }
 0x196   : > { %v1739_v34 = vadd.f32 %v1689_v62, %v1449_v61  ;;  %v5648_v61 = vld [vmem:[%s5966_s6 + $0x3c] sm:$0xff]  ;;  %v3249_v62 = vrot.slane %v3247_v35, 5  ;;  %v1052_v11 = vadd.f32 %v1051_v2, %v6386_v32  ;;  %v3275_v44 = vshrl.u32 %v6773_v57, 16 }
 0x197   : > { %5564 = vmatmul.msk.bf16.gmra.mxu0 %vm714_vm4, %v3959_v15  ;;  %v3534_v15 = vunpack.c.l.b16 %v3236_v40  ;;  %v3932_v40 = vunpack.c.l.b16 %v3838_v55  ;;  %v3245_v39 = vrot.slane %v3244_v29, 4 }
 0x198   : > { %v1401_v17 = vpop.f32.mrf.mxu2  ;;  %5338 = vmatmul.msk.bf16.gmra.mxu1 %vm714_vm4, %v2618_v8  ;;  %v6750_v0 = vadd.f32 %v2343_v27, %v1739_v34  ;;  %v2500_v34 = vsel %vm6152_vm7, %v5322_v59, %v2499_v60  ;;  %v3254_v35 = vor.u32 %v3253_v33, %v3249_v62  ;;  %v5479_v60 = vld [vmem:[%s5966_s6 + $0x54] sm:$0xf] }
 0x199   : > { %v1450_v50 = vadd.f32 %v1401_v17, %v1049_v22  ;;  %v3562_v19 = vpack.c.b16 %v3534_v15, %v3533_v23  ;;  %v2591_v4 = vunpack.c.l.b16 %v2500_v34  ;;  %v5533_v23 = vld [vmem:[%s5966_s6 + $0x48] sm:$0xe]  ;;  %v3262_v3 = vshrl.u32 %v5479_v60, 16  ;;  %v5847_v34 = vld [vmem:[%s5966_s6 + $0x4c] sm:$0xf] }
 0x19a   : > { %v3255_v59 = vrot.slane %v3254_v35, 4  ;;  %v3265_v33 = vshll.u32 %v5479_v60, 16  ;;  %v2506_v53 = vrot.slane %v5847_v34, 5  ;;  %v3271_v35 = vshll.u32 %v6773_v57, 16 }
 0x19b   : > { %v2619_v15 = vpack.c.b16 %v2592_v54, %v2591_v4  ;;  %v3843_v4 = vrot.slane %v3841_v7, 4  ;;  %v3264_v54 = vrot.slane %v3262_v3, 4  ;;  %v3277_v34 = vrot.slane %v3275_v44, 4 }
 0x19c   : > { %v2345_v8 = vpop.f32.mrf.mxu0 }
 0x19d   : > { %v1691_v22 = vpop.f32.mrf.mxu3  ;;  %5451 = vmatmul.msk.bf16.gmra.mxu2 %vm714_vm4, %v5648_v61  ;;  %v1053_v27 = vpop.f32.mrf.mxu1 }
 0x19e   : > { %v1740_v28 = vadd.f32 %v1691_v22, %v1450_v50  ;;  %v3960_v50 = vpack.c.b16 %v3932_v40, %v3931_v58  ;;  %v1054_v63 = vadd.f32 %v1053_v27, %v6401_v5  ;;  %v3260_v40 = vsel %vm5978_vm3, %v3255_v59, %v3259_v56 }
 0x19f   : > { %v2508_v5 = vrot.slane %v2506_v53, 4  ;;  %v3536_v56 = vunpack.c.l.b16 %v3260_v40 }
 0x1a0   : > { %v1404_v17 = vpop.f32.mrf.mxu2  ;;  %v6769_v32 = vadd.f32 %v2345_v8, %v1740_v28  ;;  %v3250_v8 = vsel %vm5978_vm3, %v3245_v39, %v3249_v62  ;;  %v5549_v28 = vrot.slane %v5533_v23, 9  ;;  %v3844_v62 = vrot.slane %v6757_v52, 5  ;;  %v5649_v39 = vld [vmem:[%s5966_s6 + $0x48] sm:$0xff]  ;;  %v6796_v52 = vld [vmem:[%s5966_s6 + $0x5c] sm:$0x1] }
 0x1a1   : > { %v1451_v61 = vadd.f32 %v1404_v17, %v1052_v11  ;;  %v5307_v11 = vld [vmem:[%s5966_s6 + $0x48] sm:$0xe]  ;;  %v3535_v59 = vunpack.c.l.b16 %v3250_v8  ;;  %v3281_v44 = vshll.u32 %v6796_v52, 16 }
 0x1a2   : > { %5516 = vmatmul.msk.bf16.gmra.mxu3 %vm714_vm4, %v3562_v19  ;;  %v5848_v19 = vld [vmem:[%s5966_s6 + $0x50] sm:$0x1]  ;;  %v3842_v23 = vsel %vm6152_vm7, %v5549_v28, %v3841_v7 }
 0x1a3   : > { %v2509_v58 = vrot.slane %v5848_v19, 5  ;;  %v3845_v19 = vsel %vm6152_vm7, %v3843_v4, %v3844_v62  ;;  %v3563_v28 = vpack.c.b16 %v3536_v56, %v3535_v59 }
 0x1a4   : > { %v2348_v2 = vpop.f32.mrf.mxu0  ;;  %v3934_v40 = vunpack.c.l.b16 %v3845_v19 }
 0x1a5   : > { %v1694_v55 = vpop.f32.mrf.mxu3  ;;  %v1056_v22 = vpop.f32.mrf.mxu1  ;;  %v2510_v7 = vsel %vm6152_vm7, %v2508_v5, %v2509_v58  ;;  %v3848_v58 = vrot.slane %v6773_v57, 5  ;;  %v3851_v57 = vrot.slane %v6796_v52, 5 }
 0x1a6   : > { %v1741_v29 = vadd.f32 %v1694_v55, %v1451_v61  ;;  %v3267_v61 = vrot.slane %v3265_v33, 5  ;;  %v3273_v55 = vrot.slane %v3271_v35, 5  ;;  %v2594_v62 = vunpack.c.l.b16 %v2510_v7  ;;  %v5849_v7 = vld [vmem:[%s5966_s6 + $0x58] sm:$0xf] }
 0x1a7   : > { %5565 = vmatmul.msk.bf16.gmra.mxu0 %vm714_vm4, %v3960_v50  ;;  %v5323_v50 = vrot.slane %v5307_v11, 9  ;;  %v3933_v11 = vunpack.c.l.b16 %v3842_v23 }
 0x1a8   : > { %v1406_v17 = vpop.f32.mrf.mxu2  ;;  %5339 = vmatmul.msk.bf16.gmra.mxu1 %vm714_vm4, %v2619_v15  ;;  %v6789_v27 = vadd.f32 %v2348_v2, %v1741_v29  ;;  %v3268_v29 = vor.u32 %v3267_v61, %v3264_v54  ;;  %v3278_v35 = vor.u32 %v3277_v34, %v3273_v55 }
 0x1a9   : > { %v1452_v60 = vadd.f32 %v1406_v17, %v1054_v63  ;;  %v2507_v2 = vsel %vm6152_vm7, %v5323_v50, %v2506_v53  ;;  %v1057_v63 = vadd.f32 %v1056_v22, %v6273_v45  ;;  %v5534_v50 = vld [vmem:[%s5966_s6 + $0x54] sm:$0xe]  ;;  %v3961_v54 = vpack.c.b16 %v3934_v40, %v3933_v11  ;;  %v6810_v22 = vld [vmem:[%s5966_s6 + $0x64] sm:$0xf]  ;;  %v5850_v40 = vld [vmem:[%s5966_s6 + $0x5c] sm:$0x1] }
 0x1aa   : > { %7882 = vst [vmem:[#allocation4_spill] sm:$0xff] %v6789_v27  ;;  %v2593_v4 = vunpack.c.l.b16 %v2507_v2  ;;  %v3269_v53 = vrot.slane %v3268_v29, 4  ;;  %v5482_v27 = vld [vmem:[%s5966_s6 + $0x60] sm:$0xf]  ;;  %v3279_v61 = vrot.slane %v3278_v35, 4  ;;  %v3283_v45 = vrot.slane %v3281_v44, 5 }
 0x1ab   : > { %v5550_v56 = vrot.slane %v5534_v50, 9  ;;  %v3286_v23 = vshrl.u32 %v5482_v27, 16  ;;  %v3289_v34 = vshll.u32 %v5482_v27, 16  ;;  %v2513_v29 = vrot.slane %v5849_v7, 5 }
 0x1ac   : > { %v2350_v15 = vpop.f32.mrf.mxu0  ;;  %v2620_v59 = vpack.c.b16 %v2594_v62, %v2593_v4  ;;  %v3274_v2 = vsel %vm5978_vm3, %v3269_v53, %v3273_v55  ;;  %v3850_v11 = vrot.slane %v3848_v58, 4  ;;  %v2516_v35 = vrot.slane %v5850_v40, 5  ;;  %v5650_v53 = vld [vmem:[%s5966_s6 + $0x54] sm:$0xff]  ;;  %v5485_v40 = vld [vmem:[%s5966_s6 + $0x6c] sm:$0xf] }
 0x1ad   : > { %v1696_v3 = vpop.f32.mrf.mxu3  ;;  %5452 = vmatmul.msk.bf16.gmra.mxu2 %vm714_vm4, %v5649_v39  ;;  %v1058_v33 = vpop.f32.mrf.mxu1  ;;  %v3284_v55 = vsel %vm5978_vm3, %v3279_v61, %v3283_v45  ;;  %v3537_v44 = vunpack.c.l.b16 %v3274_v2  ;;  %v3288_v4 = vrot.slane %v3286_v23, 4  ;;  %v3291_v62 = vrot.slane %v3289_v34, 5 }
 0x1ae   : > { %v1742_v8 = vadd.f32 %v1696_v3, %v1452_v60  ;;  %v1059_v27 = vadd.f32 %v1058_v33, %v6296_v9  ;;  %v3538_v9 = vunpack.c.l.b16 %v3284_v55  ;;  %v3852_v33 = vsel %vm6152_vm7, %v3850_v11, %v3851_v57 }
 0x1af   : > { %v3936_v23 = vunpack.c.l.b16 %v3852_v33  ;;  %v3292_v7 = vor.u32 %v3291_v62, %v3288_v4  ;;  %v5535_v4 = vld [vmem:[%s5966_s6 + $0x60] sm:$0xe]  ;;  %v3855_v62 = vrot.slane %v6810_v22, 5 }
 0x1b0   : > { %v1409_v17 = vpop.f32.mrf.mxu2  ;;  %v6812_v60 = vadd.f32 %v2350_v15, %v1742_v8  ;;  %v5308_v15 = vld [vmem:[%s5966_s6 + $0x54] sm:$0xe]  ;;  %v3295_v8 = vshll.u32 %v6810_v22, 16  ;;  %v3564_v11 = vpack.c.b16 %v3538_v9, %v3537_v44 }
 0x1b1   : > { %v1453_v39 = vadd.f32 %v1409_v17, %v1057_v63  ;;  %v3299_v63 = vshrl.u32 %v6810_v22, 16  ;;  %v3849_v17 = vsel %vm6152_vm7, %v5550_v56, %v3848_v58  ;;  %v5324_v50 = vrot.slane %v5308_v15, 9 }
 0x1b2   : > { %5517 = vmatmul.msk.bf16.gmra.mxu3 %vm714_vm4, %v3563_v28  ;;  %v6834_v61 = vrot.slane %v3295_v8, 5  ;;  %v3935_v58 = vunpack.c.l.b16 %v3849_v17  ;;  %v6849_v17 = vld [vmem:[%s5966_s6 + $0x70] sm:$0xf] }
 0x1b3   : > { %v3301_v45 = vrot.slane %v3299_v63, 4 }
 0x1b4   : > { %v2353_v5 = vpop.f32.mrf.mxu0 }
 0x1b5   : > { %v1699_v19 = vpop.f32.mrf.mxu3  ;;  %v1061_v3 = vpop.f32.mrf.mxu1  ;;  %v3302_v15 = vor.u32 %v3301_v45, %v6834_v61 }
 0x1b6   : > { %v1743_v28 = vadd.f32 %v1699_v19, %v1453_v39  ;;  %v2515_v19 = vrot.slane %v2513_v29, 4  ;;  %v1062_v63 = vadd.f32 %v1061_v3, %v6317_v46  ;;  %v3319_v46 = vshll.u32 %v6849_v17, 16 }
 0x1b7   : > { %5566 = vmatmul.msk.bf16.gmra.mxu0 %vm714_vm4, %v3961_v54  ;;  %v3323_v3 = vshrl.u32 %v6849_v17, 16 }
 0x1b8   : > { %v1411_v52 = vpop.f32.mrf.mxu2  ;;  %5340 = vmatmul.msk.bf16.gmra.mxu1 %vm714_vm4, %v2620_v59  ;;  %v6830_v54 = vadd.f32 %v2353_v5, %v1743_v28  ;;  %v6837_v59 = vld [vmem:[%s5966_s6 + $0x68] sm:$0x1]  ;;  %v2514_v5 = vsel %vm6152_vm7, %v5324_v50, %v2513_v29  ;;  %v2517_v57 = vsel %vm6152_vm7, %v2515_v19, %v2516_v35  ;;  %v3962_v29 = vpack.c.b16 %v3936_v23, %v3935_v58 }
 0x1b9   : > { %v1454_v39 = vadd.f32 %v1411_v52, %v1059_v27  ;;  %v3305_v8 = vshll.u32 %v6837_v59, 16  ;;  %v2595_v55 = vunpack.c.l.b16 %v2514_v5  ;;  %v2596_v52 = vunpack.c.l.b16 %v2517_v57  ;;  %v5851_v57 = vld [vmem:[%s5966_s6 + $0x64] sm:$0xf] }
 0x1ba   : > { %v3293_v50 = vrot.slane %v3292_v7, 4  ;;  %v3303_v35 = vrot.slane %v3302_v15, 4  ;;  %v3313_v19 = vshll.u32 %v5485_v40, 16  ;;  %v5551_v5 = vrot.slane %v5535_v4, 9  ;;  %v5309_v15 = vld [vmem:[%s5966_s6 + $0x60] sm:$0xe] }
 0x1bb   : > { %v3307_v44 = vrot.slane %v3305_v8, 5  ;;  %v2621_v45 = vpack.c.b16 %v2596_v52, %v2595_v55  ;;  %v3858_v22 = vrot.slane %v6837_v59, 5  ;;  %v2520_v7 = vrot.slane %v5851_v57, 5  ;;  %v5852_v55 = vld [vmem:[%s5966_s6 + $0x68] sm:$0x1]  ;;  %v5651_v4 = vld [vmem:[%s5966_s6 + $0x60] sm:$0xff] }
 0x1bc   : > { %v2355_v2 = vpop.f32.mrf.mxu0  ;;  %v3298_v23 = vsel %vm5978_vm3, %v3293_v50, %v6834_v61  ;;  %v3321_v61 = vrot.slane %v3319_v46, 5  ;;  %v2523_v59 = vrot.slane %v5852_v55, 5 }
 0x1bd   : > { %v1701_v56 = vpop.f32.mrf.mxu3  ;;  %5453 = vmatmul.msk.bf16.gmra.mxu2 %vm714_vm4, %v5650_v53  ;;  %v1063_v34 = vpop.f32.mrf.mxu1 }
 0x1be   : > { %v1744_v28 = vadd.f32 %v1701_v56, %v1454_v39  ;;  %v3310_v39 = vshrl.u32 %v5485_v40, 16  ;;  %v3315_v40 = vrot.slane %v3313_v19, 5 }
 0x1c0   : > { %v1414_v27 = vpop.f32.mrf.mxu2  ;;  %v6856_v9 = vadd.f32 %v2355_v2, %v1744_v28  ;;  %v3308_v2 = vsel %vm5978_vm3, %v3303_v35, %v3307_v44  ;;  %v3857_v28 = vrot.slane %v3855_v62, 4  ;;  %v3312_v8 = vrot.slane %v3310_v39, 4 }
 0x1c1   : > { %v1455_v53 = vadd.f32 %v1414_v27, %v1062_v63  ;;  %v1064_v63 = vadd.f32 %v1063_v34, %v6334_v25  ;;  %v3325_v27 = vrot.slane %v3323_v3, 4  ;;  %v5325_v35 = vrot.slane %v5309_v15, 9 }
 0x1c2   : > { %5518 = vmatmul.msk.bf16.gmra.mxu3 %vm714_vm4, %v3564_v11  ;;  %7883 = vst [vmem:[#allocation5_spill] sm:$0xff] %v6856_v9  ;;  %v2522_v44 = vrot.slane %v2520_v7, 4  ;;  %v3539_v39 = vunpack.c.l.b16 %v3298_v23  ;;  %v3856_v25 = vsel %vm6152_vm7, %v5551_v5, %v3855_v62  ;;  %v3859_v34 = vsel %vm6152_vm7, %v3857_v28, %v3858_v22 }
 0x1c3   : > { %v3316_v19 = vor.u32 %v3315_v40, %v3312_v8  ;;  %v3326_v46 = vor.u32 %v3325_v27, %v3321_v61  ;;  %v3937_v22 = vunpack.c.l.b16 %v3856_v25 }
 0x1c4   : > { %v2358_v33 = vpop.f32.mrf.mxu0  ;;  %v2524_v62 = vsel %vm6152_vm7, %v2522_v44, %v2523_v59  ;;  %v3862_v59 = vrot.slane %v6849_v17, 5  ;;  %v5310_v17 = vld [vmem:[%s5966_s6 + $0x6c] sm:$0xe] }
 0x1c5   : > { %v1704_v58 = vpop.f32.mrf.mxu3  ;;  %v1066_v56 = vpop.f32.mrf.mxu1  ;;  %v3317_v28 = vrot.slane %v3316_v19, 4  ;;  %v3327_v8 = vrot.slane %v3326_v46, 4  ;;  %v2598_v55 = vunpack.c.l.b16 %v2524_v62 }
 0x1c6   : > { %v1745_v11 = vadd.f32 %v1704_v58, %v1455_v53  ;;  %v6871_v53 = vld [vmem:[%s5966_s6 + $0x74] sm:$0x1] }
 0x1c7   : > { %5567 = vmatmul.msk.bf16.gmra.mxu0 %vm714_vm4, %v3962_v29  ;;  %v3540_v29 = vunpack.c.l.b16 %v3308_v2  ;;  %v3329_v3 = vshll.u32 %v6871_v53, 16  ;;  %v1067_v2 = vadd.f32 %v1066_v56, %v6355_v47  ;;  %v3322_v47 = vsel %vm5978_vm3, %v3317_v28, %v3321_v61 }
 0x1c8   : > { %v1416_v52 = vpop.f32.mrf.mxu2  ;;  %5341 = vmatmul.msk.bf16.gmra.mxu1 %vm714_vm4, %v2621_v45  ;;  %v6874_v58 = vadd.f32 %v2358_v33, %v1745_v11  ;;  %v2521_v33 = vsel %vm6152_vm7, %v5325_v35, %v2520_v7  ;;  %v3938_v11 = vunpack.c.l.b16 %v3859_v34  ;;  %v3541_v62 = vunpack.c.l.b16 %v3322_v47  ;;  %v5491_v47 = vld [vmem:[%s5966_s6 + $0x84] sm:$0xf] }
 0x1c9   : > { %v1456_v50 = vadd.f32 %v1416_v52, %v1064_v63  ;;  %v3565_v5 = vpack.c.b16 %v3540_v29, %v3539_v39  ;;  %v3331_v63 = vrot.slane %v3329_v3, 5  ;;  %v2597_v27 = vunpack.c.l.b16 %v2521_v33  ;;  %v5488_v52 = vld [vmem:[%s5966_s6 + $0x78] sm:$0xf] }
 0x1ca   : > { %7884 = vst [vmem:[#allocation6_spill] sm:$0xff] %v6874_v58  ;;  %v6889_v58 = vld [vmem:[%s5966_s6 + $0x7c] sm:$0xf]  ;;  %v3963_v7 = vpack.c.b16 %v3938_v11, %v3937_v22  ;;  %v3334_v35 = vshrl.u32 %v5488_v52, 16  ;;  %v3337_v25 = vshll.u32 %v5488_v52, 16  ;;  %v3864_v11 = vrot.slane %v3862_v59, 4 }
 0x1cb   : > { %v3332_v56 = vsel %vm5978_vm3, %v3327_v8, %v3331_v63  ;;  %v2622_v29 = vpack.c.b16 %v2598_v55, %v2597_v27  ;;  %v3343_v34 = vshll.u32 %v6889_v58, 16  ;;  %v3347_v19 = vshrl.u32 %v6889_v58, 16 }
 0x1cc   : > { %v2360_v45 = vpop.f32.mrf.mxu0  ;;  %v3542_v22 = vunpack.c.l.b16 %v3332_v56  ;;  %v5326_v8 = vrot.slane %v5310_v17, 9  ;;  %v3339_v63 = vrot.slane %v3337_v25, 5 }
 0x1cd   : > { %v1706_v57 = vpop.f32.mrf.mxu3  ;;  %5454 = vmatmul.msk.bf16.gmra.mxu2 %vm714_vm4, %v5651_v4  ;;  %v1068_v15 = vpop.f32.mrf.mxu1  ;;  %v3349_v27 = vrot.slane %v3347_v19, 4 }
 0x1ce   : > { %v1746_v23 = vadd.f32 %v1706_v57, %v1456_v50  ;;  %v5536_v50 = vld [vmem:[%s5966_s6 + $0x6c] sm:$0xe]  ;;  %v5853_v57 = vld [vmem:[%s5966_s6 + $0x70] sm:$0xf] }
 0x1cf   : > { %v2527_v33 = vrot.slane %v5853_v57, 5 }
 0x1d0   : > { %v1419_v40 = vpop.f32.mrf.mxu2  ;;  %v6898_v44 = vadd.f32 %v2360_v45, %v1746_v23  ;;  %v3865_v45 = vrot.slane %v6871_v53, 5  ;;  %v1069_v23 = vadd.f32 %v1068_v15, %v6374_v10  ;;  %v5652_v53 = vld [vmem:[%s5966_s6 + $0x6c] sm:$0xff]  ;;  %v6915_v15 = vld [vmem:[%s5966_s6 + $0x80] sm:$0x1] }
 0x1d1   : > { %v1457_v4 = vadd.f32 %v1419_v40, %v1067_v2  ;;  %v3336_v2 = vrot.slane %v3334_v35, 4  ;;  %v6908_v40 = vrot.slane %v3343_v34, 5  ;;  %v2529_v52 = vrot.slane %v2527_v33, 4 }
 0x1d2   : > { %5519 = vmatmul.msk.bf16.gmra.mxu3 %vm714_vm4, %v3565_v5  ;;  %7885 = vst [vmem:[#allocation7_spill] sm:$0xff] %v6898_v44  ;;  %v5552_v5 = vrot.slane %v5536_v50, 9  ;;  %v6921_v50 = vld [vmem:[%s5966_s6 + $0x88] sm:$0xf]  ;;  %v3866_v25 = vsel %vm6152_vm7, %v3864_v11, %v3865_v45  ;;  %v2528_v17 = vsel %vm6152_vm7, %v5326_v8, %v2527_v33  ;;  %v3353_v57 = vshll.u32 %v6915_v15, 16 }
 0x1d3   : > { %v3340_v34 = vor.u32 %v3339_v63, %v3336_v2  ;;  %v3350_v19 = vor.u32 %v3349_v27, %v6908_v40  ;;  %v3367_v45 = vshll.u32 %v6921_v50, 16  ;;  %v3940_v2 = vunpack.c.l.b16 %v3866_v25  ;;  %v5493_v25 = vld [vmem:[%s5966_s6 + $0x8c] sm:$0x1] }
 0x1d4   : > { %v2363_v39 = vpop.f32.mrf.mxu0  ;;  %v3863_v56 = vsel %vm6152_vm7, %v5552_v5, %v3862_v59  ;;  %v3361_v5 = vshll.u32 %v5491_v47, 16  ;;  %v2599_v33 = vunpack.c.l.b16 %v2528_v17 }
 0x1d5   : > { %v1709_v46 = vpop.f32.mrf.mxu3  ;;  %v1071_v3 = vpop.f32.mrf.mxu1  ;;  %v3939_v11 = vunpack.c.l.b16 %v3863_v56  ;;  %v3341_v63 = vrot.slane %v3340_v34, 4 }
 0x1d6   : > { %v1747_v61 = vadd.f32 %v1709_v46, %v1457_v4  ;;  %v5854_v4 = vld [vmem:[%s5966_s6 + $0x74] sm:$0x1] }
 0x1d7   : > { %5568 = vmatmul.msk.bf16.gmra.mxu0 %vm714_vm4, %v3963_v7  ;;  %v2530_v7 = vrot.slane %v5854_v4, 5  ;;  %v5537_v4 = vld [vmem:[%s5966_s6 + $0x78] sm:$0xe]  ;;  %v3964_v56 = vpack.c.b16 %v3940_v2, %v3939_v11  ;;  %v3377_v11 = vshll.u32 %v5493_v25, 16 }
 0x1d8   : > { %v1421_v28 = vpop.f32.mrf.mxu2  ;;  %5342 = vmatmul.msk.bf16.gmra.mxu1 %vm714_vm4, %v2622_v29  ;;  %v6912_v10 = vadd.f32 %v2363_v39, %v1747_v61  ;;  %v3566_v29 = vpack.c.b16 %v3542_v22, %v3541_v62  ;;  %v3358_v61 = vshrl.u32 %v5491_v47, 16  ;;  %v1072_v22 = vadd.f32 %v1071_v3, %v6397_v43 }
 0x1d9   : > { %v1458_v55 = vadd.f32 %v1421_v28, %v1069_v23  ;;  %v2531_v59 = vsel %vm6152_vm7, %v2529_v52, %v2530_v7  ;;  %v3371_v23 = vshrl.u32 %v6921_v50, 16  ;;  %v3355_v52 = vrot.slane %v3353_v57, 5  ;;  %v5311_v57 = vld [vmem:[%s5966_s6 + $0x78] sm:$0xe] }
 0x1da   : > { %7886 = vst [vmem:[#allocation8_spill] sm:$0xff] %v6912_v10  ;;  %v2600_v8 = vunpack.c.l.b16 %v2531_v59  ;;  %v3360_v7 = vrot.slane %v3358_v61, 4  ;;  %v3363_v47 = vrot.slane %v3361_v5, 5  ;;  %v6938_v43 = vrot.slane %v3367_v45, 5  ;;  %v5855_v45 = vld [vmem:[%s5966_s6 + $0x7c] sm:$0xf] }
 0x1db   : > { %v3373_v3 = vrot.slane %v3371_v23, 4  ;;  %v3872_v59 = vrot.slane %v6915_v15, 5 }
 0x1dc   : > { %v2365_v35 = vpop.f32.mrf.mxu0  ;;  %v2623_v17 = vpack.c.b16 %v2600_v8, %v2599_v33  ;;  %v3364_v23 = vor.u32 %v3363_v47, %v3360_v7  ;;  %v5856_v47 = vld [vmem:[%s5966_s6 + $0x80] sm:$0x1] }
 0x1dd   : > { %v1711_v46 = vpop.f32.mrf.mxu3  ;;  %5455 = vmatmul.msk.bf16.gmra.mxu2 %vm714_vm4, %v5652_v53  ;;  %v1073_v39 = vpop.f32.mrf.mxu1  ;;  %v3351_v53 = vrot.slane %v3350_v19, 4  ;;  %v5553_v19 = vrot.slane %v5537_v4, 9  ;;  %v3374_v15 = vor.u32 %v3373_v3, %v6938_v43  ;;  %v5653_v4 = vld [vmem:[%s5966_s6 + $0x78] sm:$0xff]  ;;  %v2537_v3 = vrot.slane %v5856_v47, 5 }
 0x1de   : > { %v1748_v62 = vadd.f32 %v1711_v46, %v1458_v55  ;;  %v3869_v55 = vrot.slane %v6889_v58, 5  ;;  %v1074_v2 = vadd.f32 %v1073_v39, %v6414_v21  ;;  %v3365_v39 = vrot.slane %v3364_v23, 4 }
 0x1df   : > { %v3356_v61 = vsel %vm5978_vm3, %v3351_v53, %v3355_v52  ;;  %v5538_v53 = vld [vmem:[%s5966_s6 + $0x84] sm:$0xe] }
 0x1e0   : > { %v1424_v28 = vpop.f32.mrf.mxu2  ;;  %v6941_v46 = vadd.f32 %v2365_v35, %v1748_v62  ;;  %v3871_v5 = vrot.slane %v3869_v55, 4  ;;  %v2534_v35 = vrot.slane %v5855_v45, 5  ;;  %v6969_v45 = vld [vmem:[%s5966_s6 + $0x94] sm:$0xf] }
 0x1e1   : > { %v1459_v27 = vadd.f32 %v1424_v28, %v1072_v22  ;;  %v3876_v28 = vrot.slane %v6921_v50, 5 }
 0x1e2   : > { %5520 = vmatmul.msk.bf16.gmra.mxu3 %vm714_vm4, %v3566_v29  ;;  %7887 = vst [vmem:[#allocation9_spill] sm:$0xff] %v6941_v46  ;;  %v3346_v29 = vsel %vm5978_vm3, %v3341_v63, %v6908_v40  ;;  %v5327_v40 = vrot.slane %v5311_v57, 9  ;;  %v3544_v63 = vunpack.c.l.b16 %v3356_v61  ;;  %v2536_v7 = vrot.slane %v2534_v35, 4 }
 0x1e3   : > { %v3543_v8 = vunpack.c.l.b16 %v3346_v29  ;;  %v3873_v50 = vsel %vm6152_vm7, %v3871_v5, %v3872_v59  ;;  %v3379_v57 = vrot.slane %v3377_v11, 5  ;;  %v3879_v29 = vrot.slane %v5493_v25, 5 }
 0x1e4   : > { %v2368_v34 = vpop.f32.mrf.mxu0  ;;  %v3942_v59 = vunpack.c.l.b16 %v3873_v50  ;;  %v2538_v23 = vsel %vm6152_vm7, %v2536_v7, %v2537_v3  ;;  %v3370_v25 = vsel %vm5978_vm3, %v3365_v39, %v6938_v43 }
 0x1e5   : > { %v1714_v22 = vpop.f32.mrf.mxu3  ;;  %v2691_v58 = vpop.f32.mrf.mxu1  ;;  %v2602_v43 = vunpack.c.l.b16 %v2538_v23 }
 0x1e6   : > { %v1749_v62 = vadd.f32 %v1714_v22, %v1459_v27  ;;  %v3870_v27 = vsel %vm6152_vm7, %v5553_v19, %v3869_v55  ;;  %v2535_v22 = vsel %vm6152_vm7, %v5327_v40, %v2534_v35  ;;  %v5554_v55 = vrot.slane %v5538_v53, 9 }
 0x1e7   : > { %5569 = vmatmul.msk.bf16.gmra.mxu0 %vm714_vm4, %v3964_v56  ;;  %v5494_v56 = vld [vmem:[%s5966_s6 + $0x90] sm:$0xf]  ;;  %v3878_v19 = vrot.slane %v3876_v28, 4  ;;  %v2601_v35 = vunpack.c.l.b16 %v2535_v22  ;;  %v2771_v53 = vadd.f32 %v2691_v58, %v6431_v49  ;;  %v5857_v22 = vld [vmem:[%s5966_s6 + $0x88] sm:$0xf] }
 0x1e8   : > { %v1426_v33 = vpop.f32.mrf.mxu2  ;;  %5343 = vmatmul.msk.bf16.gmra.mxu1 %vm714_vm4, %v2623_v17  ;;  %v6962_v21 = vadd.f32 %v2368_v34, %v1749_v62  ;;  %v3375_v17 = vrot.slane %v3374_v15, 4  ;;  %v3567_v34 = vpack.c.b16 %v3544_v63, %v3543_v8  ;;  %v3941_v62 = vunpack.c.l.b16 %v3870_v27 }
 0x1e9   : > { %v1460_v52 = vadd.f32 %v1426_v33, %v1074_v2  ;;  %v3382_v2 = vshrl.u32 %v5494_v56, 16  ;;  %v3385_v33 = vshll.u32 %v5494_v56, 16  ;;  %v3877_v40 = vsel %vm6152_vm7, %v5554_v55, %v3876_v28 }
 0x1ea   : > { %7888 = vst [vmem:[#allocation10_spill] sm:$0xff] %v6962_v21  ;;  %v3380_v11 = vsel %vm5978_vm3, %v3375_v17, %v3379_v57  ;;  %v3880_v8 = vsel %vm6152_vm7, %v3878_v19, %v3879_v29  ;;  %v3391_v63 = vshll.u32 %v6969_v45, 16  ;;  %v3395_v27 = vshrl.u32 %v6969_v45, 16  ;;  %v5312_v57 = vld [vmem:[%s5966_s6 + $0x84] sm:$0xe] }
 0x1eb   : > { %v3387_v7 = vrot.slane %v3385_v33, 5  ;;  %v3965_v3 = vpack.c.b16 %v3942_v59, %v3941_v62  ;;  %v6986_v56 = vunpack.c.l.b16 %v3370_v25  ;;  %v6989_v50 = vunpack.c.l.b16 %v3380_v11  ;;  %v6994_v19 = vld [vmem:[%s5966_s6 + $0x98] sm:$0x1]  ;;  %v7003_v25 = vld [vmem:[%s7873_s2] ss:$0 sm:$0xff] }
 0x1ec   : > { %v2370_v61 = vpop.f32.mrf.mxu0  ;;  %v3943_v39 = vunpack.c.l.b16 %v3877_v40  ;;  %v3944_v17 = vunpack.c.l.b16 %v3880_v8  ;;  %v2541_v55 = vrot.slane %v5857_v22, 5  ;;  %v6996_v49 = vrot.slane %v3391_v63, 5  ;;  %v5858_v8 = vld [vmem:[%s5966_s6 + $0x8c] sm:$0x1] }
 0x1ed   : > { %v1716_v47 = vpop.f32.mrf.mxu3  ;;  %5456 = vmatmul.msk.bf16.gmra.mxu2 %vm714_vm4, %v5653_v4  ;;  %v2693_v5 = vpop.f32.mrf.mxu1  ;;  %v3384_v4 = vrot.slane %v3382_v2, 4  ;;  %v3397_v58 = vrot.slane %v3395_v27, 4  ;;  %v2624_v33 = vpack.c.b16 %v2602_v43, %v2601_v35  ;;  %v5328_v59 = vrot.slane %v5312_v57, 9 }
 0x1ee   : > { %v1750_v15 = vadd.f32 %v1716_v47, %v1460_v52  ;;  %v7007_v40 = vpack.c.b16 %v3944_v17, %v3943_v39  ;;  %v2543_v35 = vrot.slane %v2541_v55, 4  ;;  %v2544_v63 = vrot.slane %v5858_v8, 5  ;;  %v5539_v17 = vld [vmem:[%s5966_s6 + $0x90] sm:$0xe] }
 0x1ef   : > { %v3388_v47 = vor.u32 %v3387_v7, %v3384_v4  ;;  %v3398_v27 = vor.u32 %v3397_v58, %v6996_v49  ;;  %v7021_v4 = vld [vmem:[%s7874_s3] ss:$0 sm:$0xff]  ;;  %v2542_v39 = vsel %vm6152_vm7, %v5328_v59, %v2541_v55  ;;  %v3883_v57 = vrot.slane %v6969_v45, 5 }
 0x1f0   : > { %v2981_v52 = vpop.f32.mrf.mxu2  ;;  %v6998_v29 = vadd.f32 %v2370_v61, %v1750_v15  ;;  %v3401_v61 = vshll.u32 %v6994_v19, 16  ;;  %v2772_v15 = vadd.f32 %v2693_v5, %v6444_v1  ;;  %v5555_v21 = vrot.slane %v5539_v17, 9 }
 0x1f1   : > { %v3061_v28 = vadd.f32 %v2981_v52, %v2771_v53  ;;  %v5497_v53 = vld [vmem:[%s5966_s6 + $0x9c] sm:$0xf]  ;;  %v7016_v52 = vld [vmem:[%s5966_s6 + $0xa0] sm:$0xf]  ;;  %v3389_v1 = vrot.slane %v3388_v47, 4  ;;  %v3399_v47 = vrot.slane %v3398_v27, 4  ;;  %v2603_v27 = vunpack.c.l.b16 %v2542_v39 }
 0x1f2   : > { %5521 = vmatmul.msk.bf16.gmra.mxu3 %vm714_vm4, %v3567_v34  ;;  %7889 = vst [vmem:[#allocation11_spill] sm:$0xff] %v6998_v29  ;;  %v3406_v5 = vshrl.u32 %v5497_v53, 16  ;;  %v3415_v22 = vshll.u32 %v7016_v52, 16  ;;  %v3419_v58 = vshrl.u32 %v7016_v52, 16  ;;  %v3403_v8 = vrot.slane %v3401_v61, 5 }
 0x1f3   : > { %v2545_v29 = vsel %vm6152_vm7, %v2543_v35, %v2544_v63 }
 0x1f4   : > { %v4033_v2 = vpop.f32.mrf.mxu0  ;;  %v7035_v11 = vrot.slane %v3415_v22, 5  ;;  %v3421_v55 = vrot.slane %v3419_v58, 4  ;;  %v5313_v22 = vld [vmem:[%s5966_s6 + $0x90] sm:$0xe]  ;;  %v2604_v17 = vunpack.c.l.b16 %v2545_v29 }
 0x1f5   : > { %v3635_v34 = vpop.f32.mrf.mxu3  ;;  %v2696_v62 = vpop.f32.mrf.mxu1  ;;  %v5329_v39 = vrot.slane %v5313_v22, 9 }
 0x1f6   : > { %v3715_v23 = vadd.f32 %v3635_v34, %v3061_v28  ;;  %v5654_v28 = vld [vmem:[%s5966_s6 + $0x84] sm:$0xff]  ;;  %v3422_v10 = vor.u32 %v3421_v55, %v7035_v11  ;;  %v2773_v63 = vadd.f32 %v2696_v62, %v6457_v16  ;;  %v3884_v55 = vsel %vm6152_vm7, %v5555_v21, %v3883_v57  ;;  %v5540_v62 = vld [vmem:[%s5966_s6 + $0x9c] sm:$0xe] }
 0x1f7   : > { %5570 = vmatmul.msk.bf16.gmra.mxu0 %vm714_vm4, %v3965_v3  ;;  %v3409_v3 = vshll.u32 %v5497_v53, 16  ;;  %v7033_v53 = vld [vmem:[%s5966_s6 + $0xa4] sm:$0x1]  ;;  %v2625_v22 = vpack.c.b16 %v2604_v17, %v2603_v27 }
 0x1f8   : > { %v4113_v43 = vadd.f32 %v4033_v2, %v3715_v23  ;;  %v2983_v7 = vpop.f32.mrf.mxu2  ;;  %5344 = vmatmul.msk.bf16.gmra.mxu1 %vm714_vm4, %v2624_v33  ;;  %v3408_v33 = vrot.slane %v3406_v5, 4  ;;  %v3885_v5 = vrot.slane %v3883_v57, 4  ;;  %v3425_v35 = vshll.u32 %v7033_v53, 16 }
 0x1f9   : > { %v3062_v34 = vadd.f32 %v2983_v7, %v2772_v15  ;;  %v3411_v23 = vrot.slane %v3409_v3, 5  ;;  %v3886_v3 = vrot.slane %v6994_v19, 5  ;;  %v3890_v57 = vrot.slane %v7016_v52, 5 }
 0x1fa   : > { %v4149_v2 = vmul.f32 %v7003_v25, %v4113_v43  ;;  %v5859_v43 = vld [vmem:[%s5966_s6 + $0x94] sm:$0xf] }
 0x1fb   : > { %v2548_v15 = vrot.slane %v5859_v43, 5  ;;  %v3412_v58 = vor.u32 %v3411_v23, %v3408_v33  ;;  %v5860_v23 = vld [vmem:[%s5966_s6 + $0x98] sm:$0x1]  ;;  %v3887_v16 = vsel %vm6152_vm7, %v3885_v5, %v3886_v3  ;;  %v3893_v3 = vrot.slane %v7033_v53, 5 }
 0x1fc   : > { %v7038_v45 = vadd.f32 %v7021_v4, %v4149_v2  ;;  %v4035_v59 = vpop.f32.mrf.mxu0  ;;  %v2551_v44 = vrot.slane %v5860_v23, 5 }
 0x1fd   : > { %v3637_v7 = vpop.f32.mrf.mxu3  ;;  %5457 = vmatmul.msk.bf16.gmra.mxu2 %vm714_vm4, %v5654_v28  ;;  %v2698_v61 = vpop.f32.mrf.mxu1  ;;  %v3394_v28 = vsel %vm5978_vm3, %v3389_v1, %v6996_v49  ;;  %v2550_v33 = vrot.slane %v2548_v15, 4  ;;  %v3413_v29 = vrot.slane %v3412_v58, 4  ;;  %v2549_v21 = vsel %vm6152_vm7, %v5329_v39, %v2548_v15 }
 0x1fe   : > { %v5578_v2 = vmul.f32 -1.442695, %v7038_v45  ;;  %v3716_v46 = vadd.f32 %v3637_v7, %v3062_v34  ;;  %v3404_v34 = vsel %vm5978_vm3, %v3399_v47, %v3403_v8  ;;  %v3427_v7 = vrot.slane %v3425_v35, 5 }
 0x1ff   : > { %v7066_v47 = vunpack.c.l.b16 %v3394_v28  ;;  %v7077_v27 = vunpack.c.l.b16 %v3404_v34  ;;  %v3946_v35 = vunpack.c.l.b16 %v3887_v16  ;;  %v2774_v39 = vadd.f32 %v2698_v61, %v6470_v13 }
 0x200   : > { %5691 = vpow2.f32 %v5578_v2  ;;  %v4114_v19 = vadd.f32 %v4035_v59, %v3716_v46  ;;  %v2986_v43 = vpop.f32.mrf.mxu2  ;;  %v7890_v46 = vpack.c.b16 %v6989_v50, %v6986_v56  ;;  %v3423_v59 = vrot.slane %v3422_v10, 4 }
 0x201   : > { %v3063_v1 = vadd.f32 %v2986_v43, %v2773_v63  ;;  %v2552_v56 = vsel %vm6152_vm7, %v2550_v33, %v2551_v44  ;;  %v5556_v50 = vrot.slane %v5540_v62, 9  ;;  %v3945_v2 = vunpack.c.l.b16 %v3884_v55  ;;  %v5500_v55 = vld [vmem:[%s5966_s6 + $0xa8] sm:$0xf] }
 0x202   : > { %v4150_v49 = vmul.f32 %v7003_v25, %v4114_v19  ;;  %5522 = vmatmul.msk.bf16.gmra.mxu3 %vm714_vm4, %v7890_v46  ;;  %v3892_v63 = vrot.slane %v3890_v57, 4  ;;  %v3418_v44 = vsel %vm5978_vm3, %v3413_v29, %v7035_v11  ;;  %v3428_v53 = vsel %vm5978_vm3, %v3423_v59, %v3427_v7 }
 0x203   : > { %v2605_v19 = vunpack.c.l.b16 %v2549_v21  ;;  %v2606_v43 = vunpack.c.l.b16 %v2552_v56  ;;  %v3891_v11 = vsel %vm6152_vm7, %v5556_v50, %v3890_v57  ;;  %v7098_v16 = vunpack.c.l.b16 %v3418_v44  ;;  %v7113_v57 = vld [vmem:[%s5966_s6 + $0xac] sm:$0xf] }
 0x204   : > { %v7072_v8 = vadd.f32 %v7021_v4, %v4150_v49  ;;  %v4038_v5 = vpop.f32.mrf.mxu0  ;;  %v3894_v34 = vsel %vm6152_vm7, %v3892_v63, %v3893_v3  ;;  %v7100_v13 = vunpack.c.l.b16 %v3428_v53  ;;  %v3569_v62 = vpack.c.b16 %v7077_v27, %v7066_v47  ;;  %v5861_v27 = vld [vmem:[%s5966_s6 + $0xa0] sm:$0xf] }
 0x205   : > { %v3640_v10 = vpop.f32.mrf.mxu3  ;;  %v2701_v58 = vpop.f32.mrf.mxu1  ;;  %v3947_v49 = vunpack.c.l.b16 %v3891_v11  ;;  %v3948_v46 = vunpack.c.l.b16 %v3894_v34  ;;  %v7110_v21 = vpack.c.b16 %v2606_v43, %v2605_v19 }
 0x206   : > { %v5692_v15 = vpop.eup %5691  ;;  %v5579_v52 = vmul.f32 -1.442695, %v7072_v8  ;;  %v3717_v17 = vadd.f32 %v3640_v10, %v3063_v1  ;;  %v3430_v1 = vshrl.u32 %v5500_v55, 16  ;;  %v2775_v47 = vadd.f32 %v2701_v58, %v6483_v20 }
 0x207   : > { %v7085_v28 = vadd.f32 1.0, %v5692_v15  ;;  %5571 = vmatmul.msk.bf16.gmra.mxu0 %vm714_vm4, %v7007_v40  ;;  %v5655_v40 = vld [vmem:[%s5966_s6 + $0x90] sm:$0xff]  ;;  %v7127_v44 = vpack.c.b16 %v3948_v46, %v3947_v49 }
 0x208   : > { %5693 = vpow2.f32 %v5579_v52  ;;  %v4115_v33 = vadd.f32 %v4038_v5, %v3717_v17  ;;  %v2988_v23 = vpop.f32.mrf.mxu2  ;;  %5345 = vmatmul.msk.bf16.gmra.mxu1 %vm714_vm4, %v2625_v22  ;;  %v7108_v22 = vpack.c.b16 %v3946_v35, %v3945_v2  ;;  %v3433_v5 = vshll.u32 %v5500_v55, 16  ;;  %v5314_v17 = vld [vmem:[%s5966_s6 + $0x9c] sm:$0xe] }
 0x209   : > { %5695 = vrcp.f32 %v7085_v28  ;;  %v3064_v29 = vadd.f32 %v2988_v23, %v2774_v39  ;;  %v4354_v56 = vand.u32 2147483647, %v7085_v28  ;;  %v2555_v2 = vrot.slane %v5861_v27, 5  ;;  %v7132_v23 = vld [vmem:[%s5966_s6 + $0xb0] sm:$0x1] }
 0x20a   : > { %v4151_v61 = vmul.f32 %v7003_v25, %v4115_v33  ;;  %vm4350_vm8 = vweird.f32 %v7085_v28  ;;  %v4356_v63 = vand.u32 2147483648, %v7085_v28  ;;  %v3432_v53 = vrot.slane %v3430_v1, 4 }
 0x20b   : > { %v3439_v39 = vshll.u32 %v7113_v57, 16  ;;  %v3435_v11 = vrot.slane %v3433_v5, 5  ;;  %v5330_v34 = vrot.slane %v5314_v17, 9  ;;  %v2557_v55 = vrot.slane %v2555_v2, 4 }
 0x20c   : > { %v7106_v59 = vadd.f32 %v7021_v4, %v4151_v61  ;;  %v4040_v7 = vpop.f32.mrf.mxu0  ;;  %v3443_v1 = vshrl.u32 %v7113_v57, 16  ;;  %vm7139_vm9 = vcmp.eq.f32.partialorder %v4354_v56, 8.507059e+37  ;;  %v4357_v5 = vor.u32 1.1754944e-38, %v4356_v63 }
 0x20d   : > { %v3642_v50 = vpop.f32.mrf.mxu3  ;;  %5458 = vmatmul.msk.bf16.gmra.mxu2 %vm714_vm4, %v5655_v40  ;;  %v2703_v3 = vpop.f32.mrf.mxu1  ;;  %v5862_v40 = vld [vmem:[%s5966_s6 + $0xa4] sm:$0x1]  ;;  %v3449_v27 = vshll.u32 %v7132_v23, 16  ;;  %v2556_v56 = vsel %vm6152_vm7, %v5330_v34, %v2555_v2 }
 0x20e   : > { %v5694_v35 = vpop.eup %5693  ;;  %v5580_v15 = vmul.f32 -1.442695, %v7106_v59  ;;  %v3718_v52 = vadd.f32 %v3642_v50, %v3064_v29  ;;  %v2558_v61 = vrot.slane %v5862_v40, 5 }
 0x20f   : > { %v5696_v20 = vpop.eup %5695  ;;  %v7125_v58 = vadd.f32 1.0, %v5694_v35 }
 0x210   : > { %v4346_v19 = vmul.f32 %v5696_v20, %v7085_v28  ;;  %5697 = vpow2.f32 %v5580_v15  ;;  %v4116_v43 = vadd.f32 %v4040_v7, %v3718_v52  ;;  %v2991_v33 = vpop.f32.mrf.mxu2  ;;  %vm4351_vm10 = vweird.f32 %v5696_v20 }
 0x211   : > { %5699 = vrcp.f32 %v7125_v58  ;;  %v3065_v46 = vadd.f32 %v2991_v33, %v2775_v47  ;;  %v4371_v50 = vand.u32 2147483648, %v7125_v58  ;;  %v4369_v15 = vand.u32 2147483647, %v7125_v58  ;;  %vm7160_vm11 = vmor %vm4350_vm8, %vm4351_vm10 }
 0x212   : > { %v4347_v29 = vsub.f32 1.0, %v4346_v19  ;;  %v4152_v49 = vmul.f32 %v7003_v25, %v4116_v43  ;;  %5523 = vmatmul.msk.bf16.gmra.mxu3 %vm714_vm4, %v3569_v62  ;;  %v2559_v63 = vsel %vm6152_vm7, %v2557_v55, %v2558_v61  ;;  %v3436_v19 = vor.u32 %v3435_v11, %v3432_v53  ;;  %v5315_v55 = vld [vmem:[%s5966_s6 + $0xa8] sm:$0xe] }
 0x213   : > { %v7153_v43 = vrot.slane %v3439_v39, 5  ;;  %vm4365_vm12 = vweird.f32 %v7125_v58  ;;  %v4372_v53 = vor.u32 1.1754944e-38, %v4371_v50  ;;  %v2776_v11 = vadd.f32 %v2703_v3, %v6496_v38 }
 0x214   : > { %v4348_v35 = vmul.f32 %v5696_v20, %v4347_v29  ;;  %v7147_v52 = vadd.f32 %v7021_v4, %v4152_v49  ;;  %v4043_v62 = vpop.f32.mrf.mxu0  ;;  %v3445_v49 = vrot.slane %v3443_v1, 4  ;;  %vm7173_vm13 = vcmp.eq.f32.partialorder %v4369_v15, 8.507059e+37  ;;  %v5541_v1 = vld [vmem:[%s5966_s6 + $0xa8] sm:$0xe] }
 0x215   : > { %v3645_v47 = vpop.f32.mrf.mxu3  ;;  %v2706_v17 = vpop.f32.mrf.mxu1  ;;  %v2608_v3 = vunpack.c.l.b16 %v2559_v63 }
 0x216   : > { %v5698_v33 = vpop.eup %5697  ;;  %v4349_v40 = vadd.f32 %v5696_v20, %v4348_v35  ;;  %v5581_v29 = vmul.f32 -1.442695, %v7147_v52  ;;  %v3719_v10 = vadd.f32 %v3645_v47, %v3065_v46  ;;  %v2607_v46 = vunpack.c.l.b16 %v2556_v56 }
 0x217   : > { %v5700_v9 = vpop.eup %5699  ;;  %v7165_v39 = vadd.f32 1.0, %v5698_v33  ;;  %5572 = vmatmul.msk.bf16.gmra.mxu0 %vm714_vm4, %v7108_v22  ;;  %v5656_v22 = vld [vmem:[%s5966_s6 + $0x9c] sm:$0xff]  ;;  %v3446_v15 = vor.u32 %v3445_v49, %v7153_v43  ;;  %v3451_v56 = vrot.slane %v3449_v27, 5  ;;  %v5557_v33 = vrot.slane %v5541_v1, 9 }
 0x218   : > { %v4353_v34 = vsel %vm7160_vm11, %v5696_v20, %v4349_v40  ;;  %v4361_v28 = vmul.f32 %v5700_v9, %v7125_v58  ;;  %5701 = vpow2.f32 %v5581_v29  ;;  %v2993_v61 = vpop.f32.mrf.mxu2  ;;  %5346 = vmatmul.msk.bf16.gmra.mxu1 %vm714_vm4, %v7110_v21  ;;  %v3437_v20 = vrot.slane %v3436_v19, 4 }
 0x219   : > { %v4358_v38 = vsel %vm7139_vm9, %v4357_v5, %v4353_v34  ;;  %5703 = vrcp.f32 %v7165_v39  ;;  %v4117_v21 = vadd.f32 %v4043_v62, %v3719_v10  ;;  %v3066_v47 = vadd.f32 %v2993_v61, %v2776_v11 }
 0x21a   : > { %v4825_v50 = vmul.f32 %v4358_v38, %v7038_v45  ;;  %v4362_v35 = vsub.f32 1.0, %v4361_v28  ;;  %v3897_v40 = vrot.slane %v7113_v57, 5  ;;  %vm4366_vm14 = vweird.f32 %v5700_v9 }
 0x21b   : > { %v4384_v5 = vand.u32 2147483647, %v7165_v39  ;;  %v4153_v29 = vmul.f32 %v7003_v25, %v4117_v21  ;;  %v4386_v19 = vand.u32 2147483648, %v7165_v39  ;;  %v2777_v10 = vadd.f32 %v2706_v17, %v6508_v41  ;;  %vm4367_vm0 = vmor %vm4365_vm12, %vm4366_vm14 }
 0x21c   : > { %4857 = vst [vmem:[%s7183_s25] sm:$0xff] %v4825_v50  ;;  %v4363_v7 = vmul.f32 %v5700_v9, %v4362_v35  ;;  %v4045_v63 = vpop.f32.mrf.mxu0  ;;  %v7198_v27 = vpack.c.b16 %v2608_v3, %v2607_v46  ;;  %v3442_v57 = vsel %vm5978_vm3, %v3437_v20, %v7153_v43  ;;  %vm4380_vm15 = vweird.f32 %v7165_v39 }
 0x21d   : > { %v3647_v45 = vpop.f32.mrf.mxu3  ;;  %5459 = vmatmul.msk.bf16.gmra.mxu2 %vm714_vm4, %v5656_v22  ;;  %v2708_v62 = vpop.f32.mrf.mxu1  ;;  %v7205_v11 = vadd.f32 %v7021_v4, %v4153_v29  ;;  %v3447_v34 = vrot.slane %v3446_v15, 4  ;;  %v7214_v61 = vsel %vm6152_vm7, %v5557_v33, %v3897_v40  ;;  %v3899_v43 = vrot.slane %v3897_v40, 4 }
 0x21e   : > { %v5702_v49 = vpop.eup %5701  ;;  %v4364_v2 = vadd.f32 %v5700_v9, %v4363_v7  ;;  %v3720_v17 = vadd.f32 %v3647_v45, %v3066_v47  ;;  %vm7217_vm1 = vcmp.eq.f32.partialorder %v4384_v5, 8.507059e+37  ;;  %v3900_v3 = vrot.slane %v7132_v23, 5  ;;  %v5863_v45 = vld [vmem:[%s5966_s6 + $0xac] sm:$0xf] }
 0x21f   : > { %v5704_v28 = vpop.eup %5703  ;;  %v7210_v41 = vadd.f32 1.0, %v5702_v49  ;;  %v5582_v22 = vmul.f32 -1.442695, %v7205_v11  ;;  %v4387_v50 = vor.u32 1.1754944e-38, %v4386_v19  ;;  %v7226_v35 = vunpack.c.l.b16 %v3442_v57 }
 0x220   : > { %v4368_v46 = vsel %vm4367_vm0, %v5700_v9, %v4364_v2  ;;  %v4376_v1 = vmul.f32 %v5704_v28, %v7165_v39  ;;  %v2996_v58 = vpop.f32.mrf.mxu2  ;;  %v7899_v15 = vpack.c.b16 %v7100_v13, %v7098_v16  ;;  %v3452_v23 = vsel %vm5978_vm3, %v3447_v34, %v3451_v56  ;;  %v5503_v13 = vld [vmem:[%s5966_s6 + $0xb4] sm:$0xf] }
 0x221   : > { %v4373_v20 = vsel %vm7173_vm13, %v4372_v53, %v4368_v46  ;;  %5705 = vrcp.f32 %v7210_v41  ;;  %v4118_v53 = vadd.f32 %v4045_v63, %v3720_v17  ;;  %v3067_v47 = vadd.f32 %v2996_v58, %v2777_v10  ;;  %v5864_v46 = vld [vmem:[%s5966_s6 + $0xb0] sm:$0x1] }
 0x222   : > { %v4826_v9 = vmul.f32 %v4373_v20, %v7072_v8  ;;  %v4377_v21 = vsub.f32 1.0, %v4376_v1  ;;  %5707 = vpow2.f32 %v5582_v22  ;;  %5524 = vmatmul.msk.bf16.gmra.mxu3 %vm714_vm4, %v7899_v15  ;;  %v2778_v33 = vadd.f32 %v2708_v62, %v6521_v31 }
 0x223   : > { %v3949_v40 = vunpack.c.l.b16 %v7214_v61  ;;  %vm4381_vm2 = vweird.f32 %v5704_v28  ;;  %v4399_v7 = vand.u32 2147483647, %v7210_v41  ;;  %v3901_v16 = vsel %vm6152_vm7, %v3899_v43, %v3900_v3 }
 0x224   : > { %4858 = vst [vmem:[%s7183_s25 + $0x8] sm:$0xff] %v4826_v9  ;;  %v4378_v8 = vmul.f32 %v5704_v28, %v4377_v21  ;;  %v4048_v5 = vpop.f32.mrf.mxu0  ;;  %v4154_v56 = vmul.f32 %v7003_v25, %v4118_v53  ;;  %v7244_v19 = vunpack.c.l.b16 %v3452_v23  ;;  %v5331_v31 = vrot.slane %v5315_v55, 9  ;;  %vm7252_vm6 = vmor %vm4380_vm15, %vm4381_vm2  ;;  %v5657_v55 = vld [vmem:[%s5966_s6 + $0xa8] sm:$0xff] }
 0x225   : > { %v3650_v29 = vpop.f32.mrf.mxu3  ;;  %v2711_v63 = vpop.f32.mrf.mxu1  ;;  %v2562_v10 = vrot.slane %v5863_v45, 5  ;;  %vm4395_vm5 = vweird.f32 %v7210_v41  ;;  %v4401_v57 = vand.u32 2147483648, %v7210_v41  ;;  %v3950_v43 = vunpack.c.l.b16 %v3901_v16 }
 0x226   : > { %v4379_v62 = vadd.f32 %v5704_v28, %v4378_v8  ;;  %v3721_v49 = vadd.f32 %v3650_v29, %v3067_v47  ;;  %v7257_v17 = vadd.f32 %v7021_v4, %v4154_v56  ;;  %v2565_v1 = vrot.slane %v5864_v46, 5  ;;  %v7289_v56 = vld [vmem:[%s5966_s6 + $0xb8] sm:$0xf] }
 0x227   : > { %v5706_v2 = vpop.eup %5705  ;;  %5573 = vmatmul.msk.bf16.gmra.mxu0 %vm714_vm4, %v7127_v44  ;;  %v3454_v22 = vshrl.u32 %v5503_v13, 16  ;;  %vm7265_vm8 = vcmp.eq.f32.partialorder %v4399_v7, 8.507059e+37  ;;  %v3457_v44 = vshll.u32 %v5503_v13, 16  ;;  %v2564_v53 = vrot.slane %v2562_v10, 4 }
 0x228   : > { %v5708_v58 = vpop.eup %5707  ;;  %v4383_v3 = vsel %vm7252_vm6, %v5704_v28, %v4379_v62  ;;  %v4391_v39 = vmul.f32 %v5706_v2, %v7210_v41  ;;  %v4119_v9 = vadd.f32 %v4048_v5, %v3721_v49  ;;  %v2998_v21 = vpop.f32.mrf.mxu2  ;;  %5347 = vmatmul.msk.bf16.gmra.mxu1 %vm714_vm4, %v7198_v27  ;;  %v5583_v28 = vmul.f32 -1.442695, %v7257_v17 }
 0x229   : > { %v4388_v15 = vsel %vm7217_vm1, %v4387_v50, %v4383_v3  ;;  %v7273_v23 = vadd.f32 1.0, %v5708_v58  ;;  %v3068_v5 = vadd.f32 %v2998_v21, %v2778_v33  ;;  %v3571_v27 = vpack.c.b16 %v7244_v19, %v7226_v35 }
 0x22a   : > { %v4827_v47 = vmul.f32 %v4388_v15, %v7106_v59  ;;  %v4392_v8 = vsub.f32 1.0, %v4391_v39  ;;  %v4155_v7 = vmul.f32 %v7003_v25, %v4119_v9  ;;  %v2563_v38 = vsel %vm6152_vm7, %v5331_v31, %v2562_v10  ;;  %v7304_v39 = vld [vmem:[%s5966_s6 + $0xbc] sm:$0x1] }
 0x22b   : > { %5709 = vrcp.f32 %v7273_v23  ;;  %v3456_v50 = vrot.slane %v3454_v22, 4  ;;  %vm4396_vm9 = vweird.f32 %v5706_v2  ;;  %v4402_v33 = vor.u32 1.1754944e-38, %v4401_v57 }
 0x22c   : > { %4859 = vst [vmem:[%s7183_s25 + $0x10] sm:$0xff] %v4827_v47  ;;  %v4393_v16 = vmul.f32 %v5706_v2, %v4392_v8  ;;  %5711 = vpow2.f32 %v5583_v28  ;;  %v7286_v13 = vadd.f32 %v7021_v4, %v4155_v7  ;;  %v4050_v59 = vpop.f32.mrf.mxu0  ;;  %v2779_v45 = vadd.f32 %v2711_v63, %v6535_v30  ;;  %vm4397_vm10 = vmor %vm4395_vm5, %vm4396_vm9 }
 0x22d   : > { %v3652_v29 = vpop.f32.mrf.mxu3  ;;  %5460 = vmatmul.msk.bf16.gmra.mxu2 %vm714_vm4, %v5657_v55  ;;  %v2713_v35 = vpop.f32.mrf.mxu1  ;;  %v2566_v19 = vsel %vm6152_vm7, %v2564_v53, %v2565_v1  ;;  %v3459_v31 = vrot.slane %v3457_v44, 5  ;;  %v3969_v34 = vpack.c.b16 %v3950_v43, %v3949_v40  ;;  %v2609_v30 = vunpack.c.l.b16 %v2563_v38 }
 0x22e   : > { %v4394_v10 = vadd.f32 %v5706_v2, %v4393_v16  ;;  %v5584_v62 = vmul.f32 -1.442695, %v7286_v13  ;;  %v3722_v49 = vadd.f32 %v3652_v29, %v3068_v5  ;;  %v3463_v57 = vshll.u32 %v7289_v56, 16 }
 0x22f   : > { %v3460_v63 = vor.u32 %v3459_v31, %v3456_v50  ;;  %v3467_v46 = vshrl.u32 %v7289_v56, 16  ;;  %v2610_v3 = vunpack.c.l.b16 %v2566_v19  ;;  %v4414_v41 = vand.u32 2147483647, %v7273_v23  ;;  %v5542_v31 = vld [vmem:[%s5966_s6 + $0xb4] sm:$0xe] }
 0x230   : > { %v4398_v1 = vsel %vm4397_vm10, %v5706_v2, %v4394_v10  ;;  %5713 = vpow2.f32 %v5584_v62  ;;  %v4120_v22 = vadd.f32 %v4050_v59, %v3722_v49  ;;  %v3001_v58 = vpop.f32.mrf.mxu2  ;;  %v4416_v43 = vand.u32 2147483648, %v7273_v23 }
 0x231   : > { %v5710_v61 = vpop.eup %5709  ;;  %v4403_v40 = vsel %vm7265_vm8, %v4402_v33, %v4398_v1  ;;  %v3069_v9 = vadd.f32 %v3001_v58, %v2779_v45  ;;  %v3461_v28 = vrot.slane %v3460_v63, 4  ;;  %v3465_v53 = vrot.slane %v3463_v57, 5 }
 0x232   : > { %v5712_v21 = vpop.eup %5711  ;;  %v4828_v44 = vmul.f32 %v4403_v40, %v7147_v52  ;;  %v4406_v2 = vmul.f32 %v5710_v61, %v7273_v23  ;;  %v4156_v15 = vmul.f32 %v7003_v25, %v4120_v22  ;;  %5525 = vmatmul.msk.bf16.gmra.mxu3 %vm714_vm4, %v3571_v27  ;;  %v3469_v20 = vrot.slane %v3467_v46, 4  ;;  %v5658_v22 = vld [vmem:[%s5966_s6 + $0xb4] sm:$0xff] }
 0x233   : > { %v7314_v55 = vadd.f32 1.0, %v5712_v21  ;;  %v3473_v47 = vshll.u32 %v7304_v39, 16  ;;  %vm4410_vm11 = vweird.f32 %v7273_v23  ;;  %v2628_v5 = vpack.c.b16 %v2610_v3, %v2609_v30 }
 0x234   : > { %4860 = vst [vmem:[%s7183_s25 + $0x18] sm:$0xff] %v4828_v44  ;;  %v4407_v8 = vsub.f32 1.0, %v4406_v2  ;;  %v7320_v52 = vadd.f32 %v7021_v4, %v4156_v15  ;;  %v4053_v7 = vpop.f32.mrf.mxu0  ;;  %vm4411_vm12 = vweird.f32 %v5710_v61  ;;  %vm7322_vm13 = vcmp.eq.f32.partialorder %v4414_v41, 8.507059e+37  ;;  %v5506_v2 = vld [vmem:[%s5966_s6 + $0xc0] sm:$0xf] }
 0x235   : > { %v4417_v38 = vor.u32 1.1754944e-38, %v4416_v43  ;;  %5715 = vrcp.f32 %v7314_v55  ;;  %v3655_v50 = vpop.f32.mrf.mxu3  ;;  %v2716_v16 = vpop.f32.mrf.mxu1  ;;  %v3466_v19 = vsel %vm5978_vm3, %v3461_v28, %v3465_v53  ;;  %v2780_v62 = vadd.f32 %v2713_v35, %v6548_v48  ;;  %vm4412_vm14 = vmor %vm4410_vm11, %vm4411_vm12 }
 0x236   : > { %v5714_v59 = vpop.eup %5713  ;;  %v4408_v33 = vmul.f32 %v5710_v61, %v4407_v8  ;;  %v5585_v29 = vmul.f32 -1.442695, %v7320_v52  ;;  %v3723_v45 = vadd.f32 %v3655_v50, %v3069_v9  ;;  %v3470_v49 = vor.u32 %v3469_v20, %v3465_v53 }
 0x237   : > { %v7331_v10 = vadd.f32 1.0, %v5714_v59  ;;  %5574 = vmatmul.msk.bf16.gmra.mxu0 %vm714_vm4, %v3969_v34  ;;  %v3475_v30 = vrot.slane %v3473_v47, 5  ;;  %v4429_v57 = vand.u32 2147483647, %v7314_v55  ;;  %v3553_v34 = vunpack.c.l.b16 %v3466_v19 }
 0x238   : > { %v4409_v63 = vadd.f32 %v5710_v61, %v4408_v33  ;;  %5717 = vpow2.f32 %v5585_v29  ;;  %v4121_v46 = vadd.f32 %v4053_v7, %v3723_v45  ;;  %v3003_v1 = vpop.f32.mrf.mxu2  ;;  %5348 = vmatmul.msk.bf16.gmra.mxu1 %vm714_vm4, %v2628_v5  ;;  %v5558_v58 = vrot.slane %v5542_v31, 9 }
 0x239   : > { %5719 = vrcp.f32 %v7331_v10  ;;  %v3904_v48 = vrot.slane %v7289_v56, 5  ;;  %vm4425_vm15 = vweird.f32 %v7314_v55  ;;  %v3070_v40 = vadd.f32 %v3003_v1, %v2780_v62 }
 0x23a   : > { %v4413_v35 = vsel %vm4412_vm14, %v5710_v61, %v4409_v63  ;;  %v4157_v3 = vmul.f32 %v7003_v25, %v4121_v46  ;;  %v3471_v41 = vrot.slane %v3470_v49, 4  ;;  %v4431_v23 = vand.u32 2147483648, %v7314_v55 }
 0x23b   : > { %v5716_v43 = vpop.eup %5715  ;;  %v4418_v9 = vsel %vm7322_vm13, %v4417_v38, %v4413_v35  ;;  %v4444_v21 = vand.u32 2147483647, %v7331_v10  ;;  %v2781_v44 = vadd.f32 %v2716_v16, %v6564_v14  ;;  %vm7352_vm0 = vcmp.eq.f32.partialorder %v4429_v57, 8.507059e+37 }
 0x23c   : > { %v4829_v56 = vmul.f32 %v4418_v9, %v7205_v11  ;;  %v4421_v61 = vmul.f32 %v5716_v43, %v7314_v55  ;;  %v4446_v15 = vand.u32 2147483648, %v7331_v10  ;;  %v7358_v28 = vadd.f32 %v7021_v4, %v4157_v3  ;;  %v4055_v53 = vpop.f32.mrf.mxu0 }
 0x23d   : > { %v3657_v20 = vpop.f32.mrf.mxu3  ;;  %5461 = vmatmul.msk.bf16.gmra.mxu2 %vm714_vm4, %v5658_v22  ;;  %v3476_v14 = vsel %vm5978_vm3, %v3471_v41, %v3475_v30  ;;  %v3905_v11 = vsel %vm6152_vm7, %v5558_v58, %v3904_v48  ;;  %v3906_v47 = vrot.slane %v3904_v48, 4  ;;  %v3907_v8 = vrot.slane %v7304_v39, 5  ;;  %v2718_v7 = vpop.f32.mrf.mxu1  ;;  %v5316_v22 = vld [vmem:[%s5966_s6 + $0xb4] sm:$0xe] }
 0x23e   : > { %v5718_v5 = vpop.eup %5717  ;;  %4861 = vst [vmem:[%s7183_s25 + $0x20] sm:$0xff] %v4829_v56  ;;  %v4422_v27 = vsub.f32 1.0, %v4421_v61  ;;  %v5586_v38 = vmul.f32 -1.442695, %v7358_v28  ;;  %v3724_v50 = vadd.f32 %v3657_v20, %v3070_v40  ;;  %v3554_v16 = vunpack.c.l.b16 %v3476_v14 }
 0x23f   : > { %v5720_v59 = vpop.eup %5719  ;;  %vm4426_vm1 = vweird.f32 %v5716_v43  ;;  %v4432_v33 = vor.u32 1.1754944e-38, %v4431_v23  ;;  %vm4440_vm2 = vweird.f32 %v7331_v10  ;;  %v7369_v29 = vadd.f32 1.0, %v5718_v5  ;;  %v5865_v23 = vld [vmem:[%s5966_s6 + $0xb8] sm:$0xf] }
 0x240   : > { %v4423_v45 = vmul.f32 %v5716_v43, %v4422_v27  ;;  %v4436_v19 = vmul.f32 %v5720_v59, %v7331_v10  ;;  %5721 = vpow2.f32 %v5586_v38  ;;  %v3908_v39 = vsel %vm6152_vm7, %v3906_v47, %v3907_v8  ;;  %v3006_v31 = vpop.f32.mrf.mxu2  ;;  %vm4427_vm6 = vmor %vm4425_vm15, %vm4426_vm1 }
 0x241   : > { %vm7374_vm5 = vcmp.eq.f32.partialorder %v4444_v21, 8.507059e+37  ;;  %v4447_v49 = vor.u32 1.1754944e-38, %v4446_v15  ;;  %5723 = vrcp.f32 %v7369_v29  ;;  %v3951_v30 = vunpack.c.l.b16 %v3905_v11 }
 0x242   : > { %v4424_v63 = vadd.f32 %v5716_v43, %v4423_v45  ;;  %v4437_v57 = vsub.f32 1.0, %v4436_v19  ;;  %v4122_v46 = vadd.f32 %v4055_v53, %v3724_v50  ;;  %v3572_v1 = vpack.c.b16 %v3554_v16, %v3553_v34  ;;  %v5659_v45 = vld [vmem:[%s5966_s6 + $0xc0] sm:$0xff] }
 0x243   : > { %vm4441_vm8 = vweird.f32 %v5720_v59  ;;  %v3952_v58 = vunpack.c.l.b16 %v3908_v39  ;;  %v3071_v48 = vadd.f32 %v3006_v31, %v2781_v44  ;;  %v2782_v35 = vadd.f32 %v2718_v7, %v6589_v51 }
 0x244   : > { %v4428_v3 = vsel %vm4427_vm6, %v5716_v43, %v4424_v63  ;;  %v4438_v40 = vmul.f32 %v5720_v59, %v4437_v57  ;;  %v4158_v41 = vmul.f32 %v7003_v25, %v4122_v46  ;;  %v4058_v9 = vpop.f32.mrf.mxu0  ;;  %5526 = vmatmul.msk.bf16.gmra.mxu3 %vm714_vm4, %v3572_v1  ;;  %v2569_v34 = vrot.slane %v5865_v23, 5  ;;  %vm4442_vm9 = vmor %vm4440_vm2, %vm4441_vm8 }
 0x245   : > { %v4433_v21 = vsel %vm7352_vm0, %v4432_v33, %v4428_v3  ;;  %v4459_v55 = vand.u32 2147483647, %v7369_v29  ;;  %v3970_v56 = vpack.c.b16 %v3952_v58, %v3951_v30  ;;  %v3660_v44 = vpop.f32.mrf.mxu3  ;;  %v7390_v61 = vpop.f32.mrf.mxu1  ;;  %v5332_v51 = vrot.slane %v5316_v22, 9  ;;  %v7421_v30 = vld [vmem:[%s5966_s6 + $0xc4] sm:$0xf] }
 0x246   : > { %v5722_v43 = vpop.eup %5721  ;;  %v4830_v15 = vmul.f32 %v4433_v21, %v7257_v17  ;;  %v4439_v53 = vadd.f32 %v5720_v59, %v4438_v40  ;;  %v4461_v20 = vand.u32 2147483648, %v7369_v29  ;;  %v7395_v14 = vadd.f32 %v7021_v4, %v4158_v41  ;;  %v5866_v17 = vld [vmem:[%s5966_s6 + $0xbc] sm:$0x1]  ;;  %v7429_v3 = vld [vmem:[%s5966_s6 + $0xc8] sm:$0x1] }
 0x247   : > { %v5724_v11 = vpop.eup %5723  ;;  %v7401_v47 = vadd.f32 1.0, %v5722_v43  ;;  %5575 = vmatmul.msk.bf16.gmra.mxu0 %vm714_vm4, %v3970_v56  ;;  %v3725_v8 = vadd.f32 %v3660_v44, %v3071_v48  ;;  %v2571_v7 = vrot.slane %v2569_v34, 4  ;;  %v2572_v5 = vrot.slane %v5866_v17, 5 }
 0x248   : > { %4862 = vst [vmem:[%s7183_s25 + $0x28] sm:$0xff] %v4830_v15  ;;  %v4443_v27 = vsel %vm4442_vm9, %v5720_v59, %v4439_v53  ;;  %v4451_v38 = vmul.f32 %v5724_v11, %v7369_v29  ;;  %vm4455_vm10 = vweird.f32 %v7369_v29  ;;  %v5587_v50 = vmul.f32 -1.442695, %v7395_v14  ;;  %v3008_v10 = vpop.f32.mrf.mxu2 }
 0x249   : > { %v4448_v16 = vsel %vm7374_vm5, %v4447_v49, %v4443_v27  ;;  %5725 = vrcp.f32 %v7401_v47  ;;  %v2570_v33 = vsel %vm6152_vm7, %v5332_v51, %v2569_v34  ;;  %v3478_v19 = vshrl.u32 %v5506_v2, 16 }
 0x24a   : > { %v4831_v59 = vmul.f32 %v4448_v16, %v7286_v13  ;;  %v4452_v39 = vsub.f32 1.0, %v4451_v38  ;;  %vm7416_vm11 = vcmp.eq.f32.partialorder %v4459_v55, 8.507059e+37  ;;  %5727 = vpow2.f32 %v5587_v50 }
 0x24b   : > { %v4462_v62 = vor.u32 1.1754944e-38, %v4461_v20  ;;  %v4123_v49 = vadd.f32 %v4058_v9, %v3725_v8  ;;  %v3072_v63 = vadd.f32 %v3008_v10, %v2782_v35  ;;  %v2573_v57 = vsel %vm6152_vm7, %v2571_v7, %v2572_v5 }
 0x24c   : > { %4863 = vst [vmem:[%s7183_s25 + $0x30] sm:$0xff] %v4831_v59  ;;  %v4453_v46 = vmul.f32 %v5724_v11, %v4452_v39  ;;  %vm4456_vm12 = vweird.f32 %v5724_v11  ;;  %v4060_v1 = vpop.f32.mrf.mxu0  ;;  %v2611_v13 = vunpack.c.l.b16 %v2570_v33  ;;  %v2612_v22 = vunpack.c.l.b16 %v2573_v57  ;;  %v5543_v59 = vld [vmem:[%s5966_s6 + $0xc0] sm:$0xe] }
 0x24d   : > { %v4159_v58 = vmul.f32 %v7003_v25, %v4123_v49  ;;  %v3662_v48 = vpop.f32.mrf.mxu3  ;;  %5462 = vmatmul.msk.bf16.gmra.mxu2 %vm714_vm4, %v5659_v45  ;;  %v3480_v40 = vrot.slane %v3478_v19, 4  ;;  %v3481_v41 = vshll.u32 %v5506_v2, 16  ;;  %v3487_v35 = vshll.u32 %v7421_v30, 16  ;;  %v7432_v9 = vpop.f32.mrf.mxu1  ;;  %vm4457_vm13 = vmor %vm4455_vm10, %vm4456_vm12  ;;  %v7912_v45 = vld [vmem:[#allocation2_spill] sm:$0xff] }
 0x24e   : > { %v4454_v23 = vadd.f32 %v5724_v11, %v4453_v46  ;;  %v3726_v34 = vadd.f32 %v3662_v48, %v3072_v63  ;;  %v2629_v21 = vpack.c.b16 %v2612_v22, %v2611_v13  ;;  %v3491_v55 = vshrl.u32 %v7421_v30, 16 }
 0x24f   : > { %v5726_v56 = vpop.eup %5725  ;;  %v4474_v44 = vand.u32 2147483647, %v7401_v47  ;;  %v7440_v51 = vadd.f32 %v7021_v4, %v4159_v58  ;;  %v3483_v43 = vrot.slane %v3481_v41, 5  ;;  %v3489_v15 = vrot.slane %v3487_v35, 5 }
 0x250   : > { %v5728_v53 = vpop.eup %5727  ;;  %v4458_v20 = vsel %vm4457_vm13, %v5724_v11, %v4454_v23  ;;  %v4466_v2 = vmul.f32 %v5726_v56, %v7401_v47  ;;  %v4124_v8 = vadd.f32 %v4060_v1, %v3726_v34  ;;  %5349 = vmatmul.msk.bf16.gmra.mxu1 %vm714_vm4, %v2629_v21  ;;  %v3497_v7 = vshll.u32 %v7429_v3, 16  ;;  %v3011_v29 = vpop.f32.mrf.mxu2 }
 0x251   : > { %v4463_v17 = vsel %vm7416_vm11, %v4462_v62, %v4458_v20  ;;  %v7447_v5 = vadd.f32 1.0, %v5728_v53  ;;  %v5588_v27 = vmul.f32 -1.442695, %v7440_v51  ;;  %v3484_v38 = vor.u32 %v3483_v43, %v3480_v40  ;;  %v7915_v20 = vld [vmem:[#allocation3_spill] sm:$0xff] }
 0x252   : > { %v4832_v11 = vmul.f32 %v4463_v17, %v7320_v52  ;;  %v4467_v50 = vsub.f32 1.0, %v4466_v2  ;;  %v4160_v10 = vmul.f32 %v7003_v25, %v4124_v8  ;;  %v3493_v16 = vrot.slane %v3491_v55, 4  ;;  %v5317_v25 = vld [vmem:[%s5966_s6 + $0xc0] sm:$0xe] }
 0x253   : > { %vm4471_vm14 = vweird.f32 %v5726_v56  ;;  %v4476_v33 = vand.u32 2147483648, %v7401_v47  ;;  %5729 = vrcp.f32 %v7447_v5  ;;  %v2783_v19 = vadd.f32 %v7390_v61, %v7912_v45 }
 0x254   : > { %4864 = vst [vmem:[%s7183_s25 + $0x38] sm:$0xff] %v4832_v11  ;;  %v4468_v39 = vmul.f32 %v5726_v56, %v4467_v50  ;;  %5731 = vpow2.f32 %v5588_v27  ;;  %v7459_v31 = vadd.f32 %v7021_v4, %v4160_v10  ;;  %v4063_v52 = vpop.f32.mrf.mxu0  ;;  %v3485_v62 = vrot.slane %v3484_v38, 4 }
 0x255   : > { %vm4470_vm15 = vweird.f32 %v7401_v47  ;;  %vm7462_vm0 = vcmp.eq.f32.partialorder %v4474_v44, 8.507059e+37  ;;  %v3494_v49 = vor.u32 %v3493_v16, %v3489_v15  ;;  %v3499_v63 = vrot.slane %v3497_v7, 5  ;;  %v3665_v57 = vpop.f32.mrf.mxu3  ;;  %v7466_v46 = vpop.f32.mrf.mxu1 }
 0x256   : > { %v4469_v61 = vadd.f32 %v5726_v56, %v4468_v39  ;;  %v5589_v1 = vmul.f32 -1.442695, %v7459_v31  ;;  %v3490_v4 = vsel %vm5978_vm3, %v3485_v62, %v3489_v15  ;;  %v5559_v13 = vrot.slane %v5543_v59, 9  ;;  %vm4472_vm1 = vmor %vm4470_vm15, %vm4471_vm14 }
 0x257   : > { %v4477_v47 = vor.u32 1.1754944e-38, %v4476_v33  ;;  %v3495_v22 = vrot.slane %v3494_v49, 4  ;;  %v3911_v58 = vrot.slane %v7421_v30, 5  ;;  %v3914_v48 = vrot.slane %v7429_v3, 5  ;;  %v5660_v30 = vld [vmem:[%s5966_s6 + $0xcc] sm:$0xff] }
 0x258   : > { %v4473_v40 = vsel %vm4472_vm1, %v5726_v56, %v4469_v61  ;;  %5733 = vpow2.f32 %v5589_v1  ;;  %v3555_v41 = vunpack.c.l.b16 %v3490_v4  ;;  %v3073_v35 = vadd.f32 %v3011_v29, %v2783_v19  ;;  %v3013_v23 = vpop.f32.mrf.mxu2  ;;  %v7507_v1 = vld [vmem:[%s7873_s2] ss:$0 sm:$0xff] }
 0x259   : > { %v5730_v34 = vpop.eup %5729  ;;  %v4478_v21 = vsel %vm7462_vm0, %v4477_v47, %v4473_v40  ;;  %v3500_v55 = vsel %vm5978_vm3, %v3495_v22, %v3499_v63  ;;  %v3912_v44 = vsel %vm6152_vm7, %v5559_v13, %v3911_v58  ;;  %v3913_v43 = vrot.slane %v3911_v58, 4  ;;  %v7518_v58 = vld [vmem:[%s7874_s3] ss:$0 sm:$0xff] }
 0x25a   : > { %v5732_v15 = vpop.eup %5731  ;;  %v4833_v3 = vmul.f32 %v4478_v21, %v7358_v28  ;;  %v4481_v56 = vmul.f32 %v5730_v34, %v7447_v5  ;;  %v3556_v53 = vunpack.c.l.b16 %v3500_v55  ;;  %v2784_v2 = vadd.f32 %v7432_v9, %v7915_v20 }
 0x25b   : > { %v7485_v8 = vadd.f32 1.0, %v5732_v15  ;;  %v3915_v7 = vsel %vm6152_vm7, %v3913_v43, %v3914_v48  ;;  %v3953_v29 = vunpack.c.l.b16 %v3912_v44  ;;  %v3727_v17 = vadd.f32 %v3665_v57, %v3073_v35  ;;  %v5870_v43 = vld [vmem:[%s5966_s6 + $0xc8] sm:$0x1] }
 0x25c   : > { %4865 = vst [vmem:[%s7183_s25 + $0x40] sm:$0xff] %v4833_v3  ;;  %v4482_v27 = vsub.f32 1.0, %v4481_v56  ;;  %v3573_v38 = vpack.c.b16 %v3556_v53, %v3555_v41  ;;  %v3954_v11 = vunpack.c.l.b16 %v3915_v7  ;;  %v4065_v50 = vpop.f32.mrf.mxu0  ;;  %v3074_v28 = vadd.f32 %v3013_v23, %v2784_v2  ;;  %v5869_v41 = vld [vmem:[%s5966_s6 + $0xc4] sm:$0xf]  ;;  %v5509_v23 = vld [vmem:[%s5966_s6 + $0xcc] sm:$0xf] }
 0x25d   : > { %vm4486_vm2 = vweird.f32 %v5730_v34  ;;  %v4489_v10 = vand.u32 2147483647, %v7447_v5  ;;  %v4491_v16 = vand.u32 2147483648, %v7447_v5  ;;  %5735 = vrcp.f32 %v7485_v8  ;;  %v3667_v9 = vpop.f32.mrf.mxu3  ;;  %5463 = vmatmul.msk.bf16.gmra.mxu2 %vm714_vm4, %v5660_v30  ;;  %v7494_v33 = vpop.f32.mrf.mxu1  ;;  %v5510_v7 = vld [vmem:[%s5966_s6 + $0xd0] sm:$0xf] }
 0x25e   : > { %v5734_v45 = vpop.eup %5733  ;;  %v4483_v19 = vmul.f32 %v5730_v34, %v4482_v27  ;;  %5527 = vmatmul.msk.bf16.gmra.mxu3 %vm714_vm4, %v3573_v38  ;;  %v3971_v59 = vpack.c.b16 %v3954_v11, %v3953_v29  ;;  %v4125_v39 = vadd.f32 %v4063_v52, %v3727_v17  ;;  %v3728_v62 = vadd.f32 %v3667_v9, %v3074_v28 }
 0x25f   : > { %vm4485_vm5 = vweird.f32 %v7447_v5  ;;  %v4506_v49 = vand.u32 2147483648, %v7485_v8  ;;  %v7500_v63 = vadd.f32 1.0, %v5734_v45  ;;  %v4504_v61 = vand.u32 2147483647, %v7485_v8 }
 0x260   : > { %v4484_v57 = vadd.f32 %v5730_v34, %v4483_v19  ;;  %5576 = vmatmul.msk.bf16.gmra.mxu0 %vm714_vm4, %v3971_v59  ;;  %v4161_v52 = vmul.f32 %v7507_v1, %v4125_v39  ;;  %v4126_v4 = vadd.f32 %v4065_v50, %v3728_v62  ;;  %v7510_v5 = vpop.f32.mrf.mxu2  ;;  %vm4487_vm6 = vmor %vm4485_vm5, %vm4486_vm2  ;;  %vm4490_vm8 = vcmp.eq.f32.partialorder %v4489_v10, 8.507059e+37  ;;  %v5511_v19 = vld [vmem:[%s5966_s6 + $0xd4] sm:$0x1] }
 0x261   : > { %v4492_v13 = vor.u32 1.1754944e-38, %v4491_v16  ;;  %5737 = vrcp.f32 %v7500_v63  ;;  %v5333_v47 = vrot.slane %v5317_v25, 9  ;;  %vm4500_vm9 = vweird.f32 %v7485_v8 }
 0x262   : > { %v4488_v22 = vsel %vm4487_vm6, %v5730_v34, %v4484_v57  ;;  %v7521_v48 = vadd.f32 %v7518_v58, %v4161_v52  ;;  %v4162_v40 = vmul.f32 %v7507_v1, %v4126_v4  ;;  %v2576_v35 = vrot.slane %v5869_v41, 5  ;;  %v5544_v57 = vld [vmem:[%s5966_s6 + $0xcc] sm:$0xe] }
 0x263   : > { %v5736_v21 = vpop.eup %5735  ;;  %v4493_v55 = vsel %vm4490_vm8, %v4492_v13, %v4488_v22  ;;  %v4507_v44 = vor.u32 1.1754944e-38, %v4506_v49  ;;  %v4519_v34 = vand.u32 2147483647, %v7500_v63  ;;  %v2579_v30 = vrot.slane %v5870_v43, 5 }
 0x264   : > { %v4834_v15 = vmul.f32 %v4493_v55, %v7395_v14  ;;  %v4496_v3 = vmul.f32 %v5736_v21, %v7485_v8  ;;  %vm7530_vm10 = vcmp.eq.f32.partialorder %v4504_v61, 8.507059e+37  ;;  %v4521_v53 = vand.u32 2147483648, %v7500_v63  ;;  %v7536_v2 = vpop.f32.mrf.mxu0 }
 0x265   : > { %v5590_v20 = vmul.f32 -1.442695, %v7521_v48  ;;  %v7540_v29 = vadd.f32 %v7518_v58, %v4162_v40  ;;  %v2577_v14 = vsel %vm6152_vm7, %v5333_v47, %v2576_v35  ;;  %v2578_v17 = vrot.slane %v2576_v35, 4  ;;  %v7544_v38 = vpop.f32.mrf.mxu3  ;;  %v7546_v11 = vpop.f32.mrf.mxu1 }
 0x266   : > { %v3502_v27 = vshrl.u32 %v5509_v23, 16  ;;  %4866 = vst [vmem:[%s7183_s25 + $0x48] sm:$0xff] %v4834_v15  ;;  %v4497_v50 = vsub.f32 1.0, %v4496_v3  ;;  %vm4515_vm11 = vweird.f32 %v7500_v63  ;;  %v2613_v28 = vunpack.c.l.b16 %v2577_v14 }
 0x267   : > { %5739 = vpow2.f32 %v5590_v20  ;;  %v3505_v10 = vshll.u32 %v5509_v23, 16  ;;  %v5738_v16 = vpop.eup %5737  ;;  %v5591_v9 = vmul.f32 -1.442695, %v7540_v29  ;;  %v2580_v45 = vsel %vm6152_vm7, %v2578_v17, %v2579_v30 }
 0x268   : > { %v3504_v59 = vrot.slane %v3502_v27, 4  ;;  %v3511_v39 = vshll.u32 %v5510_v7, 16  ;;  %v4498_v62 = vmul.f32 %v5736_v21, %v4497_v50  ;;  %vm4501_vm12 = vweird.f32 %v5736_v21  ;;  %v7556_v61 = vpop.f32.mrf.mxu2 }
 0x269   : > { %v4511_v25 = vmul.f32 %v5738_v16, %v7500_v63  ;;  %v2614_v49 = vunpack.c.l.b16 %v2580_v45  ;;  %5741 = vpow2.f32 %v5591_v9  ;;  %v3507_v52 = vrot.slane %v3505_v10, 5  ;;  %vm4502_vm13 = vmor %vm4500_vm9, %vm4501_vm12 }
 0x26a   : > { %v3513_v4 = vrot.slane %v3511_v39, 5  ;;  %v3515_v13 = vshrl.u32 %v5510_v7, 16  ;;  %v4499_v47 = vadd.f32 %v5736_v21, %v4498_v62  ;;  %v3521_v41 = vshll.u32 %v5511_v19, 16 }
 0x26b   : > { %v4512_v22 = vsub.f32 1.0, %v4511_v25  ;;  %v2630_v40 = vpack.c.b16 %v2614_v49, %v2613_v28  ;;  %v3508_v35 = vor.u32 %v3507_v52, %v3504_v59  ;;  %v5560_v55 = vrot.slane %v5544_v57, 9 }
 0x26c   : > { %v3517_v23 = vrot.slane %v3515_v13, 4  ;;  %v3918_v43 = vrot.slane %v5510_v7, 5  ;;  %v4503_v15 = vsel %vm4502_vm13, %v5736_v21, %v4499_v47  ;;  %vm4516_vm14 = vweird.f32 %v5738_v16  ;;  %v7565_v14 = vpop.f32.mrf.mxu0 }
 0x26d   : > { %v5740_v30 = vpop.eup %5739  ;;  %v4513_v3 = vmul.f32 %v5738_v16, %v4512_v22  ;;  %vm7560_vm15 = vcmp.eq.f32.partialorder %v4519_v34, 8.507059e+37  ;;  %5350 = vmatmul.msk.bf16.gmra.mxu1 %vm714_vm4, %v2630_v40  ;;  %v4508_v8 = vsel %vm7530_vm10, %v4507_v44, %v4503_v15  ;;  %v3509_v27 = vrot.slane %v3508_v35, 4  ;;  %v3672_v50 = vpop.f32.mrf.mxu3  ;;  %vm4517_vm0 = vmor %vm4515_vm11, %vm4516_vm14 }
 0x26e   : > { %v7569_v17 = vadd.f32 1.0, %v5740_v30  ;;  %v3518_v7 = vor.u32 %v3517_v23, %v3513_v4  ;;  %v2733_v21 = vpop.f32.mrf.mxu1  ;;  %v4835_v28 = vmul.f32 %v4508_v8, %v7440_v51  ;;  %v4522_v10 = vor.u32 1.1754944e-38, %v4521_v53 }
 0x26f   : > { %v4514_v34 = vadd.f32 %v5738_v16, %v4513_v3  ;;  %v3523_v9 = vrot.slane %v3521_v41, 5  ;;  %v5742_v45 = vpop.eup %5741  ;;  %v3919_v44 = vsel %vm6152_vm7, %v5560_v55, %v3918_v43  ;;  %v3920_v56 = vrot.slane %v3918_v43, 4 }
 0x270   : > { %5743 = vrcp.f32 %v7569_v17  ;;  %v3921_v59 = vrot.slane %v5511_v19, 5  ;;  %4867 = vst [vmem:[%s7183_s25 + $0x50] sm:$0xff] %v4835_v28  ;;  %v7579_v62 = vadd.f32 1.0, %v5742_v45  ;;  %v3514_v51 = vsel %vm5978_vm3, %v3509_v27, %v3513_v4  ;;  %v3021_v25 = vpop.f32.mrf.mxu2 }
 0x271   : > { %v4518_v39 = vsel %vm4517_vm0, %v5738_v16, %v4514_v34  ;;  %v3519_v53 = vrot.slane %v3518_v7, 4  ;;  %v2785_v57 = vadd.f32 %v7466_v46, %v6633_v6  ;;  %v3557_v19 = vunpack.c.l.b16 %v3514_v51 }
 0x272   : > { %v4523_v63 = vsel %vm7560_vm15, %v4522_v10, %v4518_v39  ;;  %5745 = vrcp.f32 %v7579_v62  ;;  %v3922_v52 = vsel %vm6152_vm7, %v3920_v56, %v3921_v59  ;;  %v3955_v4 = vunpack.c.l.b16 %v3919_v44 }
 0x273   : > { %v4836_v49 = vmul.f32 %v4523_v63, %v7459_v31  ;;  %v3524_v16 = vsel %vm5978_vm3, %v3519_v53, %v3523_v9  ;;  %v4534_v13 = vand.u32 2147483647, %v7569_v17  ;;  %v3956_v22 = vunpack.c.l.b16 %v3922_v52 }
 0x274   : > { %v3558_v47 = vunpack.c.l.b16 %v3524_v16  ;;  %v3075_v31 = vadd.f32 %v7510_v5, %v2785_v57  ;;  %v4073_v40 = vpop.f32.mrf.mxu0  ;;  %v2786_v6 = vadd.f32 %v7494_v33, %v6652_v37  ;;  %v2787_v36 = vadd.f32 %v7546_v11, %v6672_v42 }
 0x275   : > { %4868 = vst [vmem:[%s7183_s25 + $0x58] sm:$0xff] %v4836_v49  ;;  %v3675_v46 = vpop.f32.mrf.mxu3  ;;  %v3972_v55 = vpack.c.b16 %v3956_v22, %v3955_v4  ;;  %v4536_v43 = vand.u32 2147483648, %v7569_v17  ;;  %vm4530_vm3 = vweird.f32 %v7569_v17  ;;  %vm7605_vm7 = vcmp.eq.f32.partialorder %v4534_v13, 8.507059e+37 }
 0x276   : > { %v5744_v41 = vpop.eup %5743  ;;  %v2736_v35 = vpop.f32.mrf.mxu1  ;;  %v3574_v23 = vpack.c.b16 %v3558_v47, %v3557_v19  ;;  %v3729_v30 = vadd.f32 %v7544_v38, %v3075_v31  ;;  %v3076_v5 = vadd.f32 %v7556_v61, %v2786_v6  ;;  %v3077_v15 = vadd.f32 %v3021_v25, %v2787_v36 }
 0x277   : > { %v4526_v18 = vmul.f32 %v5744_v41, %v7569_v17  ;;  %5577 = vmatmul.msk.bf16.gmra.mxu0 %vm714_vm4, %v3972_v55  ;;  %v2788_v42 = vadd.f32 %v2733_v21, %v6691_v24  ;;  %v4551_v11 = vand.u32 2147483648, %v7579_v62  ;;  %vm4531_vm1 = vweird.f32 %v5744_v41 }
 0x278   : > { %v5746_v3 = vpop.eup %5745  ;;  %5528 = vmatmul.msk.bf16.gmra.mxu3 %vm714_vm4, %v3574_v23  ;;  %v3023_v33 = vpop.f32.mrf.mxu2  ;;  %v4127_v61 = vadd.f32 %v7536_v2, %v3729_v30  ;;  %v3730_v8 = vadd.f32 %v3672_v50, %v3076_v5  ;;  %v3731_v7 = vadd.f32 %v3675_v46, %v3077_v15  ;;  %v4537_v34 = vor.u32 1.1754944e-38, %v4536_v43  ;;  %vm4532_vm2 = vmor %vm4530_vm3, %vm4531_vm1 }
 0x279   : > { %v4527_v20 = vsub.f32 1.0, %v4526_v18  ;;  %v4541_v38 = vmul.f32 %v5746_v3, %v7579_v62  ;;  %v3078_v28 = vadd.f32 %v3023_v33, %v2788_v42  ;;  %vm4545_vm4 = vweird.f32 %v7579_v62 }
 0x27a   : > { %v4163_v9 = vmul.f32 %v7507_v1, %v4127_v61  ;;  %v4128_v45 = vadd.f32 %v7565_v14, %v3730_v8  ;;  %v4549_v24 = vand.u32 2147483647, %v7579_v62  ;;  %v4129_v21 = vadd.f32 %v4073_v40, %v3731_v7 }
 0x27b   : > { %v4528_v27 = vmul.f32 %v5744_v41, %v4527_v20  ;;  %v4542_v10 = vsub.f32 1.0, %v4541_v38  ;;  %vm4546_vm5 = vweird.f32 %v5746_v3  ;;  %v4552_v53 = vor.u32 1.1754944e-38, %v4551_v11 }
 0x27c   : > { %v4075_v56 = vpop.f32.mrf.mxu0  ;;  %v7622_v50 = vadd.f32 %v7518_v58, %v4163_v9  ;;  %v4164_v59 = vmul.f32 %v7507_v1, %v4128_v45  ;;  %v4165_v25 = vmul.f32 %v7507_v1, %v4129_v21  ;;  %vm4547_vm6 = vmor %vm4545_vm4, %vm4546_vm5  ;;  %v2789_v13 = vadd.f32 %v2736_v35, %v6711_v12 }
 0x27d   : > { %v4529_v44 = vadd.f32 %v5744_v41, %v4528_v27  ;;  %v4543_v2 = vmul.f32 %v5746_v3, %v4542_v10  ;;  %v3677_v39 = vpop.f32.mrf.mxu3  ;;  %vm4550_vm8 = vcmp.eq.f32.partialorder %v4549_v24, 8.507059e+37 }
 0x27e   : > { %v2738_v51 = vpop.f32.mrf.mxu1  ;;  %v3732_v63 = vadd.f32 %v3677_v39, %v3078_v28  ;;  %v5592_v57 = vmul.f32 -1.442695, %v7622_v50  ;;  %v7630_v19 = vadd.f32 %v7518_v58, %v4164_v59  ;;  %v7636_v52 = vadd.f32 %v7518_v58, %v4165_v25 }
 0x27f   : > { %v4533_v14 = vsel %vm4532_vm2, %v5744_v41, %v4529_v44  ;;  %v4544_v17 = vadd.f32 %v5746_v3, %v4543_v2 }
 0x280   : > { %v4538_v49 = vsel %vm7605_vm7, %v4537_v34, %v4533_v14  ;;  %v4130_v4 = vadd.f32 %v4075_v56, %v3732_v63  ;;  %v3026_v47 = vpop.f32.mrf.mxu2  ;;  %5747 = vpow2.f32 %v5592_v57  ;;  %v5593_v31 = vmul.f32 -1.442695, %v7630_v19 }
 0x281   : > { %v4837_v16 = vmul.f32 %v4538_v49, %v7521_v48  ;;  %v4548_v22 = vsel %vm4547_vm6, %v5746_v3, %v4544_v17  ;;  %v5594_v48 = vmul.f32 -1.442695, %v7636_v52  ;;  %v3079_v41 = vadd.f32 %v3026_v47, %v2789_v13 }
 0x282   : > { %v4553_v40 = vsel %vm4550_vm8, %v4552_v53, %v4548_v22  ;;  %v4166_v62 = vmul.f32 %v7507_v1, %v4130_v4  ;;  %5749 = vpow2.f32 %v5593_v31  ;;  %v2790_v3 = vadd.f32 %v2738_v51, %v6730_v26 }
 0x283   : > { %4869 = vst [vmem:[%s7183_s25 + $0x60] sm:$0xff] %v4837_v16  ;;  %v4838_v6 = vmul.f32 %v4553_v40, %v7540_v29  ;;  %5751 = vpow2.f32 %v5594_v48 }
 0x284   : > { %v7645_v12 = vadd.f32 %v7518_v58, %v4166_v62  ;;  %v4078_v36 = vpop.f32.mrf.mxu0 }
 0x285   : > { %4870 = vst [vmem:[%s7183_s25 + $0x68] sm:$0xff] %v4838_v6  ;;  %v3680_v46 = vpop.f32.mrf.mxu3 }
 0x286   : > { %v2741_v35 = vpop.f32.mrf.mxu1  ;;  %v5595_v18 = vmul.f32 -1.442695, %v7645_v12  ;;  %v3733_v23 = vadd.f32 %v3680_v46, %v3079_v41  ;;  %v5748_v55 = vpop.eup %5747 }
 0x287   : > { %v7649_v43 = vadd.f32 1.0, %v5748_v55  ;;  %v2791_v34 = vadd.f32 %v2741_v35, %v6750_v0 }
 0x288   : > { %5753 = vpow2.f32 %v5595_v18  ;;  %v4131_v30 = vadd.f32 %v4078_v36, %v3733_v23  ;;  %v3028_v5 = vpop.f32.mrf.mxu2  ;;  %v5750_v15 = vpop.eup %5749 }
 0x289   : > { %v5752_v29 = vpop.eup %5751  ;;  %5755 = vrcp.f32 %v7649_v43  ;;  %v7653_v20 = vadd.f32 1.0, %v5750_v15  ;;  %v3080_v38 = vadd.f32 %v3028_v5, %v2790_v3  ;;  %v4564_v27 = vand.u32 2147483647, %v7649_v43 }
 0x28a   : > { %v7655_v37 = vadd.f32 1.0, %v5752_v29  ;;  %v4167_v42 = vmul.f32 %v7507_v1, %v4131_v30  ;;  %v4566_v7 = vand.u32 2147483648, %v7649_v43  ;;  %vm4560_vm9 = vweird.f32 %v7649_v43 }
 0x28b   : > { %5757 = vrcp.f32 %v7653_v20  ;;  %v4579_v9 = vand.u32 2147483647, %v7653_v20  ;;  %v4581_v45 = vand.u32 2147483648, %v7653_v20  ;;  %vm7675_vm10 = vcmp.eq.f32.partialorder %v4564_v27, 8.507059e+37 }
 0x28c   : > { %v4080_v33 = vpop.f32.mrf.mxu0  ;;  %5759 = vrcp.f32 %v7655_v37  ;;  %v7665_v28 = vadd.f32 %v7518_v58, %v4167_v42  ;;  %v4596_v44 = vand.u32 2147483648, %v7655_v37  ;;  %v4594_v2 = vand.u32 2147483647, %v7655_v37 }
 0x28d   : > { %v3682_v11 = vpop.f32.mrf.mxu3  ;;  %v4567_v0 = vor.u32 1.1754944e-38, %v4566_v7  ;;  %vm4575_vm11 = vweird.f32 %v7653_v20  ;;  %vm4590_vm12 = vweird.f32 %v7655_v37  ;;  %vm7683_vm13 = vcmp.eq.f32.partialorder %v4579_v9, 8.507059e+37 }
 0x28e   : > { %v2743_v61 = vpop.f32.mrf.mxu1  ;;  %v5754_v8 = vpop.eup %5753  ;;  %v3734_v24 = vadd.f32 %v3682_v11, %v3080_v38  ;;  %v5596_v39 = vmul.f32 -1.442695, %v7665_v28  ;;  %v4582_v57 = vor.u32 1.1754944e-38, %v4581_v45  ;;  %v4597_v16 = vor.u32 1.1754944e-38, %v4596_v44 }
 0x28f   : > { %v7662_v26 = vadd.f32 1.0, %v5754_v8  ;;  %v5756_v10 = vpop.eup %5755  ;;  %v2792_v13 = vadd.f32 %v2743_v61, %v6769_v32  ;;  %vm7689_vm15 = vcmp.eq.f32.partialorder %v4594_v2, 8.507059e+37 }
 0x290   : > { %v3031_v21 = vpop.f32.mrf.mxu2  ;;  %v4556_v56 = vmul.f32 %v5756_v10, %v7649_v43  ;;  %v4132_v51 = vadd.f32 %v4080_v33, %v3734_v24  ;;  %vm4561_vm14 = vweird.f32 %v5756_v10 }
 0x291   : > { %5761 = vrcp.f32 %v7662_v26  ;;  %v5758_v14 = vpop.eup %5757  ;;  %v3081_v25 = vadd.f32 %v3031_v21, %v2791_v34  ;;  %v4609_v41 = vand.u32 2147483647, %v7662_v26  ;;  %v4611_v18 = vand.u32 2147483648, %v7662_v26  ;;  %vm4562_vm3 = vmor %vm4560_vm9, %vm4561_vm14 }
 0x292   : > { %v4557_v53 = vsub.f32 1.0, %v4556_v56  ;;  %v5760_v63 = vpop.eup %5759  ;;  %v4571_v49 = vmul.f32 %v5758_v14, %v7653_v20  ;;  %5763 = vpow2.f32 %v5596_v39  ;;  %v4168_v6 = vmul.f32 %v7507_v1, %v4132_v51 }
 0x293   : > { %v4586_v22 = vmul.f32 %v5760_v63, %v7655_v37  ;;  %vm4576_vm0 = vweird.f32 %v5758_v14  ;;  %vm4591_vm7 = vweird.f32 %v5760_v63  ;;  %vm4605_vm5 = vweird.f32 %v7662_v26 }
 0x294   : > { %v4083_v4 = vpop.f32.mrf.mxu0  ;;  %v4558_v47 = vmul.f32 %v5756_v10, %v4557_v53  ;;  %v4572_v62 = vsub.f32 1.0, %v4571_v49  ;;  %v7701_v30 = vadd.f32 %v7518_v58, %v4168_v6  ;;  %vm4577_vm4 = vmor %vm4575_vm11, %vm4576_vm0  ;;  %vm4610_vm8 = vcmp.eq.f32.partialorder %v4609_v41, 8.507059e+37 }
 0x295   : > { %v3685_v40 = vpop.f32.mrf.mxu3  ;;  %v4587_v32 = vsub.f32 1.0, %v4586_v22  ;;  %vm4592_vm2 = vmor %vm4590_vm12, %vm4591_vm7  ;;  %v4612_v59 = vor.u32 1.1754944e-38, %v4611_v18 }
 0x296   : > { %v2746_v48 = vpop.f32.mrf.mxu1  ;;  %v3735_v36 = vadd.f32 %v3685_v40, %v3081_v25  ;;  %v4559_v35 = vadd.f32 %v5756_v10, %v4558_v47  ;;  %v4573_v23 = vmul.f32 %v5758_v14, %v4572_v62  ;;  %v5597_v43 = vmul.f32 -1.442695, %v7701_v30 }
 0x297   : > { %v5762_v46 = vpop.eup %5761  ;;  %v4588_v29 = vmul.f32 %v5760_v63, %v4587_v32 }
 0x298   : > { %v4601_v55 = vmul.f32 %v5762_v46, %v7662_v26  ;;  %v3033_v5 = vpop.f32.mrf.mxu2  ;;  %v4563_v15 = vsel %vm4562_vm3, %v5756_v10, %v4559_v35  ;;  %vm4606_vm1 = vweird.f32 %v5762_v46  ;;  %v4133_v3 = vadd.f32 %v4083_v4, %v3735_v36  ;;  %v5764_v11 = vpop.eup %5763 }
 0x299   : > { %v4568_v42 = vsel %vm7675_vm10, %v4567_v0, %v4563_v15  ;;  %v4574_v33 = vadd.f32 %v5758_v14, %v4573_v23  ;;  %v4589_v8 = vadd.f32 %v5760_v63, %v4588_v29  ;;  %v3082_v7 = vadd.f32 %v3033_v5, %v2792_v13  ;;  %vm4607_vm6 = vmor %vm4605_vm5, %vm4606_vm1 }
 0x29a   : > { %v4602_v38 = vsub.f32 1.0, %v4601_v55  ;;  %v4839_v61 = vmul.f32 %v4568_v42, %v7622_v50  ;;  %v4169_v27 = vmul.f32 %v7507_v1, %v4133_v3  ;;  %v7714_v9 = vadd.f32 1.0, %v5764_v11 }
 0x29b   : > { %v4578_v34 = vsel %vm4577_vm4, %v5758_v14, %v4574_v33  ;;  %5765 = vpow2.f32 %v5597_v43  ;;  %v4593_v20 = vsel %vm4592_vm2, %v5760_v63, %v4589_v8 }
 0x29c   : > { %v4603_v10 = vmul.f32 %v5762_v46, %v4602_v38  ;;  %v4085_v45 = vpop.f32.mrf.mxu0  ;;  %4871 = vst [vmem:[%s7183_s25 + $0x70] sm:$0xff] %v4839_v61  ;;  %v4583_v50 = vsel %vm7683_vm13, %v4582_v57, %v4578_v34  ;;  %v7721_v44 = vadd.f32 %v7518_v58, %v4169_v27  ;;  %v4598_v21 = vsel %vm7689_vm15, %v4597_v16, %v4593_v20 }
 0x29d   : > { %v3687_v24 = vpop.f32.mrf.mxu3  ;;  %v4840_v37 = vmul.f32 %v4583_v50, %v7630_v19  ;;  %5767 = vrcp.f32 %v7714_v9  ;;  %v4841_v2 = vmul.f32 %v4598_v21, %v7636_v52  ;;  %v7928_v19 = vld [vmem:[#allocation4_spill] sm:$0xff]  ;;  %v4624_v62 = vand.u32 2147483647, %v7714_v9 }
 0x29e   : > { %v4604_v56 = vadd.f32 %v5762_v46, %v4603_v10  ;;  %v2748_v26 = vpop.f32.mrf.mxu1  ;;  %v5598_v39 = vmul.f32 -1.442695, %v7721_v44  ;;  %v3736_v51 = vadd.f32 %v3687_v24, %v3082_v7  ;;  %v2793_v14 = vadd.f32 %v2746_v48, %v7928_v19 }
 0x29f   : > { %4872 = vst [vmem:[%s7183_s25 + $0x78] sm:$0xff] %v4840_v37  ;;  %v4626_v41 = vand.u32 2147483648, %v7714_v9  ;;  %v2794_v18 = vadd.f32 %v2748_v26, %v6812_v60  ;;  %vm4620_vm10 = vweird.f32 %v7714_v9  ;;  %vm4625_vm12 = vcmp.eq.f32.partialorder %v4624_v62, 8.507059e+37  ;;  %v7929_v62 = vld [vmem:[#allocation5_spill] sm:$0xff] }
 0x2a0   : > { %v4608_v0 = vsel %vm4607_vm6, %v5762_v46, %v4604_v56  ;;  %v3036_v53 = vpop.f32.mrf.mxu2  ;;  %4873 = vst [vmem:[%s7183_s25 + $0x80] sm:$0xff] %v4841_v2  ;;  %5769 = vpow2.f32 %v5598_v39  ;;  %v4134_v52 = vadd.f32 %v4085_v45, %v3736_v51 }
 0x2a1   : > { %v4613_v25 = vsel %vm4610_vm8, %v4612_v59, %v4608_v0  ;;  %v5766_v63 = vpop.eup %5765  ;;  %v3083_v17 = vadd.f32 %v3036_v53, %v2793_v14  ;;  %v4627_v3 = vor.u32 1.1754944e-38, %v4626_v41 }
 0x2a2   : > { %v4842_v49 = vmul.f32 %v4613_v25, %v7645_v12  ;;  %v7734_v57 = vadd.f32 1.0, %v5766_v63  ;;  %v4170_v4 = vmul.f32 %v7507_v1, %v4134_v52 }
 0x2a3   : > { %v5768_v16 = vpop.eup %5767 }
 0x2a4   : > { %4874 = vst [vmem:[%s7183_s25 + $0x88] sm:$0xff] %v4842_v49  ;;  %v4088_v13 = vpop.f32.mrf.mxu0  ;;  %v4616_v47 = vmul.f32 %v5768_v16, %v7714_v9  ;;  %5771 = vrcp.f32 %v7734_v57  ;;  %v7741_v31 = vadd.f32 %v7518_v58, %v4170_v4  ;;  %vm4621_vm9 = vweird.f32 %v5768_v16 }
 0x2a5   : > { %v3690_v22 = vpop.f32.mrf.mxu3  ;;  %vm4622_vm11 = vmor %vm4620_vm10, %vm4621_vm9  ;;  %v4639_v7 = vand.u32 2147483647, %v7734_v57  ;;  %v4641_v34 = vand.u32 2147483648, %v7734_v57  ;;  %vm4635_vm14 = vweird.f32 %v7734_v57 }
 0x2a6   : > { %v3737_v40 = vadd.f32 %v3690_v22, %v3083_v17  ;;  %v4617_v12 = vsub.f32 1.0, %v4616_v47  ;;  %v5770_v48 = vpop.eup %5769  ;;  %v5599_v6 = vmul.f32 -1.442695, %v7741_v31  ;;  %v2751_v23 = vpop.f32.mrf.mxu1 }
 0x2a7   : > { %v7746_v32 = vadd.f32 1.0, %v5770_v48  ;;  %v2795_v50 = vadd.f32 %v2751_v23, %v6830_v54  ;;  %v4642_v59 = vor.u32 1.1754944e-38, %v4641_v34  ;;  %vm4640_vm0 = vcmp.eq.f32.partialorder %v4639_v7, 8.507059e+37  ;;  %v7930_v34 = vld [vmem:[#allocation6_spill] sm:$0xff] }
 0x2a8   : > { %v4135_v36 = vadd.f32 %v4088_v13, %v3737_v40  ;;  %v3038_v46 = vpop.f32.mrf.mxu2  ;;  %v4618_v35 = vmul.f32 %v5768_v16, %v4617_v12  ;;  %5773 = vpow2.f32 %v5599_v6 }
 0x2a9   : > { %5775 = vrcp.f32 %v7746_v32  ;;  %v3084_v29 = vadd.f32 %v3038_v46, %v2794_v18  ;;  %v4654_v14 = vand.u32 2147483647, %v7746_v32  ;;  %v4656_v53 = vand.u32 2147483648, %v7746_v32 }
 0x2aa   : > { %v4171_v55 = vmul.f32 %v7507_v1, %v4135_v36  ;;  %v5772_v5 = vpop.eup %5771  ;;  %v4619_v15 = vadd.f32 %v5768_v16, %v4618_v35  ;;  %vm4650_vm7 = vweird.f32 %v7746_v32 }
 0x2ab   : > { %v4631_v42 = vmul.f32 %v5772_v5, %v7734_v57  ;;  %vm4636_vm13 = vweird.f32 %v5772_v5  ;;  %vm4655_vm4 = vcmp.eq.f32.partialorder %v4654_v14, 8.507059e+37 }
 0x2ac   : > { %v7754_v33 = vadd.f32 %v7518_v58, %v4171_v55  ;;  %v4090_v38 = vpop.f32.mrf.mxu0  ;;  %v4623_v60 = vsel %vm4622_vm11, %v5768_v16, %v4619_v15  ;;  %vm4637_vm15 = vmor %vm4635_vm14, %vm4636_vm13 }
 0x2ad   : > { %v3692_v43 = vpop.f32.mrf.mxu3  ;;  %v4628_v11 = vsel %vm4625_vm12, %v4627_v3, %v4623_v60  ;;  %v4632_v61 = vsub.f32 1.0, %v4631_v42 }
 0x2ae   : > { %v5600_v8 = vmul.f32 -1.442695, %v7754_v33  ;;  %v4843_v27 = vmul.f32 %v4628_v11, %v7665_v28  ;;  %v3738_v10 = vadd.f32 %v3692_v43, %v3084_v29  ;;  %v5774_v9 = vpop.eup %5773  ;;  %v2753_v26 = vpop.f32.mrf.mxu1 }
 0x2af   : > { %v4633_v45 = vmul.f32 %v5772_v5, %v4632_v61  ;;  %v5776_v24 = vpop.eup %5775  ;;  %v7762_v37 = vadd.f32 1.0, %v5774_v9  ;;  %v2796_v41 = vadd.f32 %v2753_v26, %v7929_v62 }
 0x2b0   : > { %5777 = vpow2.f32 %v5600_v8  ;;  %v3041_v20 = vpop.f32.mrf.mxu2  ;;  %4875 = vst [vmem:[%s7183_s25 + $0x90] sm:$0xff] %v4843_v27  ;;  %v4136_v21 = vadd.f32 %v4090_v38, %v3738_v10  ;;  %v4646_v28 = vmul.f32 %v5776_v24, %v7746_v32  ;;  %vm4651_vm3 = vweird.f32 %v5776_v24 }
 0x2b1   : > { %v4634_v56 = vadd.f32 %v5772_v5, %v4633_v45  ;;  %v3085_v2 = vadd.f32 %v3041_v20, %v2795_v50  ;;  %5779 = vrcp.f32 %v7762_v37  ;;  %vm4652_vm1 = vmor %vm4650_vm7, %vm4651_vm3  ;;  %v4669_v32 = vand.u32 2147483647, %v7762_v37 }
 0x2b2   : > { %v4647_v54 = vsub.f32 1.0, %v4646_v28  ;;  %v4172_v39 = vmul.f32 %v7507_v1, %v4136_v21  ;;  %v4671_v23 = vand.u32 2147483648, %v7762_v37  ;;  %vm4665_vm5 = vweird.f32 %v7762_v37 }
 0x2b3   : > { %v4638_v0 = vsel %vm4637_vm15, %v5772_v5, %v4634_v56  ;;  %vm4670_vm6 = vcmp.eq.f32.partialorder %v4669_v32, 8.507059e+37 }
 0x2b4   : > { %v4093_v51 = vpop.f32.mrf.mxu0  ;;  %v4643_v19 = vsel %vm4640_vm0, %v4642_v59, %v4638_v0  ;;  %v4648_v52 = vmul.f32 %v5776_v24, %v4647_v54  ;;  %v7772_v17 = vadd.f32 %v7518_v58, %v4172_v39  ;;  %v4672_v27 = vor.u32 1.1754944e-38, %v4671_v23 }
 0x2b5   : > { %v3695_v25 = vpop.f32.mrf.mxu3  ;;  %v4844_v49 = vmul.f32 %v4643_v19, %v7701_v30  ;;  %v4657_v30 = vor.u32 1.1754944e-38, %v4656_v53 }
 0x2b6   : > { %v5778_v63 = vpop.eup %5777  ;;  %v3739_v57 = vadd.f32 %v3695_v25, %v3085_v2  ;;  %v4649_v4 = vadd.f32 %v5776_v24, %v4648_v52  ;;  %v5601_v13 = vmul.f32 -1.442695, %v7772_v17  ;;  %v2756_v15 = vpop.f32.mrf.mxu1 }
 0x2b7   : > { %v7774_v16 = vadd.f32 1.0, %v5778_v63  ;;  %4876 = vst [vmem:[%s7183_s25 + $0x98] sm:$0xff] %v4844_v49  ;;  %v5780_v40 = vpop.eup %5779  ;;  %v2797_v10 = vadd.f32 %v2756_v15, %v7930_v34 }
 0x2b8   : > { %v4137_v47 = vadd.f32 %v4093_v51, %v3739_v57  ;;  %v3043_v22 = vpop.f32.mrf.mxu2  ;;  %v4653_v12 = vsel %vm4652_vm1, %v5776_v24, %v4649_v4  ;;  %v4661_v48 = vmul.f32 %v5780_v40, %v7762_v37  ;;  %vm4666_vm2 = vweird.f32 %v5780_v40 }
 0x2b9   : > { %5781 = vrcp.f32 %v7774_v16  ;;  %v4658_v6 = vsel %vm4655_vm4, %v4657_v30, %v4653_v12  ;;  %v3086_v18 = vadd.f32 %v3043_v22, %v2796_v41  ;;  %vm4667_vm8 = vmor %vm4665_vm5, %vm4666_vm2  ;;  %v4684_v50 = vand.u32 2147483647, %v7774_v16 }
 0x2ba   : > { %5783 = vpow2.f32 %v5601_v13  ;;  %v4173_v36 = vmul.f32 %v7507_v1, %v4137_v47  ;;  %v4845_v46 = vmul.f32 %v4658_v6, %v7721_v44  ;;  %v4662_v35 = vsub.f32 1.0, %v4661_v48 }
 0x2bb   : > { %v4686_v37 = vand.u32 2147483648, %v7774_v16  ;;  %vm4680_vm10 = vweird.f32 %v7774_v16  ;;  %vm4685_vm12 = vcmp.eq.f32.partialorder %v4684_v50, 8.507059e+37 }
 0x2bc   : > { %v7788_v55 = vadd.f32 %v7518_v58, %v4173_v36  ;;  %4877 = vst [vmem:[%s7183_s25 + $0xa0] sm:$0xff] %v4845_v46  ;;  %v4663_v29 = vmul.f32 %v5780_v40, %v4662_v35  ;;  %v4095_v3 = vpop.f32.mrf.mxu0 }
 0x2bd   : > { %v3697_v5 = vpop.f32.mrf.mxu3  ;;  %v4687_v54 = vor.u32 1.1754944e-38, %v4686_v37 }
 0x2be   : > { %v3740_v42 = vadd.f32 %v3697_v5, %v3086_v18  ;;  %v5602_v44 = vmul.f32 -1.442695, %v7788_v55  ;;  %v4664_v43 = vadd.f32 %v5780_v40, %v4663_v29  ;;  %v2758_v51 = vpop.f32.mrf.mxu1 }
 0x2bf   : > { %v5782_v38 = vpop.eup %5781 }
 0x2c0   : > { %v5784_v60 = vpop.eup %5783  ;;  %v4676_v11 = vmul.f32 %v5782_v38, %v7774_v16  ;;  %v4138_v61 = vadd.f32 %v4095_v3, %v3740_v42  ;;  %v3046_v8 = vpop.f32.mrf.mxu2  ;;  %5785 = vpow2.f32 %v5602_v44  ;;  %v4668_v9 = vsel %vm4667_vm8, %v5780_v40, %v4664_v43  ;;  %v7931_v16 = vld [vmem:[#allocation7_spill] sm:$0xff] }
 0x2c1   : > { %v4336_v7 = vadd.f32 1.0, %v5784_v60  ;;  %v4673_v24 = vsel %vm4670_vm6, %v4672_v27, %v4668_v9  ;;  %vm4681_vm9 = vweird.f32 %v5782_v38  ;;  %v3087_v2 = vadd.f32 %v3046_v8, %v2797_v10 }
 0x2c2   : > { %v4677_v45 = vsub.f32 1.0, %v4676_v11  ;;  %v4174_v20 = vmul.f32 %v7507_v1, %v4138_v61  ;;  %v4846_v21 = vmul.f32 %v4673_v24, %v7741_v31  ;;  %vm4682_vm11 = vmor %vm4680_vm10, %vm4681_vm9  ;;  %v2798_v4 = vadd.f32 %v2758_v51, %v7931_v16  ;;  %v7933_v16 = vld [vmem:[#allocation9_spill] sm:$0xff] }
 0x2c3   : > { %5787 = vrcp.f32 %v4336_v7  ;;  %v4701_v40 = vand.u32 2147483648, %v4336_v7  ;;  %v4699_v62 = vand.u32 2147483647, %v4336_v7  ;;  %vm4695_vm14 = vweird.f32 %v4336_v7 }
 0x2c4   : > { %v4678_v56 = vmul.f32 %v5782_v38, %v4677_v45  ;;  %v7800_v28 = vadd.f32 %v7518_v58, %v4174_v20  ;;  %4878 = vst [vmem:[%s7183_s25 + $0xa8] sm:$0xff] %v4846_v21  ;;  %v4098_v14 = vpop.f32.mrf.mxu0 }
 0x2c5   : > { %v4702_v32 = vor.u32 1.1754944e-38, %v4701_v40  ;;  %vm4700_vm0 = vcmp.eq.f32.partialorder %v4699_v62, 8.507059e+37  ;;  %v7835_v62 = vld [vmem:[%s7874_s3] ss:$0 sm:$0xff] }
 0x2c6   : > { %v4679_v59 = vadd.f32 %v5782_v38, %v4678_v56  ;;  %v5603_v26 = vmul.f32 -1.442695, %v7800_v28  ;;  %v5786_v0 = vpop.eup %5785 }
 0x2c7   : > { %v3700_v39 = vpop.f32.mrf.mxu3  ;;  %v4337_v31 = vadd.f32 1.0, %v5786_v0 }
 0x2c8   : > { %v4683_v19 = vsel %vm4682_vm11, %v5782_v38, %v4679_v59  ;;  %5789 = vpow2.f32 %v5603_v26  ;;  %v3741_v53 = vadd.f32 %v3700_v39, %v3087_v2  ;;  %v3048_v49 = vpop.f32.mrf.mxu2  ;;  %v7932_v2 = vld [vmem:[#allocation8_spill] sm:$0xff] }
 0x2c9   : > { %v5788_v25 = vpop.eup %5787  ;;  %v4688_v63 = vsel %vm4685_vm12, %v4687_v54, %v4683_v19  ;;  %5791 = vrcp.f32 %v4337_v31  ;;  %v3088_v22 = vadd.f32 %v3048_v49, %v2798_v4  ;;  %v4716_v44 = vand.u32 2147483648, %v4337_v31 }
 0x2ca   : > { %v4847_v52 = vmul.f32 %v4688_v63, %v7754_v33  ;;  %v4691_v57 = vmul.f32 %v5788_v25, %v4336_v7  ;;  %v4139_v13 = vadd.f32 %v4098_v14, %v3741_v53  ;;  %vm4696_vm13 = vweird.f32 %v5788_v25 }
 0x2cb   : > { %vm4697_vm15 = vmor %vm4695_vm14, %vm4696_vm13  ;;  %v4714_v43 = vand.u32 2147483647, %v4337_v31  ;;  %vm4710_vm7 = vweird.f32 %v4337_v31  ;;  %v4717_v34 = vor.u32 1.1754944e-38, %v4716_v44 }
 0x2cc   : > { %4879 = vst [vmem:[%s7183_s25 + $0xb0] sm:$0xff] %v4847_v52  ;;  %v4692_v47 = vsub.f32 1.0, %v4691_v57  ;;  %v4175_v30 = vmul.f32 %v7507_v1, %v4139_v13  ;;  %v4100_v15 = vpop.f32.mrf.mxu0 }
 0x2cd   : > { %v2761_v61 = vpop.f32.mrf.mxu1  ;;  %vm4715_vm4 = vcmp.eq.f32.partialorder %v4714_v43, 8.507059e+37 }
 0x2ce   : > { %v5790_v12 = vpop.eup %5789  ;;  %v4693_v48 = vmul.f32 %v5788_v25, %v4692_v47  ;;  %v7810_v6 = vadd.f32 %v7518_v58, %v4175_v30  ;;  %v2799_v59 = vadd.f32 %v2761_v61, %v7932_v2  ;;  %v7829_v30 = vld [vmem:[%s7873_s2] ss:$0 sm:$0xff] }
 0x2cf   : > { %v4338_v41 = vadd.f32 1.0, %v5790_v12  ;;  %v3702_v33 = vpop.f32.mrf.mxu3  ;;  %v5792_v36 = vpop.eup %5791 }
 0x2d0   : > { %v4694_v46 = vadd.f32 %v5788_v25, %v4693_v48  ;;  %v3742_v35 = vadd.f32 %v3702_v33, %v3088_v22  ;;  %v4706_v18 = vmul.f32 %v5792_v36, %v4337_v31  ;;  %v5604_v5 = vmul.f32 -1.442695, %v7810_v6  ;;  %v3051_v45 = vpop.f32.mrf.mxu2 }
 0x2d1   : > { %5793 = vrcp.f32 %v4338_v41  ;;  %vm4711_vm3 = vweird.f32 %v5792_v36  ;;  %v4731_v37 = vand.u32 2147483648, %v4338_v41  ;;  %vm4725_vm5 = vweird.f32 %v4338_v41 }
 0x2d2   : > { %v4698_v23 = vsel %vm4697_vm15, %v5788_v25, %v4694_v46  ;;  %v4707_v3 = vsub.f32 1.0, %v4706_v18  ;;  %v4140_v42 = vadd.f32 %v4100_v15, %v3742_v35  ;;  %5795 = vpow2.f32 %v5604_v5  ;;  %vm4712_vm1 = vmor %vm4710_vm7, %vm4711_vm3 }
 0x2d3   : > { %v4703_v29 = vsel %vm4700_vm0, %v4702_v32, %v4698_v23  ;;  %v3089_v0 = vadd.f32 %v3051_v45, %v2799_v59  ;;  %v4732_v54 = vor.u32 1.1754944e-38, %v4731_v37 }
 0x2d4   : > { %v4848_v38 = vmul.f32 %v4703_v29, %v7772_v17  ;;  %v4708_v60 = vmul.f32 %v5792_v36, %v4707_v3  ;;  %v4176_v11 = vmul.f32 %v7507_v1, %v4140_v42 }
 0x2d5   : > { %v2763_v51 = vpop.f32.mrf.mxu1 }
 0x2d6   : > { %4880 = vst [vmem:[%s7183_s25 + $0xb8] sm:$0xff] %v4848_v38  ;;  %v4709_v27 = vadd.f32 %v5792_v36, %v4708_v60  ;;  %v7817_v7 = vadd.f32 %v7518_v58, %v4176_v11  ;;  %v4729_v58 = vand.u32 2147483647, %v4338_v41  ;;  %v2800_v4 = vadd.f32 %v2763_v51, %v7933_v16 }
 0x2d7   : > { %v5794_v8 = vpop.eup %5793 }
 0x2d8   : > { %v4721_v10 = vmul.f32 %v5794_v8, %v4338_v41  ;;  %v4713_v17 = vsel %vm4712_vm1, %v5792_v36, %v4709_v27  ;;  %v5605_v9 = vmul.f32 -1.442695, %v7817_v7  ;;  %v5796_v50 = vpop.eup %5795  ;;  %vm4726_vm2 = vweird.f32 %v5794_v8  ;;  %v3053_v52 = vpop.f32.mrf.mxu2 }
 0x2d9   : > { %v4718_v20 = vsel %vm4715_vm4, %v4717_v34, %v4713_v17  ;;  %v4339_v21 = vadd.f32 1.0, %v5796_v50  ;;  %vm4727_vm6 = vmor %vm4725_vm5, %vm4726_vm2  ;;  %vm4730_vm8 = vcmp.eq.f32.partialorder %v4729_v58, 8.507059e+37  ;;  %v3090_v22 = vadd.f32 %v3053_v52, %v2800_v4 }
 0x2da   : > { %v4722_v1 = vsub.f32 1.0, %v4721_v10  ;;  %v4849_v24 = vmul.f32 %v4718_v20, %v7788_v55  ;;  %5797 = vpow2.f32 %v5605_v9 }
 0x2db   : > { %5799 = vrcp.f32 %v4339_v21  ;;  %v4746_v40 = vand.u32 2147483648, %v4339_v21  ;;  %v4744_v48 = vand.u32 2147483647, %v4339_v21  ;;  %vm4740_vm10 = vweird.f32 %v4339_v21 }
 0x2dc   : > { %v4723_v56 = vmul.f32 %v5794_v8, %v4722_v1  ;;  %4881 = vst [vmem:[%s7183_s25 + $0xc0] sm:$0xff] %v4849_v24  ;;  %v7934_v1 = vld [vmem:[#allocation10_spill] sm:$0xff] }
 0x2dd   : > { %v4103_v31 = vpop.f32.mrf.mxu0  ;;  %v4747_v32 = vor.u32 1.1754944e-38, %v4746_v40  ;;  %vm4745_vm12 = vcmp.eq.f32.partialorder %v4744_v48, 8.507059e+37 }
 0x2de   : > { %v4724_v26 = vadd.f32 %v5794_v8, %v4723_v56 }
 0x2e0   : > { %v4728_v39 = vsel %vm4727_vm6, %v5794_v8, %v4724_v26  ;;  %v5798_v55 = vpop.eup %5797  ;;  %v3056_v9 = vpop.f32.mrf.mxu2 }
 0x2e1   : > { %v4733_v19 = vsel %vm4730_vm8, %v4732_v54, %v4728_v39  ;;  %v3705_v14 = vpop.f32.mrf.mxu3  ;;  %v4340_v25 = vadd.f32 1.0, %v5798_v55  ;;  %v5800_v49 = vpop.eup %5799  ;;  %v7935_v55 = vld [vmem:[#allocation11_spill] sm:$0xff] }
 0x2e2   : > { %v4850_v53 = vmul.f32 %v4733_v19, %v7800_v28  ;;  %v3743_v63 = vadd.f32 %v3705_v14, %v3089_v0  ;;  %v4736_v57 = vmul.f32 %v5800_v49, %v4339_v21  ;;  %vm4741_vm9 = vweird.f32 %v5800_v49 }
 0x2e3   : > { %5801 = vrcp.f32 %v4340_v25  ;;  %vm4742_vm11 = vmor %vm4740_vm10, %vm4741_vm9  ;;  %v4761_v44 = vand.u32 2147483648, %v4340_v25  ;;  %v4759_v11 = vand.u32 2147483647, %v4340_v25  ;;  %vm4755_vm14 = vweird.f32 %v4340_v25 }
 0x2e4   : > { %4882 = vst [vmem:[%s7183_s25 + $0xc8] sm:$0xff] %v4850_v53  ;;  %v4141_v13 = vadd.f32 %v4103_v31, %v3743_v63  ;;  %v4737_v47 = vsub.f32 1.0, %v4736_v57 }
 0x2e5   : > { %v4105_v5 = vpop.f32.mrf.mxu0  ;;  %v4762_v34 = vor.u32 1.1754944e-38, %v4761_v44  ;;  %vm4760_vm0 = vcmp.eq.f32.partialorder %v4759_v11, 8.507059e+37 }
 0x2e6   : > { %v4177_v28 = vmul.f32 %v7829_v30, %v4141_v13  ;;  %v4738_v12 = vmul.f32 %v5800_v49, %v4737_v47 }
 0x2e8   : > { %v7838_v41 = vadd.f32 %v7835_v62, %v4177_v28  ;;  %v4739_v46 = vadd.f32 %v5800_v49, %v4738_v12  ;;  %v3058_v39 = vpop.f32.mrf.mxu2 }
 0x2e9   : > { %v3707_v33 = vpop.f32.mrf.mxu3  ;;  %v5802_v36 = vpop.eup %5801 }
 0x2ea   : > { %v3744_v35 = vadd.f32 %v3707_v33, %v3090_v22  ;;  %v4751_v18 = vmul.f32 %v5802_v36, %v4340_v25  ;;  %v5606_v23 = vmul.f32 -1.442695, %v7838_v41  ;;  %v4743_v15 = vsel %vm4742_vm11, %v5800_v49, %v4739_v46  ;;  %v2766_v8 = vpop.f32.mrf.mxu1 }
 0x2eb   : > { %v4748_v3 = vsel %vm4745_vm12, %v4747_v32, %v4743_v15  ;;  %vm4756_vm13 = vweird.f32 %v5802_v36  ;;  %v2801_v24 = vadd.f32 %v2766_v8, %v7934_v1 }
 0x2ec   : > { %v4142_v29 = vadd.f32 %v4105_v5, %v3744_v35  ;;  %v4752_v42 = vsub.f32 1.0, %v4751_v18  ;;  %5803 = vpow2.f32 %v5606_v23  ;;  %v4851_v38 = vmul.f32 %v4748_v3, %v7810_v6  ;;  %vm4757_vm15 = vmor %vm4755_vm14, %vm4756_vm13 }
 0x2ed   : > { %v3091_v37 = vadd.f32 %v3056_v9, %v2801_v24 }
 0x2ee   : > { %v4178_v60 = vmul.f32 %v7829_v30, %v4142_v29  ;;  %v4753_v43 = vmul.f32 %v5802_v36, %v4752_v42  ;;  %4883 = vst [vmem:[%s7183_s25 + $0xd0] sm:$0xff] %v4851_v38 }
 0x2f0   : > { %v7845_v61 = vadd.f32 %v7835_v62, %v4178_v60  ;;  %v4754_v27 = vadd.f32 %v5802_v36, %v4753_v43 }
 0x2f2   : > { %v5607_v10 = vmul.f32 -1.442695, %v7845_v61  ;;  %v5804_v17 = vpop.eup %5803  ;;  %v4758_v6 = vsel %vm4757_vm15, %v5802_v36, %v4754_v27  ;;  %v2768_v56 = vpop.f32.mrf.mxu1 }
 0x2f3   : > { %v4763_v45 = vsel %vm4760_vm0, %v4762_v34, %v4758_v6  ;;  %v4341_v50 = vadd.f32 1.0, %v5804_v17  ;;  %v2802_v19 = vadd.f32 %v2768_v56, %v7935_v55 }
 0x2f4   : > { %5805 = vpow2.f32 %v5607_v10  ;;  %v4852_v20 = vmul.f32 %v4763_v45, %v7817_v7  ;;  %v4108_v2 = vpop.f32.mrf.mxu0 }
 0x2f5   : > { %5807 = vrcp.f32 %v4341_v50  ;;  %v4776_v7 = vand.u32 2147483648, %v4341_v50  ;;  %v3092_v53 = vadd.f32 %v3058_v39, %v2802_v19  ;;  %v4774_v63 = vand.u32 2147483647, %v4341_v50 }
 0x2f6   : > { %4884 = vst [vmem:[%s7183_s25 + $0xd8] sm:$0xff] %v4852_v20  ;;  %vm4770_vm7 = vweird.f32 %v4341_v50 }
 0x2f7   : > { %v4777_v4 = vor.u32 1.1754944e-38, %v4776_v7  ;;  %vm4775_vm4 = vcmp.eq.f32.partialorder %v4774_v63, 8.507059e+37 }
 0x2fa   : > { %v5806_v21 = vpop.eup %5805 }
 0x2fb   : > { %v4342_v58 = vadd.f32 1.0, %v5806_v21  ;;  %v3710_v59 = vpop.f32.mrf.mxu3  ;;  %v5808_v26 = vpop.eup %5807 }
 0x2fc   : > { %v3745_v0 = vadd.f32 %v3710_v59, %v3091_v37  ;;  %v4766_v54 = vmul.f32 %v5808_v26, %v4341_v50  ;;  %vm4771_vm3 = vweird.f32 %v5808_v26  ;;  %v4110_v28 = vpop.f32.mrf.mxu0 }
 0x2fd   : > { %5809 = vrcp.f32 %v4342_v58  ;;  %vm4772_vm1 = vmor %vm4770_vm7, %vm4771_vm3  ;;  %v4791_v46 = vand.u32 2147483648, %v4342_v58  ;;  %v4789_v32 = vand.u32 2147483647, %v4342_v58  ;;  %vm4785_vm5 = vweird.f32 %v4342_v58 }
 0x2fe   : > { %v4143_v51 = vadd.f32 %v4108_v2, %v3745_v0  ;;  %v4767_v31 = vsub.f32 1.0, %v4766_v54 }
 0x2ff   : > { %v4792_v15 = vor.u32 1.1754944e-38, %v4791_v46  ;;  %vm4790_vm8 = vcmp.eq.f32.partialorder %v4789_v32, 8.507059e+37 }
 0x300   : > { %v4179_v14 = vmul.f32 %v7829_v30, %v4143_v51  ;;  %v4768_v25 = vmul.f32 %v5808_v26, %v4767_v31 }
 0x302   : > { %v4215_v49 = vadd.f32 %v7835_v62, %v4179_v14  ;;  %v4769_v57 = vadd.f32 %v5808_v26, %v4768_v25 }
 0x303   : > { %v5810_v52 = vpop.eup %5809  ;;  %v3712_v16 = vpop.f32.mrf.mxu3 }
 0x304   : > { %v4781_v13 = vmul.f32 %v5810_v52, %v4342_v58  ;;  %v5608_v47 = vmul.f32 -1.442695, %v4215_v49  ;;  %v3746_v22 = vadd.f32 %v3712_v16, %v3092_v53  ;;  %v4773_v40 = vsel %vm4772_vm1, %v5808_v26, %v4769_v57 }
 0x305   : > { %v4778_v12 = vsel %vm4775_vm4, %v4777_v4, %v4773_v40  ;;  %vm4786_vm2 = vweird.f32 %v5810_v52 }
 0x306   : > { %v4782_v48 = vsub.f32 1.0, %v4781_v13  ;;  %5811 = vpow2.f32 %v5608_v47  ;;  %v4144_v33 = vadd.f32 %v4110_v28, %v3746_v22  ;;  %v4853_v36 = vmul.f32 %v4778_v12, %v7838_v41  ;;  %vm4787_vm6 = vmor %vm4785_vm5, %vm4786_vm2 }
 0x308   : > { %v4783_v35 = vmul.f32 %v5810_v52, %v4782_v48  ;;  %v4180_v18 = vmul.f32 %v7829_v30, %v4144_v33  ;;  %4885 = vst [vmem:[%s7183_s25 + $0xe0] sm:$0xff] %v4853_v36 }
 0x30a   : > { %v4784_v23 = vadd.f32 %v5810_v52, %v4783_v35  ;;  %v4216_v5 = vadd.f32 %v7835_v62, %v4180_v18 }
 0x30c   : > { %v5812_v29 = vpop.eup %5811  ;;  %v4788_v3 = vsel %vm4787_vm6, %v5810_v52, %v4784_v23  ;;  %v5609_v42 = vmul.f32 -1.442695, %v4216_v5 }
 0x30d   : > { %v4793_v38 = vsel %vm4790_vm8, %v4792_v15, %v4788_v3  ;;  %v4343_v41 = vadd.f32 1.0, %v5812_v29 }
 0x30e   : > { %v4854_v44 = vmul.f32 %v4793_v38, %v7845_v61  ;;  %5813 = vpow2.f32 %v5609_v42 }
 0x30f   : > { %5815 = vrcp.f32 %v4343_v41  ;;  %v4806_v62 = vand.u32 2147483648, %v4343_v41  ;;  %v4804_v34 = vand.u32 2147483647, %v4343_v41  ;;  %vm4800_vm10 = vweird.f32 %v4343_v41 }
 0x310   : > { %4886 = vst [vmem:[%s7183_s25 + $0xe8] sm:$0xff] %v4854_v44 }
 0x311   : > { %v4807_v6 = vor.u32 1.1754944e-38, %v4806_v62  ;;  %vm4805_vm12 = vcmp.eq.f32.partialorder %v4804_v34, 8.507059e+37 }
 0x314   : > { %v5814_v30 = vpop.eup %5813 }
 0x315   : > { %v5816_v60 = vpop.eup %5815  ;;  %v4344_v43 = vadd.f32 1.0, %v5814_v30 }
 0x316   : > { %v4796_v11 = vmul.f32 %v5816_v60, %v4343_v41  ;;  %vm4801_vm9 = vweird.f32 %v5816_v60 }
 0x317   : > { %5817 = vrcp.f32 %v4344_v43  ;;  %vm4802_vm11 = vmor %vm4800_vm10, %vm4801_vm9  ;;  %v4821_v1 = vand.u32 2147483648, %v4344_v43  ;;  %v4819_v37 = vand.u32 2147483647, %v4344_v43  ;;  %vm4815_vm14 = vweird.f32 %v4344_v43 }
 0x318   : > { %v4797_v8 = vsub.f32 1.0, %v4796_v11 }
 0x319   : > { %v4822_v56 = vor.u32 1.1754944e-38, %v4821_v1  ;;  %vm4820_vm0 = vcmp.eq.f32.partialorder %v4819_v37, 8.507059e+37 }
 0x31a   : > { %v4798_v27 = vmul.f32 %v5816_v60, %v4797_v8 }
 0x31c   : > { %v4799_v10 = vadd.f32 %v5816_v60, %v4798_v27 }
 0x31d   : > { %v5818_v17 = vpop.eup %5817 }
 0x31e   : > { %v4803_v61 = vsel %vm4802_vm11, %v5816_v60, %v4799_v10  ;;  %v4811_v9 = vmul.f32 %v5818_v17, %v4344_v43  ;;  %vm4816_vm13 = vweird.f32 %v5818_v17 }
 0x31f   : > { %v4808_v45 = vsel %vm4805_vm12, %v4807_v6, %v4803_v61  ;;  %vm4817_vm15 = vmor %vm4815_vm14, %vm4816_vm13 }
 0x320   : > { %v4855_v50 = vmul.f32 %v4808_v45, %v4215_v49  ;;  %v4812_v20 = vsub.f32 1.0, %v4811_v9 }
 0x322   : > { %4887 = vst [vmem:[%s7183_s25 + $0xf0] sm:$0xff] %v4855_v50  ;;  %v4813_v24 = vmul.f32 %v5818_v17, %v4812_v20 }
 0x324   : > { %v4814_v21 = vadd.f32 %v5818_v17, %v4813_v24 }
 0x326   : > { %v4818_v58 = vsel %vm4817_vm15, %v5818_v17, %v4814_v21 }
 0x327   : > { %v4823_v2 = vsel %vm4820_vm0, %v4822_v56, %v4818_v58 }
 0x328   : > { %v4856_v59 = vmul.f32 %v4823_v2, %v4216_v5 }
 0x32a   : > { %4888 = vst [vmem:[%s7183_s25 + $0xf8] sm:$0xff] %v4856_v59 }
 0x32b PF: > { %s14_s17 = sadd.s32 1, %s5895_s17   ;;  %s7936_s15 = smov %s5891_s16 }
 0x32c   : > { %p11_p5 = scmp.ge.s32.totalorder %s14_s17, 4   ;;  %s7937_s16 = smov %s7939_s18 }
 0x32e   :  { %13 = sbr.rel (!%p11_p5) target bundleno = 2 (0x2), region = 77 }

</bundles_post_ra>
